<compile_context>
chip_gen: v5e
topology: v5e:2x2
jax: 0.10.0
libtpu: 0.0.40
codegen_flags: <defaults>
</compile_context>

<pallas_src>
import jax
import jax.numpy as jnp
from jax import lax
from jax.experimental import pallas as pl
from jax.experimental.pallas import tpu as pltpu


# ----------------------------- Pallas kernels -------------------------------

def _mm_kernel(x_ref, w_ref, o_ref):
    o_ref[...] = jnp.dot(x_ref[...].astype(jnp.bfloat16), w_ref[...],
                         preferred_element_type=jnp.float32)


def _mm_res_kernel(x_ref, w_ref, r_ref, o_ref):
    o_ref[...] = r_ref[...] + jnp.dot(x_ref[...].astype(jnp.bfloat16), w_ref[...],
                                      preferred_element_type=jnp.float32)


def _ln_mm_kernel(x_ref, g_ref, b_ref, w_ref, o_ref):
    # WithBias LayerNorm over the channel (last) dim, fused into the 1x1 conv.
    x = x_ref[...]
    mu = jnp.mean(x, axis=-1, keepdims=True)
    var = jnp.mean((x - mu) ** 2, axis=-1, keepdims=True)          # unbiased=False
    xn = (x - mu) * lax.rsqrt(var + 1e-5) * g_ref[...] + b_ref[...]
    o_ref[...] = jnp.dot(xn.astype(jnp.bfloat16), w_ref[...],
                         preferred_element_type=jnp.float32)


def _glu_mm_res_kernel(x_ref, w_ref, r_ref, o_ref):
    # gated-GELU (exact erf, f32) + 1x1 conv matmul + residual add, fused.
    x1 = x_ref[:, 0, :]
    x2 = x_ref[:, 1, :]
    g = jax.nn.gelu(x1, approximate=False) * x2
    o_ref[...] = r_ref[...] + jnp.dot(g.astype(jnp.bfloat16), w_ref[...],
                                      preferred_element_type=jnp.float32)


def _conv3x3_kernel(x_ref, w_ref, o_ref):
    # x_ref: (1, H+2, W+2, Cin) f32, w_ref: (9, Cin, Cout) bf16, o_ref: (1, H, W, Cout)
    # 3x3 conv as shifted matmuls accumulated in registers (no im2col in HBM).
    _, H, W, Cout = o_ref.shape
    for y in range(H):
        acc = jnp.zeros((W, Cout), jnp.float32)
        for dy in range(3):
            for dx in range(3):
                patch = x_ref[0, y + dy, dx:dx + W, :]              # (W, Cin)
                acc = acc + jnp.dot(patch.astype(jnp.bfloat16), w_ref[dy * 3 + dx],
                                    preferred_element_type=jnp.float32)
        o_ref[0, y] = acc


def _dwconv3x3_kernel(x_ref, w_ref, o_ref):
    # x_ref: (1, H+2, W+2, C) f32, w_ref: (9, 1, C) f32, o_ref: (1, H, W, C)
    _, H, W, C = o_ref.shape
    acc = jnp.zeros((H, W, C), jnp.float32)
    for dy in range(3):
        for dx in range(3):
            acc = acc + x_ref[0, dy:dy + H, dx:dx + W, :] * w_ref[dy * 3 + dx]
    o_ref[0] = acc


def _attn_kernel(q_ref, k_ref, v_ref, t_ref, o_ref):
    # One (batch, head) per grid step: fused L2-normalize + dot + softmax + dot.
    g = pl.program_id(0)
    q = q_ref[0]                       # (c, hw) f32
    k = k_ref[0]
    v = v_ref[0]
    t = t_ref[g]                       # per-(batch, head) temperature from SMEM
    # F.normalize(x, dim=-1): x / max(||x||, 1e-12) == x * rsqrt(max(||x||^2, 1e-24))
    qn = q * lax.rsqrt(jnp.maximum(jnp.sum(q * q, axis=-1, keepdims=True), 1e-24))
    kn = k * lax.rsqrt(jnp.maximum(jnp.sum(k * k, axis=-1, keepdims=True), 1e-24))
    attn = lax.dot_general(qn.astype(jnp.bfloat16), kn.astype(jnp.bfloat16),
                           (((1,), (1,)), ((), ())),
                           preferred_element_type=jnp.float32) * t
    attn = attn - jnp.max(attn, axis=-1, keepdims=True)
    e = jnp.exp(attn)
    p = e * pl.reciprocal(jnp.sum(e, axis=-1, keepdims=True), approx=True)
    o_ref[0] = jnp.dot(p.astype(jnp.bfloat16), v.astype(jnp.bfloat16),
                       preferred_element_type=jnp.float32)


# ------------------------------ call wrappers --------------------------------

def _row_tile(M):
    for t in (256, 128, 64, 32, 16, 8):
        if M % t == 0:
            return min(t, M)
    return M


def _parallel(n):
    return pltpu.CompilerParams(dimension_semantics=("parallel",) * n)


def pw_matmul(x, w, residual=None):
    """1x1 conv as row-tiled matmul.  x: (M, K) f32, w: (K, N) bf16."""
    M, K = x.shape
    N = w.shape[1]
    tm = _row_tile(M)
    x_spec = pl.BlockSpec((tm, K), lambda i: (i, 0))
    w_spec = pl.BlockSpec((K, N), lambda i: (0, 0))
    o_spec = pl.BlockSpec((tm, N), lambda i: (i, 0))
    if residual is None:
        kern, args, specs = _mm_kernel, (x, w), [x_spec, w_spec]
    else:
        kern, args, specs = _mm_res_kernel, (x, w, residual), [x_spec, w_spec, o_spec]
    return pl.pallas_call(
        kern,
        out_shape=jax.ShapeDtypeStruct((M, N), jnp.float32),
        grid=(M // tm,),
        in_specs=specs,
        out_specs=o_spec,
        compiler_params=_parallel(1),
    )(*args)


def pw_matmul_ln(x, gamma, beta, w):
    """Fused WithBias-LayerNorm + 1x1 conv.  x: (M, K) f32, w: (K, N) bf16."""
    M, K = x.shape
    N = w.shape[1]
    tm = _row_tile(M)
    return pl.pallas_call(
        _ln_mm_kernel,
        out_shape=jax.ShapeDtypeStruct((M, N), jnp.float32),
        grid=(M // tm,),
        in_specs=[pl.BlockSpec((tm, K), lambda i: (i, 0)),
                  pl.BlockSpec((1, K), lambda i: (0, 0)),
                  pl.BlockSpec((1, K), lambda i: (0, 0)),
                  pl.BlockSpec((K, N), lambda i: (0, 0))],
        out_specs=pl.BlockSpec((tm, N), lambda i: (i, 0)),
        compiler_params=_parallel(1),
    )(x, gamma.reshape(1, K), beta.reshape(1, K), w)


def pw_matmul_glu_res(x, w, residual):
    """Fused gated-GELU + 1x1 conv + residual.  x: (M, 2, hid), w: (hid, N)."""
    M, _, hid = x.shape
    N = w.shape[1]
    tm = _row_tile(M)
    return pl.pallas_call(
        _glu_mm_res_kernel,
        out_shape=jax.ShapeDtypeStruct((M, N), jnp.float32),
        grid=(M // tm,),
        in_specs=[pl.BlockSpec((tm, 2, hid), lambda i: (i, 0, 0)),
                  pl.BlockSpec((hid, N), lambda i: (0, 0)),
                  pl.BlockSpec((tm, N), lambda i: (i, 0))],
        out_specs=pl.BlockSpec((tm, N), lambda i: (i, 0)),
        compiler_params=_parallel(1),
    )(x, w, residual)


def conv3x3(x, w):
    """Dense 3x3 conv, stride 1, pad 1, no bias, channel-last.
    x: (B, H, W, Cin) f32, w: (9, Cin, Cout) bf16."""
    B, H, W, Cin = x.shape
    Cout = w.shape[2]
    xp = jnp.pad(x, ((0, 0), (1, 1), (1, 1), (0, 0)))
    # TODO(synk): for large resolutions, additionally tile the grid over row strips.
    return pl.pallas_call(
        _conv3x3_kernel,
        out_shape=jax.ShapeDtypeStruct((B, H, W, Cout), jnp.float32),
        grid=(B,),
        in_specs=[pl.BlockSpec((1, H + 2, W + 2, Cin), lambda b: (b, 0, 0, 0)),
                  pl.BlockSpec((9, Cin, Cout), lambda b: (0, 0, 0))],
        out_specs=pl.BlockSpec((1, H, W, Cout), lambda b: (b, 0, 0, 0)),
        compiler_params=_parallel(1),
    )(xp, w)


def dwconv3x3(x, w):
    """Depthwise 3x3 conv, stride 1, pad 1, no bias, channel-last.
    x: (B, H, W, C) f32, w: (9, 1, C) f32."""
    B, H, W, C = x.shape
    xp = jnp.pad(x, ((0, 0), (1, 1), (1, 1), (0, 0)))
    return pl.pallas_call(
        _dwconv3x3_kernel,
        out_shape=jax.ShapeDtypeStruct((B, H, W, C), jnp.float32),
        grid=(B,),
        in_specs=[pl.BlockSpec((1, H + 2, W + 2, C), lambda b: (b, 0, 0, 0)),
                  pl.BlockSpec((9, 1, C), lambda b: (0, 0, 0))],
        out_specs=pl.BlockSpec((1, H, W, C), lambda b: (b, 0, 0, 0)),
        compiler_params=_parallel(1),
    )(xp, w)


def attention_core(q, k, v, temp_flat):
    """q, k, v: (B*heads, c, hw) f32; temp_flat: (B*heads,) f32 kept in SMEM."""
    G, c, hw = q.shape
    blk = pl.BlockSpec((1, c, hw), lambda g: (g, 0, 0))
    return pl.pallas_call(
        _attn_kernel,
        out_shape=jax.ShapeDtypeStruct((G, c, hw), jnp.float32),
        grid=(G,),
        in_specs=[blk, blk, blk,
                  pl.BlockSpec(memory_space=pltpu.MemorySpace.SMEM)],
        out_specs=pl.BlockSpec((1, c, hw), lambda g: (g, 0, 0)),
        compiler_params=_parallel(1),
    )(q, k, v, temp_flat)


# ------------------------------- JAX glue ------------------------------------

def pixel_unshuffle(x, r=2):
    B, H, W, C = x.shape
    x = x.reshape(B, H // r, r, W // r, r, C)
    x = x.transpose(0, 1, 3, 5, 2, 4)
    return x.reshape(B, H // r, W // r, C * r * r)


def pixel_shuffle(x, r=2):
    B, H, W, C = x.shape
    Co = C // (r * r)
    x = x.reshape(B, H, W, Co, r, r)
    x = x.transpose(0, 1, 4, 2, 5, 3)
    return x.reshape(B, H * r, W * r, Co)


# ------------------------------ model pieces ---------------------------------

class ParamGen:
    def __init__(self, seed=42):
        self._key = jax.random.PRNGKey(seed)
        self._count = 0

    def next(self, shape, scale=0.05, dtype=jnp.float32):
        self._count += 1
        k = jax.random.fold_in(self._key, self._count)
        return (scale * jax.random.normal(k, shape, jnp.float32)).astype(dtype)


def init_block(pg, dim, num_heads, ffn_expansion_factor):
    hidden = int(dim * ffn_expansion_factor)
    return {
        'num_heads': num_heads,
        'norm1_w': jnp.ones((dim,), jnp.float32),
        'norm1_b': jnp.zeros((dim,), jnp.float32),
        'temperature': jnp.ones((num_heads,), jnp.float32),
        'qkv_w': pg.next((dim, dim * 3), dtype=jnp.bfloat16),        # 1x1 conv
        'qkv_dw_w': pg.next((9, 1, dim * 3)),                        # depthwise 3x3
        'proj_w': pg.next((dim, dim), dtype=jnp.bfloat16),           # 1x1 conv
        'norm2_w': jnp.ones((dim,), jnp.float32),
        'norm2_b': jnp.zeros((dim,), jnp.float32),
        'ffn_in_w': pg.next((dim, hidden * 2), dtype=jnp.bfloat16),
        'ffn_dw_w': pg.next((9, 1, hidden * 2)),
        'ffn_out_w': pg.next((hidden, dim), dtype=jnp.bfloat16),
    }


def transformer_block(x, p):
    """x: (B, H, W, C) channel-last."""
    B, H, W, C = x.shape
    M = B * H * W
    heads = p['num_heads']
    c = C // heads
    xf = x.reshape(M, C)

    # --- attention branch (LN fused into the qkv matmul) ---
    qkv = pw_matmul_ln(xf, p['norm1_w'], p['norm1_b'], p['qkv_w'])        # (M, 3C)
    qkv = dwconv3x3(qkv.reshape(B, H, W, 3 * C), p['qkv_dw_w'])
    qkv = qkv.reshape(B, H * W, 3, heads, c).transpose(2, 0, 3, 4, 1)     # (3,B,heads,c,HW)
    q = qkv[0].reshape(B * heads, c, H * W)
    k = qkv[1].reshape(B * heads, c, H * W)
    v = qkv[2].reshape(B * heads, c, H * W)
    out = attention_core(q, k, v, jnp.tile(p['temperature'], B))          # (B*heads,c,HW)
    out = out.reshape(B, heads, c, H * W).transpose(0, 3, 1, 2).reshape(M, C)
    xf = pw_matmul(out, p['proj_w'], residual=xf)                         # +x fused

    # --- feed-forward branch (LN fused in, gated-GELU + residual fused out) ---
    hid2 = p['ffn_in_w'].shape[1]
    h = pw_matmul_ln(xf, p['norm2_w'], p['norm2_b'], p['ffn_in_w'])       # (M, 2*hid)
    h = dwconv3x3(h.reshape(B, H, W, hid2), p['ffn_dw_w'])
    h = h.reshape(M, 2, hid2 // 2)
    xf = pw_matmul_glu_res(h, p['ffn_out_w'], xf)
    return xf.reshape(B, H, W, C)


def init_restormer(seed=42, inp_channels=4, out_channels=4, dim=16,
                   num_blocks=(1, 1, 1, 1), num_refinement_blocks=1,
                   heads=(1, 2, 4, 8), ffn_expansion_factor=2.66):
    pg = ParamGen(seed)
    bf16 = jnp.bfloat16
    P = {}
    P['patch_embed_w'] = pg.next((9, inp_channels, dim), dtype=bf16)
    P['enc1'] = [init_block(pg, dim, heads[0], ffn_expansion_factor) for _ in range(num_blocks[0])]
    P['down1_2_w'] = pg.next((9, dim, dim // 2), dtype=bf16)
    P['enc2'] = [init_block(pg, dim * 2, heads[1], ffn_expansion_factor) for _ in range(num_blocks[1])]
    P['down2_3_w'] = pg.next((9, dim * 2, dim), dtype=bf16)
    P['enc3'] = [init_block(pg, dim * 4, heads[2], ffn_expansion_factor) for _ in range(num_blocks[2])]
    P['down3_4_w'] = pg.next((9, dim * 4, dim * 2), dtype=bf16)
    P['latent'] = [init_block(pg, dim * 8, heads[3], ffn_expansion_factor) for _ in range(num_blocks[3])]
    P['up4_3_w'] = pg.next((9, dim * 8, dim * 16), dtype=bf16)
    P['reduce3_w'] = pg.next((dim * 8, dim * 4), dtype=bf16)
    P['dec3'] = [init_block(pg, dim * 4, heads[2], ffn_expansion_factor) for _ in range(num_blocks[2])]
    P['up3_2_w'] = pg.next((9, dim * 4, dim * 8), dtype=bf16)
    P['reduce2_w'] = pg.next((dim * 4, dim * 2), dtype=bf16)
    P['dec2'] = [init_block(pg, dim * 2, heads[1], ffn_expansion_factor) for _ in range(num_blocks[1])]
    P['up2_1_w'] = pg.next((9, dim * 2, dim * 4), dtype=bf16)
    P['dec1'] = [init_block(pg, dim * 2, heads[0], ffn_expansion_factor) for _ in range(num_blocks[0])]
    P['refine'] = [init_block(pg, dim * 2, heads[0], ffn_expansion_factor) for _ in range(num_refinement_blocks)]
    P['output_w'] = pg.next((9, dim * 2, out_channels), dtype=bf16)
    return P


def restormer_forward(P, inp_img):
    """inp_img: (B, C, H, W) like the PyTorch reference; channel-last inside."""
    x = jnp.transpose(inp_img, (0, 2, 3, 1))                  # NCHW -> NHWC (once)

    e1 = conv3x3(x, P['patch_embed_w'])                       # OverlapPatchEmbed
    for bp in P['enc1']:
        e1 = transformer_block(e1, bp)
    e2 = pixel_unshuffle(conv3x3(e1, P['down1_2_w']), 2)
    for bp in P['enc2']:
        e2 = transformer_block(e2, bp)
    e3 = pixel_unshuffle(conv3x3(e2, P['down2_3_w']), 2)
    for bp in P['enc3']:
        e3 = transformer_block(e3, bp)
    lat = pixel_unshuffle(conv3x3(e3, P['down3_4_w']), 2)
    for bp in P['latent']:
        lat = transformer_block(lat, bp)

    d3 = pixel_shuffle(conv3x3(lat, P['up4_3_w']), 2)
    d3 = jnp.concatenate([d3, e3], axis=-1)
    B3, H3, W3, C3 = d3.shape
    d3 = pw_matmul(d3.reshape(-1, C3), P['reduce3_w']).reshape(B3, H3, W3, -1)
    for bp in P['dec3']:
        d3 = transformer_block(d3, bp)

    d2 = pixel_shuffle(conv3x3(d3, P['up3_2_w']), 2)
    d2 = jnp.concatenate([d2, e2], axis=-1)
    B2, H2, W2, C2 = d2.shape
    d2 = pw_matmul(d2.reshape(-1, C2), P['reduce2_w']).reshape(B2, H2, W2, -1)
    for bp in P['dec2']:
        d2 = transformer_block(d2, bp)

    d1 = pixel_shuffle(conv3x3(d2, P['up2_1_w']), 2)
    d1 = jnp.concatenate([d1, e1], axis=-1)
    for bp in P['dec1']:
        d1 = transformer_block(d1, bp)
    for bp in P['refine']:
        d1 = transformer_block(d1, bp)

    # dual_pixel_task=False branch
    out = conv3x3(d1, P['output_w']) + x
    return jnp.transpose(out, (0, 3, 1, 2))                   # NHWC -> NCHW (once)


# ----------------------------------- main -------------------------------------

if __name__ == "__main__":
    cfg = dict(inp_channels=4, out_channels=4, dim=16,
               num_blocks=(1, 1, 1, 1), num_refinement_blocks=1,
               heads=(1, 2, 4, 8), ffn_expansion_factor=2.66)
    params = init_restormer(seed=42, **cfg)

    key = jax.random.PRNGKey(0)
    x = jax.random.normal(key, (2, cfg['inp_channels'], 16, 16), jnp.float32)

    out = restormer_forward(params, x)
    out = jax.block_until_ready(out)
    assert out.shape == (2, cfg['out_channels'], 16, 16)
    assert out.dtype == jnp.float32
    print("KERNEL_OK")
</pallas_src>

<mosaic_0001>
module attributes {stable_mosaic.version = 11 : i64} {
  func.func @_conv3x3_kernel(%arg0: i32, %arg1: memref<1x18x18x4xf32, #tpu.memory_space<vmem>>, %arg2: memref<9x4x16xbf16, #tpu.memory_space<vmem>>, %arg3: memref<1x16x16x16xf32, #tpu.memory_space<vmem>>) attributes {dimension_semantics = [#tpu.dimension_semantics<parallel>], iteration_bounds = array<i64: 2>, scalar_prefetch = 0 : i64, scratch_operands = 0 : i64, tpu.core_type = #tpu.core_type<tc>, window_params = [{transform_indices = @transform_0, window_bounds = array<i64: 1, 18, 18, 4>}, {pipeline_mode = #tpu.pipeline_mode<synchronous>, transform_indices = @transform_1, window_bounds = array<i64: 9, 4, 16>}, {transform_indices = @transform_2, window_bounds = array<i64: 1, 16, 16, 16>}]} {
    %cst = arith.constant 0.000000e+00 : f32
    %0 = vector.broadcast %cst : f32 to vector<16x16xf32>
    %c0 = arith.constant 0 : index
    %c0_0 = arith.constant 0 : index
    %c0_1 = arith.constant 0 : index
    %c0_2 = arith.constant 0 : index
    %1 = vector.load %arg1[%c0, %c0_0, %c0_1, %c0_2] : memref<1x18x18x4xf32, #tpu.memory_space<vmem>>, vector<1x1x16x4xf32>
    %2 = vector.shape_cast %1 : vector<1x1x16x4xf32> to vector<16x4xf32>
    %3 = arith.truncf %2 : vector<16x4xf32> to vector<16x4xbf16>
    %c0_3 = arith.constant 0 : index
    %c0_4 = arith.constant 0 : index
    %c0_5 = arith.constant 0 : index
    %4 = vector.load %arg2[%c0_3, %c0_4, %c0_5] : memref<9x4x16xbf16, #tpu.memory_space<vmem>>, vector<1x4x16xbf16>
    %5 = vector.shape_cast %4 : vector<1x4x16xbf16> to vector<4x16xbf16>
    %cst_6 = arith.constant dense<0.000000e+00> : vector<16x16xf32>
    %6 = tpu.matmul %3, %5, %cst_6 {dimension_numbers = #tpu.dot_dimension_numbers<[1], [0], [0], [1], [0, 0, 1, 1], [], []>} : vector<16x4xbf16>, vector<4x16xbf16>, vector<16x16xf32> -> vector<16x16xf32>
    %7 = arith.addf %0, %6 : vector<16x16xf32>
    %c0_7 = arith.constant 0 : index
    %c0_8 = arith.constant 0 : index
    %c1 = arith.constant 1 : index
    %c0_9 = arith.constant 0 : index
    %8 = vector.load %arg1[%c0_7, %c0_8, %c1, %c0_9] : memref<1x18x18x4xf32, #tpu.memory_space<vmem>>, vector<1x1x16x4xf32>
    %9 = vector.shape_cast %8 : vector<1x1x16x4xf32> to vector<16x4xf32>
    %10 = arith.truncf %9 : vector<16x4xf32> to vector<16x4xbf16>
    %c1_10 = arith.constant 1 : index
    %c0_11 = arith.constant 0 : index
    %c0_12 = arith.constant 0 : index
    %11 = vector.load %arg2[%c1_10, %c0_11, %c0_12] : memref<9x4x16xbf16, #tpu.memory_space<vmem>>, vector<1x4x16xbf16>
    %12 = vector.shape_cast %11 : vector<1x4x16xbf16> to vector<4x16xbf16>
    %cst_13 = arith.constant dense<0.000000e+00> : vector<16x16xf32>
    %13 = tpu.matmul %10, %12, %cst_13 {dimension_numbers = #tpu.dot_dimension_numbers<[1], [0], [0], [1], [0, 0, 1, 1], [], []>} : vector<16x4xbf16>, vector<4x16xbf16>, vector<16x16xf32> -> vector<16x16xf32>
    %14 = arith.addf %7, %13 : vector<16x16xf32>
    %c0_14 = arith.constant 0 : index
    %c0_15 = arith.constant 0 : index
    %c2 = arith.constant 2 : index
    %c0_16 = arith.constant 0 : index
    %15 = vector.load %arg1[%c0_14, %c0_15, %c2, %c0_16] : memref<1x18x18x4xf32, #tpu.memory_space<vmem>>, vector<1x1x16x4xf32>
    %16 = vector.shape_cast %15 : vector<1x1x16x4xf32> to vector<16x4xf32>
    %17 = arith.truncf %16 : vector<16x4xf32> to vector<16x4xbf16>
    %c2_17 = arith.constant 2 : index
    %c0_18 = arith.constant 0 : index
    %c0_19 = arith.constant 0 : index
    %18 = vector.load %arg2[%c2_17, %c0_18, %c0_19] : memref<9x4x16xbf16, #tpu.memory_space<vmem>>, vector<1x4x16xbf16>
    %19 = vector.shape_cast %18 : vector<1x4x16xbf16> to vector<4x16xbf16>
    %cst_20 = arith.constant dense<0.000000e+00> : vector<16x16xf32>
    %20 = tpu.matmul %17, %19, %cst_20 {dimension_numbers = #tpu.dot_dimension_numbers<[1], [0], [0], [1], [0, 0, 1, 1], [], []>} : vector<16x4xbf16>, vector<4x16xbf16>, vector<16x16xf32> -> vector<16x16xf32>
    %21 = arith.addf %14, %20 : vector<16x16xf32>
    %c0_21 = arith.constant 0 : index
    %c1_22 = arith.constant 1 : index
    %c0_23 = arith.constant 0 : index
    %c0_24 = arith.constant 0 : index
    %22 = vector.load %arg1[%c0_21, %c1_22, %c0_23, %c0_24] : memref<1x18x18x4xf32, #tpu.memory_space<vmem>>, vector<1x1x16x4xf32>
    %23 = vector.shape_cast %22 : vector<1x1x16x4xf32> to vector<16x4xf32>
    %24 = arith.truncf %23 : vector<16x4xf32> to vector<16x4xbf16>
    %c3 = arith.constant 3 : index
    %c0_25 = arith.constant 0 : index
    %c0_26 = arith.constant 0 : index
    %25 = vector.load %arg2[%c3, %c0_25, %c0_26] : memref<9x4x16xbf16, #tpu.memory_space<vmem>>, vector<1x4x16xbf16>
    %26 = vector.shape_cast %25 : vector<1x4x16xbf16> to vector<4x16xbf16>
    %cst_27 = arith.constant dense<0.000000e+00> : vector<16x16xf32>
    %27 = tpu.matmul %24, %26, %cst_27 {dimension_numbers = #tpu.dot_dimension_numbers<[1], [0], [0], [1], [0, 0, 1, 1], [], []>} : vector<16x4xbf16>, vector<4x16xbf16>, vector<16x16xf32> -> vector<16x16xf32>
    %28 = arith.addf %21, %27 : vector<16x16xf32>
    %c0_28 = arith.constant 0 : index
    %c1_29 = arith.constant 1 : index
    %c1_30 = arith.constant 1 : index
    %c0_31 = arith.constant 0 : index
    %29 = vector.load %arg1[%c0_28, %c1_29, %c1_30, %c0_31] : memref<1x18x18x4xf32, #tpu.memory_space<vmem>>, vector<1x1x16x4xf32>
    %30 = vector.shape_cast %29 : vector<1x1x16x4xf32> to vector<16x4xf32>
    %31 = arith.truncf %30 : vector<16x4xf32> to vector<16x4xbf16>
    %c4 = arith.constant 4 : index
    %c0_32 = arith.constant 0 : index
    %c0_33 = arith.constant 0 : index
    %32 = vector.load %arg2[%c4, %c0_32, %c0_33] : memref<9x4x16xbf16, #tpu.memory_space<vmem>>, vector<1x4x16xbf16>
    %33 = vector.shape_cast %32 : vector<1x4x16xbf16> to vector<4x16xbf16>
    %cst_34 = arith.constant dense<0.000000e+00> : vector<16x16xf32>
    %34 = tpu.matmul %31, %33, %cst_34 {dimension_numbers = #tpu.dot_dimension_numbers<[1], [0], [0], [1], [0, 0, 1, 1], [], []>} : vector<16x4xbf16>, vector<4x16xbf16>, vector<16x16xf32> -> vector<16x16xf32>
    %35 = arith.addf %28, %34 : vector<16x16xf32>
    %c0_35 = arith.constant 0 : index
    %c1_36 = arith.constant 1 : index
    %c2_37 = arith.constant 2 : index
    %c0_38 = arith.constant 0 : index
    %36 = vector.load %arg1[%c0_35, %c1_36, %c2_37, %c0_38] : memref<1x18x18x4xf32, #tpu.memory_space<vmem>>, vector<1x1x16x4xf32>
    %37 = vector.shape_cast %36 : vector<1x1x16x4xf32> to vector<16x4xf32>
    %38 = arith.truncf %37 : vector<16x4xf32> to vector<16x4xbf16>
    %c5 = arith.constant 5 : index
    %c0_39 = arith.constant 0 : index
    %c0_40 = arith.constant 0 : index
    %39 = vector.load %arg2[%c5, %c0_39, %c0_40] : memref<9x4x16xbf16, #tpu.memory_space<vmem>>, vector<1x4x16xbf16>
    %40 = vector.shape_cast %39 : vector<1x4x16xbf16> to vector<4x16xbf16>
    %cst_41 = arith.constant dense<0.000000e+00> : vector<16x16xf32>
    %41 = tpu.matmul %38, %40, %cst_41 {dimension_numbers = #tpu.dot_dimension_numbers<[1], [0], [0], [1], [0, 0, 1, 1], [], []>} : vector<16x4xbf16>, vector<4x16xbf16>, vector<16x16xf32> -> vector<16x16xf32>
    %42 = arith.addf %35, %41 : vector<16x16xf32>
    %c0_42 = arith.constant 0 : index
    %c2_43 = arith.constant 2 : index
    %c0_44 = arith.constant 0 : index
    %c0_45 = arith.constant 0 : index
    %43 = vector.load %arg1[%c0_42, %c2_43, %c0_44, %c0_45] : memref<1x18x18x4xf32, #tpu.memory_space<vmem>>, vector<1x1x16x4xf32>
    %44 = vector.shape_cast %43 : vector<1x1x16x4xf32> to vector<16x4xf32>
    %45 = arith.truncf %44 : vector<16x4xf32> to vector<16x4xbf16>
    %c6 = arith.constant 6 : index
    %c0_46 = arith.constant 0 : index
    %c0_47 = arith.constant 0 : index
    %46 = vector.load %arg2[%c6, %c0_46, %c0_47] : memref<9x4x16xbf16, #tpu.memory_space<vmem>>, vector<1x4x16xbf16>
    %47 = vector.shape_cast %46 : vector<1x4x16xbf16> to vector<4x16xbf16>
    %cst_48 = arith.constant dense<0.000000e+00> : vector<16x16xf32>
    %48 = tpu.matmul %45, %47, %cst_48 {dimension_numbers = #tpu.dot_dimension_numbers<[1], [0], [0], [1], [0, 0, 1, 1], [], []>} : vector<16x4xbf16>, vector<4x16xbf16>, vector<16x16xf32> -> vector<16x16xf32>
    %49 = arith.addf %42, %48 : vector<16x16xf32>
    %c0_49 = arith.constant 0 : index
    %c2_50 = arith.constant 2 : index
    %c1_51 = arith.constant 1 : index
    %c0_52 = arith.constant 0 : index
    %50 = vector.load %arg1[%c0_49, %c2_50, %c1_51, %c0_52] : memref<1x18x18x4xf32, #tpu.memory_space<vmem>>, vector<1x1x16x4xf32>
    %51 = vector.shape_cast %50 : vector<1x1x16x4xf32> to vector<16x4xf32>
    %52 = arith.truncf %51 : vector<16x4xf32> to vector<16x4xbf16>
    %c7 = arith.constant 7 : index
    %c0_53 = arith.constant 0 : index
    %c0_54 = arith.constant 0 : index
    %53 = vector.load %arg2[%c7, %c0_53, %c0_54] : memref<9x4x16xbf16, #tpu.memory_space<vmem>>, vector<1x4x16xbf16>
    %54 = vector.shape_cast %53 : vector<1x4x16xbf16> to vector<4x16xbf16>
    %cst_55 = arith.constant dense<0.000000e+00> : vector<16x16xf32>
    %55 = tpu.matmul %52, %54, %cst_55 {dimension_numbers = #tpu.dot_dimension_numbers<[1], [0], [0], [1], [0, 0, 1, 1], [], []>} : vector<16x4xbf16>, vector<4x16xbf16>, vector<16x16xf32> -> vector<16x16xf32>
    %56 = arith.addf %49, %55 : vector<16x16xf32>
    %c0_56 = arith.constant 0 : index
    %c2_57 = arith.constant 2 : index
    %c2_58 = arith.constant 2 : index
    %c0_59 = arith.constant 0 : index
    %57 = vector.load %arg1[%c0_56, %c2_57, %c2_58, %c0_59] : memref<1x18x18x4xf32, #tpu.memory_space<vmem>>, vector<1x1x16x4xf32>
    %58 = vector.shape_cast %57 : vector<1x1x16x4xf32> to vector<16x4xf32>
    %59 = arith.truncf %58 : vector<16x4xf32> to vector<16x4xbf16>
    %c8 = arith.constant 8 : index
    %c0_60 = arith.constant 0 : index
    %c0_61 = arith.constant 0 : index
    %60 = vector.load %arg2[%c8, %c0_60, %c0_61] : memref<9x4x16xbf16, #tpu.memory_space<vmem>>, vector<1x4x16xbf16>
    %61 = vector.shape_cast %60 : vector<1x4x16xbf16> to vector<4x16xbf16>
    %cst_62 = arith.constant dense<0.000000e+00> : vector<16x16xf32>
    %62 = tpu.matmul %59, %61, %cst_62 {dimension_numbers = #tpu.dot_dimension_numbers<[1], [0], [0], [1], [0, 0, 1, 1], [], []>} : vector<16x4xbf16>, vector<4x16xbf16>, vector<16x16xf32> -> vector<16x16xf32>
    %63 = arith.addf %56, %62 : vector<16x16xf32>
    %c0_63 = arith.constant 0 : index
    %c0_64 = arith.constant 0 : index
    %c0_65 = arith.constant 0 : index
    %c0_66 = arith.constant 0 : index
    %64 = vector.load %arg3[%c0_63, %c0_64, %c0_65, %c0_66] : memref<1x16x16x16xf32, #tpu.memory_space<vmem>>, vector<1x1x16x16xf32>
    %65 = vector.shape_cast %64 : vector<1x1x16x16xf32> to vector<16x16xf32>
    %66 = vector.shape_cast %63 : vector<16x16xf32> to vector<1x1x16x16xf32>
    tpu.vector_store %arg3[%c0_63, %c0_64, %c0_65, %c0_66], %66 {strides = array<i32>} : memref<1x16x16x16xf32, #tpu.memory_space<vmem>>, vector<1x1x16x16xf32>,
    %cst_67 = arith.constant 0.000000e+00 : f32
    %67 = vector.broadcast %cst_67 : f32 to vector<16x16xf32>
    %c0_68 = arith.constant 0 : index
    %c1_69 = arith.constant 1 : index
    %c0_70 = arith.constant 0 : index
    %c0_71 = arith.constant 0 : index
    %68 = vector.load %arg1[%c0_68, %c1_69, %c0_70, %c0_71] : memref<1x18x18x4xf32, #tpu.memory_space<vmem>>, vector<1x1x16x4xf32>
    %69 = vector.shape_cast %68 : vector<1x1x16x4xf32> to vector<16x4xf32>
    %70 = arith.truncf %69 : vector<16x4xf32> to vector<16x4xbf16>
    %c0_72 = arith.constant 0 : index
    %c0_73 = arith.constant 0 : index
    %c0_74 = arith.constant 0 : index
    %71 = vector.load %arg2[%c0_72, %c0_73, %c0_74] : memref<9x4x16xbf16, #tpu.memory_space<vmem>>, vector<1x4x16xbf16>
    %72 = vector.shape_cast %71 : vector<1x4x16xbf16> to vector<4x16xbf16>
    %cst_75 = arith.constant dense<0.000000e+00> : vector<16x16xf32>
    %73 = tpu.matmul %70, %72, %cst_75 {dimension_numbers = #tpu.dot_dimension_numbers<[1], [0], [0], [1], [0, 0, 1, 1], [], []>} : vector<16x4xbf16>, vector<4x16xbf16>, vector<16x16xf32> -> vector<16x16xf32>
    %74 = arith.addf %67, %73 : vector<16x16xf32>
    %c0_76 = arith.constant 0 : index
    %c1_77 = arith.constant 1 : index
    %c1_78 = arith.constant 1 : index
    %c0_79 = arith.constant 0 : index
    %75 = vector.load %arg1[%c0_76, %c1_77, %c1_78, %c0_79] : memref<1x18x18x4xf32, #tpu.memory_space<vmem>>, vector<1x1x16x4xf32>
    %76 = vector.shape_cast %75 : vector<1x1x16x4xf32> to vector<16x4xf32>
    %77 = arith.truncf %76 : vector<16x4xf32> to vector<16x4xbf16>
    %c1_80 = arith.constant 1 : index
    %c0_81 = arith.constant 0 : index
    %c0_82 = arith.constant 0 : index
    %78 = vector.load %arg2[%c1_80, %c0_81, %c0_82] : memref<9x4x16xbf16, #tpu.memory_space<vmem>>, vector<1x4x16xbf16>
    %79 = vector.shape_cast %78 : vector<1x4x16xbf16> to vector<4x16xbf16>
    %cst_83 = arith.constant dense<0.000000e+00> : vector<16x16xf32>
    %80 = tpu.matmul %77, %79, %cst_83 {dimension_numbers = #tpu.dot_dimension_numbers<[1], [0], [0], [1], [0, 0, 1, 1], [], []>} : vector<16x4xbf16>, vector<4x16xbf16>, vector<16x16xf32> -> vector<16x16xf32>
    %81 = arith.addf %74, %80 : vector<16x16xf32>
    %c0_84 = arith.constant 0 : index
    %c1_85 = arith.constant 1 : index
    %c2_86 = arith.constant 2 : index
    %c0_87 = arith.constant 0 : index
    %82 = vector.load %arg1[%c0_84, %c1_85, %c2_86, %c0_87] : memref<1x18x18x4xf32, #tpu.memory_space<vmem>>, vector<1x1x16x4xf32>
    %83 = vector.shape_cast %82 : vector<1x1x16x4xf32> to vector<16x4xf32>
    %84 = arith.truncf %83 : vector<16x4xf32> to vector<16x4xbf16>
    %c2_88 = arith.constant 2 : index
    %c0_89 = arith.constant 0 : index
    %c0_90 = arith.constant 0 : index
    %85 = vector.load %arg2[%c2_88, %c0_89, %c0_90] : memref<9x4x16xbf16, #tpu.memory_space<vmem>>, vector<1x4x16xbf16>
    %86 = vector.shape_cast %85 : vector<1x4x16xbf16> to vector<4x16xbf16>
    %cst_91 = arith.constant dense<0.000000e+00> : vector<16x16xf32>
    %87 = tpu.matmul %84, %86, %cst_91 {dimension_numbers = #tpu.dot_dimension_numbers<[1], [0], [0], [1], [0, 0, 1, 1], [], []>} : vector<16x4xbf16>, vector<4x16xbf16>, vector<16x16xf32> -> vector<16x16xf32>
    %88 = arith.addf %81, %87 : vector<16x16xf32>
    %c0_92 = arith.constant 0 : index
    %c2_93 = arith.constant 2 : index
    %c0_94 = arith.constant 0 : index
    %c0_95 = arith.constant 0 : index
    %89 = vector.load %arg1[%c0_92, %c2_93, %c0_94, %c0_95] : memref<1x18x18x4xf32, #tpu.memory_space<vmem>>, vector<1x1x16x4xf32>
    %90 = vector.shape_cast %89 : vector<1x1x16x4xf32> to vector<16x4xf32>
    %91 = arith.truncf %90 : vector<16x4xf32> to vector<16x4xbf16>
    %c3_96 = arith.constant 3 : index
    %c0_97 = arith.constant 0 : index
    %c0_98 = arith.constant 0 : index
    %92 = vector.load %arg2[%c3_96, %c0_97, %c0_98] : memref<9x4x16xbf16, #tpu.memory_space<vmem>>, vector<1x4x16xbf16>
    %93 = vector.shape_cast %92 : vector<1x4x16xbf16> to vector<4x16xbf16>
    %cst_99 = arith.constant dense<0.000000e+00> : vector<16x16xf32>
    %94 = tpu.matmul %91, %93, %cst_99 {dimension_numbers = #tpu.dot_dimension_numbers<[1], [0], [0], [1], [0, 0, 1, 1], [], []>} : vector<16x4xbf16>, vector<4x16xbf16>, vector<16x16xf32> -> vector<16x16xf32>
    %95 = arith.addf %88, %94 : vector<16x16xf32>
    %c0_100 = arith.constant 0 : index
    %c2_101 = arith.constant 2 : index
    %c1_102 = arith.constant 1 : index
    %c0_103 = arith.constant 0 : index
    %96 = vector.load %arg1[%c0_100, %c2_101, %c1_102, %c0_103] : memref<1x18x18x4xf32, #tpu.memory_space<vmem>>, vector<1x1x16x4xf32>
    %97 = vector.shape_cast %96 : vector<1x1x16x4xf32> to vector<16x4xf32>
    %98 = arith.truncf %97 : vector<16x4xf32> to vector<16x4xbf16>
    %c4_104 = arith.constant 4 : index
    %c0_105 = arith.constant 0 : index
    %c0_106 = arith.constant 0 : index
    %99 = vector.load %arg2[%c4_104, %c0_105, %c0_106] : memref<9x4x16xbf16, #tpu.memory_space<vmem>>, vector<1x4x16xbf16>
    %100 = vector.shape_cast %99 : vector<1x4x16xbf16> to vector<4x16xbf16>
    %cst_107 = arith.constant dense<0.000000e+00> : vector<16x16xf32>
    %101 = tpu.matmul %98, %100, %cst_107 {dimension_numbers = #tpu.dot_dimension_numbers<[1], [0], [0], [1], [0, 0, 1, 1], [], []>} : vector<16x4xbf16>, vector<4x16xbf16>, vector<16x16xf32> -> vector<16x16xf32>
    %102 = arith.addf %95, %101 : vector<16x16xf32>
    %c0_108 = arith.constant 0 : index
    %c2_109 = arith.constant 2 : index
    %c2_110 = arith.constant 2 : index
    %c0_111 = arith.constant 0 : index
    %103 = vector.load %arg1[%c0_108, %c2_109, %c2_110, %c0_111] : memref<1x18x18x4xf32, #tpu.memory_space<vmem>>, vector<1x1x16x4xf32>
    %104 = vector.shape_cast %103 : vector<1x1x16x4xf32> to vector<16x4xf32>
    %105 = arith.truncf %104 : vector<16x4xf32> to vector<16x4xbf16>
    %c5_112 = arith.constant 5 : index
    %c0_113 = arith.constant 0 : index
    %c0_114 = arith.constant 0 : index
    %106 = vector.load %arg2[%c5_112, %c0_113, %c0_114] : memref<9x4x16xbf16, #tpu.memory_space<vmem>>, vector<1x4x16xbf16>
    %107 = vector.shape_cast %106 : vector<1x4x16xbf16> to vector<4x16xbf16>
    %cst_115 = arith.constant dense<0.000000e+00> : vector<16x16xf32>
    %108 = tpu.matmul %105, %107, %cst_115 {dimension_numbers = #tpu.dot_dimension_numbers<[1], [0], [0], [1], [0, 0, 1, 1], [], []>} : vector<16x4xbf16>, vector<4x16xbf16>, vector<16x16xf32> -> vector<16x16xf32>
    %109 = arith.addf %102, %108 : vector<16x16xf32>
    %c0_116 = arith.constant 0 : index
    %c3_117 = arith.constant 3 : index
    %c0_118 = arith.constant 0 : index
    %c0_119 = arith.constant 0 : index
    %110 = vector.load %arg1[%c0_116, %c3_117, %c0_118, %c0_119] : memref<1x18x18x4xf32, #tpu.memory_space<vmem>>, vector<1x1x16x4xf32>
    %111 = vector.shape_cast %110 : vector<1x1x16x4xf32> to vector<16x4xf32>
    %112 = arith.truncf %111 : vector<16x4xf32> to vector<16x4xbf16>
    %c6_120 = arith.constant 6 : index
    %c0_121 = arith.constant 0 : index
    %c0_122 = arith.constant 0 : index
    %113 = vector.load %arg2[%c6_120, %c0_121, %c0_122] : memref<9x4x16xbf16, #tpu.memory_space<vmem>>, vector<1x4x16xbf16>
    %114 = vector.shape_cast %113 : vector<1x4x16xbf16> to vector<4x16xbf16>
    %cst_123 = arith.constant dense<0.000000e+00> : vector<16x16xf32>
    %115 = tpu.matmul %112, %114, %cst_123 {dimension_numbers = #tpu.dot_dimension_numbers<[1], [0], [0], [1], [0, 0, 1, 1], [], []>} : vector<16x4xbf16>, vector<4x16xbf16>, vector<16x16xf32> -> vector<16x16xf32>
    %116 = arith.addf %109, %115 : vector<16x16xf32>
    %c0_124 = arith.constant 0 : index
    %c3_125 = arith.constant 3 : index
    %c1_126 = arith.constant 1 : index
    %c0_127 = arith.constant 0 : index
    %117 = vector.load %arg1[%c0_124, %c3_125, %c1_126, %c0_127] : memref<1x18x18x4xf32, #tpu.memory_space<vmem>>, vector<1x1x16x4xf32>
    %118 = vector.shape_cast %117 : vector<1x1x16x4xf32> to vector<16x4xf32>
    %119 = arith.truncf %118 : vector<16x4xf32> to vector<16x4xbf16>
    %c7_128 = arith.constant 7 : index
    %c0_129 = arith.constant 0 : index
    %c0_130 = arith.constant 0 : index
    %120 = vector.load %arg2[%c7_128, %c0_129, %c0_130] : memref<9x4x16xbf16, #tpu.memory_space<vmem>>, vector<1x4x16xbf16>
    %121 = vector.shape_cast %120 : vector<1x4x16xbf16> to vector<4x16xbf16>
    %cst_131 = arith.constant dense<0.000000e+00> : vector<16x16xf32>
    %122 = tpu.matmul %119, %121, %cst_131 {dimension_numbers = #tpu.dot_dimension_numbers<[1], [0], [0], [1], [0, 0, 1, 1], [], []>} : vector<16x4xbf16>, vector<4x16xbf16>, vector<16x16xf32> -> vector<16x16xf32>
    %123 = arith.addf %116, %122 : vector<16x16xf32>
    %c0_132 = arith.constant 0 : index
    %c3_133 = arith.constant 3 : index
    %c2_134 = arith.constant 2 : index
    %c0_135 = arith.constant 0 : index
    %124 = vector.load %arg1[%c0_132, %c3_133, %c2_134, %c0_135] : memref<1x18x18x4xf32, #tpu.memory_space<vmem>>, vector<1x1x16x4xf32>
    %125 = vector.shape_cast %124 : vector<1x1x16x4xf32> to vector<16x4xf32>
    %126 = arith.truncf %125 : vector<16x4xf32> to vector<16x4xbf16>
    %c8_136 = arith.constant 8 : index
    %c0_137 = arith.constant 0 : index
    %c0_138 = arith.constant 0 : index
    %127 = vector.load %arg2[%c8_136, %c0_137, %c0_138] : memref<9x4x16xbf16, #tpu.memory_space<vmem>>, vector<1x4x16xbf16>
    %128 = vector.shape_cast %127 : vector<1x4x16xbf16> to vector<4x16xbf16>
    %cst_139 = arith.constant dense<0.000000e+00> : vector<16x16xf32>
    %129 = tpu.matmul %126, %128, %cst_139 {dimension_numbers = #tpu.dot_dimension_numbers<[1], [0], [0], [1], [0, 0, 1, 1], [], []>} : vector<16x4xbf16>, vector<4x16xbf16>, vector<16x16xf32> -> vector<16x16xf32>
    %130 = arith.addf %123, %129 : vector<16x16xf32>
    %c0_140 = arith.constant 0 : index
    %c1_141 = arith.constant 1 : index
    %c0_142 = arith.constant 0 : index
    %c0_143 = arith.constant 0 : index
    %131 = vector.load %arg3[%c0_140, %c1_141, %c0_142, %c0_143] : memref<1x16x16x16xf32, #tpu.memory_space<vmem>>, vector<1x1x16x16xf32>
    %132 = vector.shape_cast %131 : vector<1x1x16x16xf32> to vector<16x16xf32>
    %133 = vector.shape_cast %130 : vector<16x16xf32> to vector<1x1x16x16xf32>
    tpu.vector_store %arg3[%c0_140, %c1_141, %c0_142, %c0_143], %133 {strides = array<i32>} : memref<1x16x16x16xf32, #tpu.memory_space<vmem>>, vector<1x1x16x16xf32>,
    %cst_144 = arith.constant 0.000000e+00 : f32
    %134 = vector.broadcast %cst_144 : f32 to vector<16x16xf32>
    %c0_145 = arith.constant 0 : index
    %c2_146 = arith.constant 2 : index
    %c0_147 = arith.constant 0 : index
    %c0_148 = arith.constant 0 : index
    %135 = vector.load %arg1[%c0_145, %c2_146, %c0_147, %c0_148] : memref<1x18x18x4xf32, #tpu.memory_space<vmem>>, vector<1x1x16x4xf32>
    %136 = vector.shape_cast %135 : vector<1x1x16x4xf32> to vector<16x4xf32>
    %137 = arith.truncf %136 : vector<16x4xf32> to vector<16x4xbf16>
    %c0_149 = arith.constant 0 : index
    %c0_150 = arith.constant 0 : index
    %c0_151 = arith.constant 0 : index
    %138 = vector.load %arg2[%c0_149, %c0_150, %c0_151] : memref<9x4x16xbf16, #tpu.memory_space<vmem>>, vector<1x4x16xbf16>
    %139 = vector.shape_cast %138 : vector<1x4x16xbf16> to vector<4x16xbf16>
    %cst_152 = arith.constant dense<0.000000e+00> : vector<16x16xf32>
    %140 = tpu.matmul %137, %139, %cst_152 {dimension_numbers = #tpu.dot_dimension_numbers<[1], [0], [0], [1], [0, 0, 1, 1], [], []>} : vector<16x4xbf16>, vector<4x16xbf16>, vector<16x16xf32> -> vector<16x16xf32>
    %141 = arith.addf %134, %140 : vector<16x16xf32>
    %c0_153 = arith.constant 0 : index
    %c2_154 = arith.constant 2 : index
    %c1_155 = arith.constant 1 : index
    %c0_156 = arith.constant 0 : index
    %142 = vector.load %arg1[%c0_153, %c2_154, %c1_155, %c0_156] : memref<1x18x18x4xf32, #tpu.memory_space<vmem>>, vector<1x1x16x4xf32>
    %143 = vector.shape_cast %142 : vector<1x1x16x4xf32> to vector<16x4xf32>
    %144 = arith.truncf %143 : vector<16x4xf32> to vector<16x4xbf16>
    %c1_157 = arith.constant 1 : index
    %c0_158 = arith.constant 0 : index
    %c0_159 = arith.constant 0 : index
    %145 = vector.load %arg2[%c1_157, %c0_158, %c0_159] : memref<9x4x16xbf16, #tpu.memory_space<vmem>>, vector<1x4x16xbf16>
    %146 = vector.shape_cast %145 : vector<1x4x16xbf16> to vector<4x16xbf16>
    %cst_160 = arith.constant dense<0.000000e+00> : vector<16x16xf32>
    %147 = tpu.matmul %144, %146, %cst_160 {dimension_numbers = #tpu.dot_dimension_numbers<[1], [0], [0], [1], [0, 0, 1, 1], [], []>} : vector<16x4xbf16>, vector<4x16xbf16>, vector<16x16xf32> -> vector<16x16xf32>
    %148 = arith.addf %141, %147 : vector<16x16xf32>
    %c0_161 = arith.constant 0 : index
    %c2_162 = arith.constant 2 : index
    %c2_163 = arith.constant 2 : index
    %c0_164 = arith.constant 0 : index
    %149 = vector.load %arg1[%c0_161, %c2_162, %c2_163, %c0_164] : memref<1x18x18x4xf32, #tpu.memory_space<vmem>>, vector<1x1x16x4xf32>
    %150 = vector.shape_cast %149 : vector<1x1x16x4xf32> to vector<16x4xf32>
    %151 = arith.truncf %150 : vector<16x4xf32> to vector<16x4xbf16>
    %c2_165 = arith.constant 2 : index
    %c0_166 = arith.constant 0 : index
    %c0_167 = arith.constant 0 : index
    %152 = vector.load %arg2[%c2_165, %c0_166, %c0_167] : memref<9x4x16xbf16, #tpu.memory_space<vmem>>, vector<1x4x16xbf16>
    %153 = vector.shape_cast %152 : vector<1x4x16xbf16> to vector<4x16xbf16>
    %cst_168 = arith.constant dense<0.000000e+00> : vector<16x16xf32>
    %154 = tpu.matmul %151, %153, %cst_168 {dimension_numbers = #tpu.dot_dimension_numbers<[1], [0], [0], [1], [0, 0, 1, 1], [], []>} : vector<16x4xbf16>, vector<4x16xbf16>, vector<16x16xf32> -> vector<16x16xf32>
    %155 = arith.addf %148, %154 : vector<16x16xf32>
    %c0_169 = arith.constant 0 : index
    %c3_170 = arith.constant 3 : index
    %c0_171 = arith.constant 0 : index
    %c0_172 = arith.constant 0 : index
    %156 = vector.load %arg1[%c0_169, %c3_170, %c0_171, %c0_172] : memref<1x18x18x4xf32, #tpu.memory_space<vmem>>, vector<1x1x16x4xf32>
    %157 = vector.shape_cast %156 : vector<1x1x16x4xf32> to vector<16x4xf32>
    %158 = arith.truncf %157 : vector<16x4xf32> to vector<16x4xbf16>
    %c3_173 = arith.constant 3 : index
    %c0_174 = arith.constant 0 : index
    %c0_175 = arith.constant 0 : index
    %159 = vector.load %arg2[%c3_173, %c0_174, %c0_175] : memref<9x4x16xbf16, #tpu.memory_space<vmem>>, vector<1x4x16xbf16>
    %160 = vector.shape_cast %159 : vector<1x4x16xbf16> to vector<4x16xbf16>
    %cst_176 = arith.constant dense<0.000000e+00> : vector<16x16xf32>
    %161 = tpu.matmul %158, %160, %cst_176 {dimension_numbers = #tpu.dot_dimension_numbers<[1], [0], [0], [1], [0, 0, 1, 1], [], []>} : vector<16x4xbf16>, vector<4x16xbf16>, vector<16x16xf32> -> vector<16x16xf32>
    %162 = arith.addf %155, %161 : vector<16x16xf32>
    %c0_177 = arith.constant 0 : index
    %c3_178 = arith.constant 3 : index
    %c1_179 = arith.constant 1 : index
    %c0_180 = arith.constant 0 : index
    %163 = vector.load %arg1[%c0_177, %c3_178, %c1_179, %c0_180] : memref<1x18x18x4xf32, #tpu.memory_space<vmem>>, vector<1x1x16x4xf32>
    %164 = vector.shape_cast %163 : vector<1x1x16x4xf32> to vector<16x4xf32>
    %165 = arith.truncf %164 : vector<16x4xf32> to vector<16x4xbf16>
    %c4_181 = arith.constant 4 : index
    %c0_182 = arith.constant 0 : index
    %c0_183 = arith.constant 0 : index
    %166 = vector.load %arg2[%c4_181, %c0_182, %c0_183] : memref<9x4x16xbf16, #tpu.memory_space<vmem>>, vector<1x4x16xbf16>
    %167 = vector.shape_cast %166 : vector<1x4x16xbf16> to vector<4x16xbf16>
    %cst_184 = arith.constant dense<0.000000e+00> : vector<16x16xf32>
    %168 = tpu.matmul %165, %167, %cst_184 {dimension_numbers = #tpu.dot_dimension_numbers<[1], [0], [0], [1], [0, 0, 1, 1], [], []>} : vector<16x4xbf16>, vector<4x16xbf16>, vector<16x16xf32> -> vector<16x16xf32>
    %169 = arith.addf %162, %168 : vector<16x16xf32>
    %c0_185 = arith.constant 0 : index
    %c3_186 = arith.constant 3 : index
    %c2_187 = arith.constant 2 : index
    %c0_188 = arith.constant 0 : index
    %170 = vector.load %arg1[%c0_185, %c3_186, %c2_187, %c0_188] : memref<1x18x18x4xf32, #tpu.memory_space<vmem>>, vector<1x1x16x4xf32>
    %171 = vector.shape_cast %170 : vector<1x1x16x4xf32> to vector<16x4xf32>
    %172 = arith.truncf %171 : vector<16x4xf32> to vector<16x4xbf16>
    %c5_189 = arith.constant 5 : index
    %c0_190 = arith.constant 0 : index
    %c0_191 = arith.constant 0 : index
    %173 = vector.load %arg2[%c5_189, %c0_190, %c0_191] : memref<9x4x16xbf16, #tpu.memory_space<vmem>>, vector<1x4x16xbf16>
    %174 = vector.shape_cast %173 : vector<1x4x16xbf16> to vector<4x16xbf16>
    %cst_192 = arith.constant dense<0.000000e+00> : vector<16x16xf32>
    %175 = tpu.matmul %172, %174, %cst_192 {dimension_numbers = #tpu.dot_dimension_numbers<[1], [0], [0], [1], [0, 0, 1, 1], [], []>} : vector<16x4xbf16>, vector<4x16xbf16>, vector<16x16xf32> -> vector<16x16xf32>
    %176 = arith.addf %169, %175 : vector<16x16xf32>
    %c0_193 = arith.constant 0 : index
    %c4_194 = arith.constant 4 : index
    %c0_195 = arith.constant 0 : index
    %c0_196 = arith.constant 0 : index
    %177 = vector.load %arg1[%c0_193, %c4_194, %c0_195, %c0_196] : memref<1x18x18x4xf32, #tpu.memory_space<vmem>>, vector<1x1x16x4xf32>
    %178 = vector.shape_cast %177 : vector<1x1x16x4xf32> to vector<16x4xf32>
    %179 = arith.truncf %178 : vector<16x4xf32> to vector<16x4xbf16>
    %c6_197 = arith.constant 6 : index
    %c0_198 = arith.constant 0 : index
    %c0_199 = arith.constant 0 : index
    %180 = vector.load %arg2[%c6_197, %c0_198, %c0_199] : memref<9x4x16xbf16, #tpu.memory_space<vmem>>, vector<1x4x16xbf16>
    %181 = vector.shape_cast %180 : vector<1x4x16xbf16> to vector<4x16xbf16>
    %cst_200 = arith.constant dense<0.000000e+00> : vector<16x16xf32>
    %182 = tpu.matmul %179, %181, %cst_200 {dimension_numbers = #tpu.dot_dimension_numbers<[1], [0], [0], [1], [0, 0, 1, 1], [], []>} : vector<16x4xbf16>, vector<4x16xbf16>, vector<16x16xf32> -> vector<16x16xf32>
    %183 = arith.addf %176, %182 : vector<16x16xf32>
    %c0_201 = arith.constant 0 : index
    %c4_202 = arith.constant 4 : index
    %c1_203 = arith.constant 1 : index
    %c0_204 = arith.constant 0 : index
    %184 = vector.load %arg1[%c0_201, %c4_202, %c1_203, %c0_204] : memref<1x18x18x4xf32, #tpu.memory_space<vmem>>, vector<1x1x16x4xf32>
    %185 = vector.shape_cast %184 : vector<1x1x16x4xf32> to vector<16x4xf32>
    %186 = arith.truncf %185 : vector<16x4xf32> to vector<16x4xbf16>
    %c7_205 = arith.constant 7 : index
    %c0_206 = arith.constant 0 : index
    %c0_207 = arith.constant 0 : index
    %187 = vector.load %arg2[%c7_205, %c0_206, %c0_207] : memref<9x4x16xbf16, #tpu.memory_space<vmem>>, vector<1x4x16xbf16>
    %188 = vector.shape_cast %187 : vector<1x4x16xbf16> to vector<4x16xbf16>
    %cst_208 = arith.constant dense<0.000000e+00> : vector<16x16xf32>
    %189 = tpu.matmul %186, %188, %cst_208 {dimension_numbers = #tpu.dot_dimension_numbers<[1], [0], [0], [1], [0, 0, 1, 1], [], []>} : vector<16x4xbf16>, vector<4x16xbf16>, vector<16x16xf32> -> vector<16x16xf32>
    %190 = arith.addf %183, %189 : vector<16x16xf32>
    %c0_209 = arith.constant 0 : index
    %c4_210 = arith.constant 4 : index
    %c2_211 = arith.constant 2 : index
    %c0_212 = arith.constant 0 : index
    %191 = vector.load %arg1[%c0_209, %c4_210, %c2_211, %c0_212] : memref<1x18x18x4xf32, #tpu.memory_space<vmem>>, vector<1x1x16x4xf32>
    %192 = vector.shape_cast %191 : vector<1x1x16x4xf32> to vector<16x4xf32>
    %193 = arith.truncf %192 : vector<16x4xf32> to vector<16x4xbf16>
    %c8_213 = arith.constant 8 : index
    %c0_214 = arith.constant 0 : index
    %c0_215 = arith.constant 0 : index
    %194 = vector.load %arg2[%c8_213, %c0_214, %c0_215] : memref<9x4x16xbf16, #tpu.memory_space<vmem>>, vector<1x4x16xbf16>
    %195 = vector.shape_cast %194 : vector<1x4x16xbf16> to vector<4x16xbf16>
    %cst_216 = arith.constant dense<0.000000e+00> : vector<16x16xf32>
    %196 = tpu.matmul %193, %195, %cst_216 {dimension_numbers = #tpu.dot_dimension_numbers<[1], [0], [0], [1], [0, 0, 1, 1], [], []>} : vector<16x4xbf16>, vector<4x16xbf16>, vector<16x16xf32> -> vector<16x16xf32>
    %197 = arith.addf %190, %196 : vector<16x16xf32>
    %c0_217 = arith.constant 0 : index
    %c2_218 = arith.constant 2 : index
    %c0_219 = arith.constant 0 : index
    %c0_220 = arith.constant 0 : index
    %198 = vector.load %arg3[%c0_217, %c2_218, %c0_219, %c0_220] : memref<1x16x16x16xf32, #tpu.memory_space<vmem>>, vector<1x1x16x16xf32>
    %199 = vector.shape_cast %198 : vector<1x1x16x16xf32> to vector<16x16xf32>
    %200 = vector.shape_cast %197 : vector<16x16xf32> to vector<1x1x16x16xf32>
    tpu.vector_store %arg3[%c0_217, %c2_218, %c0_219, %c0_220], %200 {strides = array<i32>} : memref<1x16x16x16xf32, #tpu.memory_space<vmem>>, vector<1x1x16x16xf32>,
    %cst_221 = arith.constant 0.000000e+00 : f32
    %201 = vector.broadcast %cst_221 : f32 to vector<16x16xf32>
    %c0_222 = arith.constant 0 : index
    %c3_223 = arith.constant 3 : index
    %c0_224 = arith.constant 0 : index
    %c0_225 = arith.constant 0 : index
    %202 = vector.load %arg1[%c0_222, %c3_223, %c0_224, %c0_225] : memref<1x18x18x4xf32, #tpu.memory_space<vmem>>, vector<1x1x16x4xf32>
    %203 = vector.shape_cast %202 : vector<1x1x16x4xf32> to vector<16x4xf32>
    %204 = arith.truncf %203 : vector<16x4xf32> to vector<16x4xbf16>
    %c0_226 = arith.constant 0 : index
    %c0_227 = arith.constant 0 : index
    %c0_228 = arith.constant 0 : index
    %205 = vector.load %arg2[%c0_226, %c0_227, %c0_228] : memref<9x4x16xbf16, #tpu.memory_space<vmem>>, vector<1x4x16xbf16>
    %206 = vector.shape_cast %205 : vector<1x4x16xbf16> to vector<4x16xbf16>
    %cst_229 = arith.constant dense<0.000000e+00> : vector<16x16xf32>
    %207 = tpu.matmul %204, %206, %cst_229 {dimension_numbers = #tpu.dot_dimension_numbers<[1], [0], [0], [1], [0, 0, 1, 1], [], []>} : vector<16x4xbf16>, vector<4x16xbf16>, vector<16x16xf32> -> vector<16x16xf32>
    %208 = arith.addf %201, %207 : vector<16x16xf32>
    %c0_230 = arith.constant 0 : index
    %c3_231 = arith.constant 3 : index
    %c1_232 = arith.constant 1 : index
    %c0_233 = arith.constant 0 : index
    %209 = vector.load %arg1[%c0_230, %c3_231, %c1_232, %c0_233] : memref<1x18x18x4xf32, #tpu.memory_space<vmem>>, vector<1x1x16x4xf32>
    %210 = vector.shape_cast %209 : vector<1x1x16x4xf32> to vector<16x4xf32>
    %211 = arith.truncf %210 : vector<16x4xf32> to vector<16x4xbf16>
    %c1_234 = arith.constant 1 : index
    %c0_235 = arith.constant 0 : index
    %c0_236 = arith.constant 0 : index
    %212 = vector.load %arg2[%c1_234, %c0_235, %c0_236] : memref<9x4x16xbf16, #tpu.memory_space<vmem>>, vector<1x4x16xbf16>
    %213 = vector.shape_cast %212 : vector<1x4x16xbf16> to vector<4x16xbf16>
    %cst_237 = arith.constant dense<0.000000e+00> : vector<16x16xf32>
    %214 = tpu.matmul %211, %213, %cst_237 {dimension_numbers = #tpu.dot_dimension_numbers<[1], [0], [0], [1], [0, 0, 1, 1], [], []>} : vector<16x4xbf16>, vector<4x16xbf16>, vector<16x16xf32> -> vector<16x16xf32>
    %215 = arith.addf %208, %214 : vector<16x16xf32>
    %c0_238 = arith.constant 0 : index
    %c3_239 = arith.constant 3 : index
    %c2_240 = arith.constant 2 : index
    %c0_241 = arith.constant 0 : index
    %216 = vector.load %arg1[%c0_238, %c3_239, %c2_240, %c0_241] : memref<1x18x18x4xf32, #tpu.memory_space<vmem>>, vector<1x1x16x4xf32>
    %217 = vector.shape_cast %216 : vector<1x1x16x4xf32> to vector<16x4xf32>
    %218 = arith.truncf %217 : vector<16x4xf32> to vector<16x4xbf16>
    %c2_242 = arith.constant 2 : index
    %c0_243 = arith.constant 0 : index
    %c0_244 = arith.constant 0 : index
    %219 = vector.load %arg2[%c2_242, %c0_243, %c0_244] : memref<9x4x16xbf16, #tpu.memory_space<vmem>>, vector<1x4x16xbf16>
    %220 = vector.shape_cast %219 : vector<1x4x16xbf16> to vector<4x16xbf16>
    %cst_245 = arith.constant dense<0.000000e+00> : vector<16x16xf32>
    %221 = tpu.matmul %218, %220, %cst_245 {dimension_numbers = #tpu.dot_dimension_numbers<[1], [0], [0], [1], [0, 0, 1, 1], [], []>} : vector<16x4xbf16>, vector<4x16xbf16>, vector<16x16xf32> -> vector<16x16xf32>
    %222 = arith.addf %215, %221 : vector<16x16xf32>
    %c0_246 = arith.constant 0 : index
    %c4_247 = arith.constant 4 : index
    %c0_248 = arith.constant 0 : index
    %c0_249 = arith.constant 0 : index
    %223 = vector.load %arg1[%c0_246, %c4_247, %c0_248, %c0_249] : memref<1x18x18x4xf32, #tpu.memory_space<vmem>>, vector<1x1x16x4xf32>
    %224 = vector.shape_cast %223 : vector<1x1x16x4xf32> to vector<16x4xf32>
    %225 = arith.truncf %224 : vector<16x4xf32> to vector<16x4xbf16>
    %c3_250 = arith.constant 3 : index
    %c0_251 = arith.constant 0 : index
    %c0_252 = arith.constant 0 : index
    %226 = vector.load %arg2[%c3_250, %c0_251, %c0_252] : memref<9x4x16xbf16, #tpu.memory_space<vmem>>, vector<1x4x16xbf16>
    %227 = vector.shape_cast %226 : vector<1x4x16xbf16> to vector<4x16xbf16>
    %cst_253 = arith.constant dense<0.000000e+00> : vector<16x16xf32>
    %228 = tpu.matmul %225, %227, %cst_253 {dimension_numbers = #tpu.dot_dimension_numbers<[1], [0], [0], [1], [0, 0, 1, 1], [], []>} : vector<16x4xbf16>, vector<4x16xbf16>, vector<16x16xf32> -> vector<16x16xf32>
    %229 = arith.addf %222, %228 : vector<16x16xf32>
    %c0_254 = arith.constant 0 : index
    %c4_255 = arith.constant 4 : index
    %c1_256 = arith.constant 1 : index
    %c0_257 = arith.constant 0 : index
    %230 = vector.load %arg1[%c0_254, %c4_255, %c1_256, %c0_257] : memref<1x18x18x4xf32, #tpu.memory_space<vmem>>, vector<1x1x16x4xf32>
    %231 = vector.shape_cast %230 : vector<1x1x16x4xf32> to vector<16x4xf32>
    %232 = arith.truncf %231 : vector<16x4xf32> to vector<16x4xbf16>
    %c4_258 = arith.constant 4 : index
    %c0_259 = arith.constant 0 : index
    %c0_260 = arith.constant 0 : index
    %233 = vector.load %arg2[%c4_258, %c0_259, %c0_260] : memref<9x4x16xbf16, #tpu.memory_space<vmem>>, vector<1x4x16xbf16>
    %234 = vector.shape_cast %233 : vector<1x4x16xbf16> to vector<4x16xbf16>
    %cst_261 = arith.constant dense<0.000000e+00> : vector<16x16xf32>
    %235 = tpu.matmul %232, %234, %cst_261 {dimension_numbers = #tpu.dot_dimension_numbers<[1], [0], [0], [1], [0, 0, 1, 1], [], []>} : vector<16x4xbf16>, vector<4x16xbf16>, vector<16x16xf32> -> vector<16x16xf32>
    %236 = arith.addf %229, %235 : vector<16x16xf32>
    %c0_262 = arith.constant 0 : index
    %c4_263 = arith.constant 4 : index
    %c2_264 = arith.constant 2 : index
    %c0_265 = arith.constant 0 : index
    %237 = vector.load %arg1[%c0_262, %c4_263, %c2_264, %c0_265] : memref<1x18x18x4xf32, #tpu.memory_space<vmem>>, vector<1x1x16x4xf32>
    %238 = vector.shape_cast %237 : vector<1x1x16x4xf32> to vector<16x4xf32>
    %239 = arith.truncf %238 : vector<16x4xf32> to vector<16x4xbf16>
    %c5_266 = arith.constant 5 : index
    %c0_267 = arith.constant 0 : index
    %c0_268 = arith.constant 0 : index
    %240 = vector.load %arg2[%c5_266, %c0_267, %c0_268] : memref<9x4x16xbf16, #tpu.memory_space<vmem>>, vector<1x4x16xbf16>
    %241 = vector.shape_cast %240 : vector<1x4x16xbf16> to vector<4x16xbf16>
    %cst_269 = arith.constant dense<0.000000e+00> : vector<16x16xf32>
    %242 = tpu.matmul %239, %241, %cst_269 {dimension_numbers = #tpu.dot_dimension_numbers<[1], [0], [0], [1], [0, 0, 1, 1], [], []>} : vector<16x4xbf16>, vector<4x16xbf16>, vector<16x16xf32> -> vector<16x16xf32>
    %243 = arith.addf %236, %242 : vector<16x16xf32>
    %c0_270 = arith.constant 0 : index
    %c5_271 = arith.constant 5 : index
    %c0_272 = arith.constant 0 : index
    %c0_273 = arith.constant 0 : index
    %244 = vector.load %arg1[%c0_270, %c5_271, %c0_272, %c0_273] : memref<1x18x18x4xf32, #tpu.memory_space<vmem>>, vector<1x1x16x4xf32>
    %245 = vector.shape_cast %244 : vector<1x1x16x4xf32> to vector<16x4xf32>
    %246 = arith.truncf %245 : vector<16x4xf32> to vector<16x4xbf16>
    %c6_274 = arith.constant 6 : index
    %c0_275 = arith.constant 0 : index
    %c0_276 = arith.constant 0 : index
    %247 = vector.load %arg2[%c6_274, %c0_275, %c0_276] : memref<9x4x16xbf16, #tpu.memory_space<vmem>>, vector<1x4x16xbf16>
    %248 = vector.shape_cast %247 : vector<1x4x16xbf16> to vector<4x16xbf16>
    %cst_277 = arith.constant dense<0.000000e+00> : vector<16x16xf32>
    %249 = tpu.matmul %246, %248, %cst_277 {dimension_numbers = #tpu.dot_dimension_numbers<[1], [0], [0], [1], [0, 0, 1, 1], [], []>} : vector<16x4xbf16>, vector<4x16xbf16>, vector<16x16xf32> -> vector<16x16xf32>
    %250 = arith.addf %243, %249 : vector<16x16xf32>
    %c0_278 = arith.constant 0 : index
    %c5_279 = arith.constant 5 : index
    %c1_280 = arith.constant 1 : index
    %c0_281 = arith.constant 0 : index
    %251 = vector.load %arg1[%c0_278, %c5_279, %c1_280, %c0_281] : memref<1x18x18x4xf32, #tpu.memory_space<vmem>>, vector<1x1x16x4xf32>
    %252 = vector.shape_cast %251 : vector<1x1x16x4xf32> to vector<16x4xf32>
    %253 = arith.truncf %252 : vector<16x4xf32> to vector<16x4xbf16>
    %c7_282 = arith.constant 7 : index
    %c0_283 = arith.constant 0 : index
    %c0_284 = arith.constant 0 : index
    %254 = vector.load %arg2[%c7_282, %c0_283, %c0_284] : memref<9x4x16xbf16, #tpu.memory_space<vmem>>, vector<1x4x16xbf16>
    %255 = vector.shape_cast %254 : vector<1x4x16xbf16> to vector<4x16xbf16>
    %cst_285 = arith.constant dense<0.000000e+00> : vector<16x16xf32>
    %256 = tpu.matmul %253, %255, %cst_285 {dimension_numbers = #tpu.dot_dimension_numbers<[1], [0], [0], [1], [0, 0, 1, 1], [], []>} : vector<16x4xbf16>, vector<4x16xbf16>, vector<16x16xf32> -> vector<16x16xf32>
    %257 = arith.addf %250, %256 : vector<16x16xf32>
    %c0_286 = arith.constant 0 : index
    %c5_287 = arith.constant 5 : index
    %c2_288 = arith.constant 2 : index
    %c0_289 = arith.constant 0 : index
    %258 = vector.load %arg1[%c0_286, %c5_287, %c2_288, %c0_289] : memref<1x18x18x4xf32, #tpu.memory_space<vmem>>, vector<1x1x16x4xf32>
    %259 = vector.shape_cast %258 : vector<1x1x16x4xf32> to vector<16x4xf32>
    %260 = arith.truncf %259 : vector<16x4xf32> to vector<16x4xbf16>
    %c8_290 = arith.constant 8 : index
    %c0_291 = arith.constant 0 : index
    %c0_292 = arith.constant 0 : index
    %261 = vector.load %arg2[%c8_290, %c0_291, %c0_292] : memref<9x4x16xbf16, #tpu.memory_space<vmem>>, vector<1x4x16xbf16>
    %262 = vector.shape_cast %261 : vector<1x4x16xbf16> to vector<4x16xbf16>
    %cst_293 = arith.constant dense<0.000000e+00> : vector<16x16xf32>
    %263 = tpu.matmul %260, %262, %cst_293 {dimension_numbers = #tpu.dot_dimension_numbers<[1], [0], [0], [1], [0, 0, 1, 1], [], []>} : vector<16x4xbf16>, vector<4x16xbf16>, vector<16x16xf32> -> vector<16x16xf32>
    %264 = arith.addf %257, %263 : vector<16x16xf32>
    %c0_294 = arith.constant 0 : index
    %c3_295 = arith.constant 3 : index
    %c0_296 = arith.constant 0 : index
    %c0_297 = arith.constant 0 : index
    %265 = vector.load %arg3[%c0_294, %c3_295, %c0_296, %c0_297] : memref<1x16x16x16xf32, #tpu.memory_space<vmem>>, vector<1x1x16x16xf32>
    %266 = vector.shape_cast %265 : vector<1x1x16x16xf32> to vector<16x16xf32>
    %267 = vector.shape_cast %264 : vector<16x16xf32> to vector<1x1x16x16xf32>
    tpu.vector_store %arg3[%c0_294, %c3_295, %c0_296, %c0_297], %267 {strides = array<i32>} : memref<1x16x16x16xf32, #tpu.memory_space<vmem>>, vector<1x1x16x16xf32>,
    %cst_298 = arith.constant 0.000000e+00 : f32
    %268 = vector.broadcast %cst_298 : f32 to vector<16x16xf32>
    %c0_299 = arith.constant 0 : index
    %c4_300 = arith.constant 4 : index
    %c0_301 = arith.constant 0 : index
    %c0_302 = arith.constant 0 : index
    %269 = vector.load %arg1[%c0_299, %c4_300, %c0_301, %c0_302] : memref<1x18x18x4xf32, #tpu.memory_space<vmem>>, vector<1x1x16x4xf32>
    %270 = vector.shape_cast %269 : vector<1x1x16x4xf32> to vector<16x4xf32>
    %271 = arith.truncf %270 : vector<16x4xf32> to vector<16x4xbf16>
    %c0_303 = arith.constant 0 : index
    %c0_304 = arith.constant 0 : index
    %c0_305 = arith.constant 0 : index
    %272 = vector.load %arg2[%c0_303, %c0_304, %c0_305] : memref<9x4x16xbf16, #tpu.memory_space<vmem>>, vector<1x4x16xbf16>
    %273 = vector.shape_cast %272 : vector<1x4x16xbf16> to vector<4x16xbf16>
    %cst_306 = arith.constant dense<0.000000e+00> : vector<16x16xf32>
    %274 = tpu.matmul %271, %273, %cst_306 {dimension_numbers = #tpu.dot_dimension_numbers<[1], [0], [0], [1], [0, 0, 1, 1], [], []>} : vector<16x4xbf16>, vector<4x16xbf16>, vector<16x16xf32> -> vector<16x16xf32>
    %275 = arith.addf %268, %274 : vector<16x16xf32>
    %c0_307 = arith.constant 0 : index
    %c4_308 = arith.constant 4 : index
    %c1_309 = arith.constant 1 : index
    %c0_310 = arith.constant 0 : index
    %276 = vector.load %arg1[%c0_307, %c4_308, %c1_309, %c0_310] : memref<1x18x18x4xf32, #tpu.memory_space<vmem>>, vector<1x1x16x4xf32>
    %277 = vector.shape_cast %276 : vector<1x1x16x4xf32> to vector<16x4xf32>
    %278 = arith.truncf %277 : vector<16x4xf32> to vector<16x4xbf16>
    %c1_311 = arith.constant 1 : index
    %c0_312 = arith.constant 0 : index
    %c0_313 = arith.constant 0 : index
    %279 = vector.load %arg2[%c1_311, %c0_312, %c0_313] : memref<9x4x16xbf16, #tpu.memory_space<vmem>>, vector<1x4x16xbf16>
    %280 = vector.shape_cast %279 : vector<1x4x16xbf16> to vector<4x16xbf16>
    %cst_314 = arith.constant dense<0.000000e+00> : vector<16x16xf32>
    %281 = tpu.matmul %278, %280, %cst_314 {dimension_numbers = #tpu.dot_dimension_numbers<[1], [0], [0], [1], [0, 0, 1, 1], [], []>} : vector<16x4xbf16>, vector<4x16xbf16>, vector<16x16xf32> -> vector<16x16xf32>
    %282 = arith.addf %275, %281 : vector<16x16xf32>
    %c0_315 = arith.constant 0 : index
    %c4_316 = arith.constant 4 : index
    %c2_317 = arith.constant 2 : index
    %c0_318 = arith.constant 0 : index
    %283 = vector.load %arg1[%c0_315, %c4_316, %c2_317, %c0_318] : memref<1x18x18x4xf32, #tpu.memory_space<vmem>>, vector<1x1x16x4xf32>
    %284 = vector.shape_cast %283 : vector<1x1x16x4xf32> to vector<16x4xf32>
    %285 = arith.truncf %284 : vector<16x4xf32> to vector<16x4xbf16>
    %c2_319 = arith.constant 2 : index
    %c0_320 = arith.constant 0 : index
    %c0_321 = arith.constant 0 : index
    %286 = vector.load %arg2[%c2_319, %c0_320, %c0_321] : memref<9x4x16xbf16, #tpu.memory_space<vmem>>, vector<1x4x16xbf16>
    %287 = vector.shape_cast %286 : vector<1x4x16xbf16> to vector<4x16xbf16>
    %cst_322 = arith.constant dense<0.000000e+00> : vector<16x16xf32>
    %288 = tpu.matmul %285, %287, %cst_322 {dimension_numbers = #tpu.dot_dimension_numbers<[1], [0], [0], [1], [0, 0, 1, 1], [], []>} : vector<16x4xbf16>, vector<4x16xbf16>, vector<16x16xf32> -> vector<16x16xf32>
    %289 = arith.addf %282, %288 : vector<16x16xf32>
    %c0_323 = arith.constant 0 : index
    %c5_324 = arith.constant 5 : index
    %c0_325 = arith.constant 0 : index
    %c0_326 = arith.constant 0 : index
    %290 = vector.load %arg1[%c0_323, %c5_324, %c0_325, %c0_326] : memref<1x18x18x4xf32, #tpu.memory_space<vmem>>, vector<1x1x16x4xf32>
    %291 = vector.shape_cast %290 : vector<1x1x16x4xf32> to vector<16x4xf32>
    %292 = arith.truncf %291 : vector<16x4xf32> to vector<16x4xbf16>
    %c3_327 = arith.constant 3 : index
    %c0_328 = arith.constant 0 : index
    %c0_329 = arith.constant 0 : index
    %293 = vector.load %arg2[%c3_327, %c0_328, %c0_329] : memref<9x4x16xbf16, #tpu.memory_space<vmem>>, vector<1x4x16xbf16>
    %294 = vector.shape_cast %293 : vector<1x4x16xbf16> to vector<4x16xbf16>
    %cst_330 = arith.constant dense<0.000000e+00> : vector<16x16xf32>
    %295 = tpu.matmul %292, %294, %cst_330 {dimension_numbers = #tpu.dot_dimension_numbers<[1], [0], [0], [1], [0, 0, 1, 1], [], []>} : vector<16x4xbf16>, vector<4x16xbf16>, vector<16x16xf32> -> vector<16x16xf32>
    %296 = arith.addf %289, %295 : vector<16x16xf32>
    %c0_331 = arith.constant 0 : index
    %c5_332 = arith.constant 5 : index
    %c1_333 = arith.constant 1 : index
    %c0_334 = arith.constant 0 : index
    %297 = vector.load %arg1[%c0_331, %c5_332, %c1_333, %c0_334] : memref<1x18x18x4xf32, #tpu.memory_space<vmem>>, vector<1x1x16x4xf32>
    %298 = vector.shape_cast %297 : vector<1x1x16x4xf32> to vector<16x4xf32>
    %299 = arith.truncf %298 : vector<16x4xf32> to vector<16x4xbf16>
    %c4_335 = arith.constant 4 : index
    %c0_336 = arith.constant 0 : index
    %c0_337 = arith.constant 0 : index
    %300 = vector.load %arg2[%c4_335, %c0_336, %c0_337] : memref<9x4x16xbf16, #tpu.memory_space<vmem>>, vector<1x4x16xbf16>
    %301 = vector.shape_cast %300 : vector<1x4x16xbf16> to vector<4x16xbf16>
    %cst_338 = arith.constant dense<0.000000e+00> : vector<16x16xf32>
    %302 = tpu.matmul %299, %301, %cst_338 {dimension_numbers = #tpu.dot_dimension_numbers<[1], [0], [0], [1], [0, 0, 1, 1], [], []>} : vector<16x4xbf16>, vector<4x16xbf16>, vector<16x16xf32> -> vector<16x16xf32>
    %303 = arith.addf %296, %302 : vector<16x16xf32>
    %c0_339 = arith.constant 0 : index
    %c5_340 = arith.constant 5 : index
    %c2_341 = arith.constant 2 : index
    %c0_342 = arith.constant 0 : index
    %304 = vector.load %arg1[%c0_339, %c5_340, %c2_341, %c0_342] : memref<1x18x18x4xf32, #tpu.memory_space<vmem>>, vector<1x1x16x4xf32>
    %305 = vector.shape_cast %304 : vector<1x1x16x4xf32> to vector<16x4xf32>
    %306 = arith.truncf %305 : vector<16x4xf32> to vector<16x4xbf16>
    %c5_343 = arith.constant 5 : index
    %c0_344 = arith.constant 0 : index
    %c0_345 = arith.constant 0 : index
    %307 = vector.load %arg2[%c5_343, %c0_344, %c0_345] : memref<9x4x16xbf16, #tpu.memory_space<vmem>>, vector<1x4x16xbf16>
    %308 = vector.shape_cast %307 : vector<1x4x16xbf16> to vector<4x16xbf16>
    %cst_346 = arith.constant dense<0.000000e+00> : vector<16x16xf32>
    %309 = tpu.matmul %306, %308, %cst_346 {dimension_numbers = #tpu.dot_dimension_numbers<[1], [0], [0], [1], [0, 0, 1, 1], [], []>} : vector<16x4xbf16>, vector<4x16xbf16>, vector<16x16xf32> -> vector<16x16xf32>
    %310 = arith.addf %303, %309 : vector<16x16xf32>
    %c0_347 = arith.constant 0 : index
    %c6_348 = arith.constant 6 : index
    %c0_349 = arith.constant 0 : index
    %c0_350 = arith.constant 0 : index
    %311 = vector.load %arg1[%c0_347, %c6_348, %c0_349, %c0_350] : memref<1x18x18x4xf32, #tpu.memory_space<vmem>>, vector<1x1x16x4xf32>
    %312 = vector.shape_cast %311 : vector<1x1x16x4xf32> to vector<16x4xf32>
    %313 = arith.truncf %312 : vector<16x4xf32> to vector<16x4xbf16>
    %c6_351 = arith.constant 6 : index
    %c0_352 = arith.constant 0 : index
    %c0_353 = arith.constant 0 : index
    %314 = vector.load %arg2[%c6_351, %c0_352, %c0_353] : memref<9x4x16xbf16, #tpu.memory_space<vmem>>, vector<1x4x16xbf16>
    %315 = vector.shape_cast %314 : vector<1x4x16xbf16> to vector<4x16xbf16>
    %cst_354 = arith.constant dense<0.000000e+00> : vector<16x16xf32>
    %316 = tpu.matmul %313, %315, %cst_354 {dimension_numbers = #tpu.dot_dimension_numbers<[1], [0], [0], [1], [0, 0, 1, 1], [], []>} : vector<16x4xbf16>, vector<4x16xbf16>, vector<16x16xf32> -> vector<16x16xf32>
    %317 = arith.addf %310, %316 : vector<16x16xf32>
    %c0_355 = arith.constant 0 : index
    %c6_356 = arith.constant 6 : index
    %c1_357 = arith.constant 1 : index
    %c0_358 = arith.constant 0 : index
    %318 = vector.load %arg1[%c0_355, %c6_356, %c1_357, %c0_358] : memref<1x18x18x4xf32, #tpu.memory_space<vmem>>, vector<1x1x16x4xf32>
    %319 = vector.shape_cast %318 : vector<1x1x16x4xf32> to vector<16x4xf32>
    %320 = arith.truncf %319 : vector<16x4xf32> to vector<16x4xbf16>
    %c7_359 = arith.constant 7 : index
    %c0_360 = arith.constant 0 : index
    %c0_361 = arith.constant 0 : index
    %321 = vector.load %arg2[%c7_359, %c0_360, %c0_361] : memref<9x4x16xbf16, #tpu.memory_space<vmem>>, vector<1x4x16xbf16>
    %322 = vector.shape_cast %321 : vector<1x4x16xbf16> to vector<4x16xbf16>
    %cst_362 = arith.constant dense<0.000000e+00> : vector<16x16xf32>
    %323 = tpu.matmul %320, %322, %cst_362 {dimension_numbers = #tpu.dot_dimension_numbers<[1], [0], [0], [1], [0, 0, 1, 1], [], []>} : vector<16x4xbf16>, vector<4x16xbf16>, vector<16x16xf32> -> vector<16x16xf32>
    %324 = arith.addf %317, %323 : vector<16x16xf32>
    %c0_363 = arith.constant 0 : index
    %c6_364 = arith.constant 6 : index
    %c2_365 = arith.constant 2 : index
    %c0_366 = arith.constant 0 : index
    %325 = vector.load %arg1[%c0_363, %c6_364, %c2_365, %c0_366] : memref<1x18x18x4xf32, #tpu.memory_space<vmem>>, vector<1x1x16x4xf32>
    %326 = vector.shape_cast %325 : vector<1x1x16x4xf32> to vector<16x4xf32>
    %327 = arith.truncf %326 : vector<16x4xf32> to vector<16x4xbf16>
    %c8_367 = arith.constant 8 : index
    %c0_368 = arith.constant 0 : index
    %c0_369 = arith.constant 0 : index
    %328 = vector.load %arg2[%c8_367, %c0_368, %c0_369] : memref<9x4x16xbf16, #tpu.memory_space<vmem>>, vector<1x4x16xbf16>
    %329 = vector.shape_cast %328 : vector<1x4x16xbf16> to vector<4x16xbf16>
    %cst_370 = arith.constant dense<0.000000e+00> : vector<16x16xf32>
    %330 = tpu.matmul %327, %329, %cst_370 {dimension_numbers = #tpu.dot_dimension_numbers<[1], [0], [0], [1], [0, 0, 1, 1], [], []>} : vector<16x4xbf16>, vector<4x16xbf16>, vector<16x16xf32> -> vector<16x16xf32>
    %331 = arith.addf %324, %330 : vector<16x16xf32>
    %c0_371 = arith.constant 0 : index
    %c4_372 = arith.constant 4 : index
    %c0_373 = arith.constant 0 : index
    %c0_374 = arith.constant 0 : index
    %332 = vector.load %arg3[%c0_371, %c4_372, %c0_373, %c0_374] : memref<1x16x16x16xf32, #tpu.memory_space<vmem>>, vector<1x1x16x16xf32>
    %333 = vector.shape_cast %332 : vector<1x1x16x16xf32> to vector<16x16xf32>
    %334 = vector.shape_cast %331 : vector<16x16xf32> to vector<1x1x16x16xf32>
    tpu.vector_store %arg3[%c0_371, %c4_372, %c0_373, %c0_374], %334 {strides = array<i32>} : memref<1x16x16x16xf32, #tpu.memory_space<vmem>>, vector<1x1x16x16xf32>,
    %cst_375 = arith.constant 0.000000e+00 : f32
    %335 = vector.broadcast %cst_375 : f32 to vector<16x16xf32>
    %c0_376 = arith.constant 0 : index
    %c5_377 = arith.constant 5 : index
    %c0_378 = arith.constant 0 : index
    %c0_379 = arith.constant 0 : index
    %336 = vector.load %arg1[%c0_376, %c5_377, %c0_378, %c0_379] : memref<1x18x18x4xf32, #tpu.memory_space<vmem>>, vector<1x1x16x4xf32>
    %337 = vector.shape_cast %336 : vector<1x1x16x4xf32> to vector<16x4xf32>
    %338 = arith.truncf %337 : vector<16x4xf32> to vector<16x4xbf16>
    %c0_380 = arith.constant 0 : index
    %c0_381 = arith.constant 0 : index
    %c0_382 = arith.constant 0 : index
    %339 = vector.load %arg2[%c0_380, %c0_381, %c0_382] : memref<9x4x16xbf16, #tpu.memory_space<vmem>>, vector<1x4x16xbf16>
    %340 = vector.shape_cast %339 : vector<1x4x16xbf16> to vector<4x16xbf16>
    %cst_383 = arith.constant dense<0.000000e+00> : vector<16x16xf32>
    %341 = tpu.matmul %338, %340, %cst_383 {dimension_numbers = #tpu.dot_dimension_numbers<[1], [0], [0], [1], [0, 0, 1, 1], [], []>} : vector<16x4xbf16>, vector<4x16xbf16>, vector<16x16xf32> -> vector<16x16xf32>
    %342 = arith.addf %335, %341 : vector<16x16xf32>
    %c0_384 = arith.constant 0 : index
    %c5_385 = arith.constant 5 : index
    %c1_386 = arith.constant 1 : index
    %c0_387 = arith.constant 0 : index
    %343 = vector.load %arg1[%c0_384, %c5_385, %c1_386, %c0_387] : memref<1x18x18x4xf32, #tpu.memory_space<vmem>>, vector<1x1x16x4xf32>
    %344 = vector.shape_cast %343 : vector<1x1x16x4xf32> to vector<16x4xf32>
    %345 = arith.truncf %344 : vector<16x4xf32> to vector<16x4xbf16>
    %c1_388 = arith.constant 1 : index
    %c0_389 = arith.constant 0 : index
    %c0_390 = arith.constant 0 : index
    %346 = vector.load %arg2[%c1_388, %c0_389, %c0_390] : memref<9x4x16xbf16, #tpu.memory_space<vmem>>, vector<1x4x16xbf16>
    %347 = vector.shape_cast %346 : vector<1x4x16xbf16> to vector<4x16xbf16>
    %cst_391 = arith.constant dense<0.000000e+00> : vector<16x16xf32>
    %348 = tpu.matmul %345, %347, %cst_391 {dimension_numbers = #tpu.dot_dimension_numbers<[1], [0], [0], [1], [0, 0, 1, 1], [], []>} : vector<16x4xbf16>, vector<4x16xbf16>, vector<16x16xf32> -> vector<16x16xf32>
    %349 = arith.addf %342, %348 : vector<16x16xf32>
    %c0_392 = arith.constant 0 : index
    %c5_393 = arith.constant 5 : index
    %c2_394 = arith.constant 2 : index
    %c0_395 = arith.constant 0 : index
    %350 = vector.load %arg1[%c0_392, %c5_393, %c2_394, %c0_395] : memref<1x18x18x4xf32, #tpu.memory_space<vmem>>, vector<1x1x16x4xf32>
    %351 = vector.shape_cast %350 : vector<1x1x16x4xf32> to vector<16x4xf32>
    %352 = arith.truncf %351 : vector<16x4xf32> to vector<16x4xbf16>
    %c2_396 = arith.constant 2 : index
    %c0_397 = arith.constant 0 : index
    %c0_398 = arith.constant 0 : index
    %353 = vector.load %arg2[%c2_396, %c0_397, %c0_398] : memref<9x4x16xbf16, #tpu.memory_space<vmem>>, vector<1x4x16xbf16>
    %354 = vector.shape_cast %353 : vector<1x4x16xbf16> to vector<4x16xbf16>
    %cst_399 = arith.constant dense<0.000000e+00> : vector<16x16xf32>
    %355 = tpu.matmul %352, %354, %cst_399 {dimension_numbers = #tpu.dot_dimension_numbers<[1], [0], [0], [1], [0, 0, 1, 1], [], []>} : vector<16x4xbf16>, vector<4x16xbf16>, vector<16x16xf32> -> vector<16x16xf32>
    %356 = arith.addf %349, %355 : vector<16x16xf32>
    %c0_400 = arith.constant 0 : index
    %c6_401 = arith.constant 6 : index
    %c0_402 = arith.constant 0 : index
    %c0_403 = arith.constant 0 : index
    %357 = vector.load %arg1[%c0_400, %c6_401, %c0_402, %c0_403] : memref<1x18x18x4xf32, #tpu.memory_space<vmem>>, vector<1x1x16x4xf32>
    %358 = vector.shape_cast %357 : vector<1x1x16x4xf32> to vector<16x4xf32>
    %359 = arith.truncf %358 : vector<16x4xf32> to vector<16x4xbf16>
    %c3_404 = arith.constant 3 : index
    %c0_405 = arith.constant 0 : index
    %c0_406 = arith.constant 0 : index
    %360 = vector.load %arg2[%c3_404, %c0_405, %c0_406] : memref<9x4x16xbf16, #tpu.memory_space<vmem>>, vector<1x4x16xbf16>
    %361 = vector.shape_cast %360 : vector<1x4x16xbf16> to vector<4x16xbf16>
    %cst_407 = arith.constant dense<0.000000e+00> : vector<16x16xf32>
    %362 = tpu.matmul %359, %361, %cst_407 {dimension_numbers = #tpu.dot_dimension_numbers<[1], [0], [0], [1], [0, 0, 1, 1], [], []>} : vector<16x4xbf16>, vector<4x16xbf16>, vector<16x16xf32> -> vector<16x16xf32>
    %363 = arith.addf %356, %362 : vector<16x16xf32>
    %c0_408 = arith.constant 0 : index
    %c6_409 = arith.constant 6 : index
    %c1_410 = arith.constant 1 : index
    %c0_411 = arith.constant 0 : index
    %364 = vector.load %arg1[%c0_408, %c6_409, %c1_410, %c0_411] : memref<1x18x18x4xf32, #tpu.memory_space<vmem>>, vector<1x1x16x4xf32>
    %365 = vector.shape_cast %364 : vector<1x1x16x4xf32> to vector<16x4xf32>
    %366 = arith.truncf %365 : vector<16x4xf32> to vector<16x4xbf16>
    %c4_412 = arith.constant 4 : index
    %c0_413 = arith.constant 0 : index
    %c0_414 = arith.constant 0 : index
    %367 = vector.load %arg2[%c4_412, %c0_413, %c0_414] : memref<9x4x16xbf16, #tpu.memory_space<vmem>>, vector<1x4x16xbf16>
    %368 = vector.shape_cast %367 : vector<1x4x16xbf16> to vector<4x16xbf16>
    %cst_415 = arith.constant dense<0.000000e+00> : vector<16x16xf32>
    %369 = tpu.matmul %366, %368, %cst_415 {dimension_numbers = #tpu.dot_dimension_numbers<[1], [0], [0], [1], [0, 0, 1, 1], [], []>} : vector<16x4xbf16>, vector<4x16xbf16>, vector<16x16xf32> -> vector<16x16xf32>
    %370 = arith.addf %363, %369 : vector<16x16xf32>
    %c0_416 = arith.constant 0 : index
    %c6_417 = arith.constant 6 : index
    %c2_418 = arith.constant 2 : index
    %c0_419 = arith.constant 0 : index
    %371 = vector.load %arg1[%c0_416, %c6_417, %c2_418, %c0_419] : memref<1x18x18x4xf32, #tpu.memory_space<vmem>>, vector<1x1x16x4xf32>
    %372 = vector.shape_cast %371 : vector<1x1x16x4xf32> to vector<16x4xf32>
    %373 = arith.truncf %372 : vector<16x4xf32> to vector<16x4xbf16>
    %c5_420 = arith.constant 5 : index
    %c0_421 = arith.constant 0 : index
    %c0_422 = arith.constant 0 : index
    %374 = vector.load %arg2[%c5_420, %c0_421, %c0_422] : memref<9x4x16xbf16, #tpu.memory_space<vmem>>, vector<1x4x16xbf16>
    %375 = vector.shape_cast %374 : vector<1x4x16xbf16> to vector<4x16xbf16>
    %cst_423 = arith.constant dense<0.000000e+00> : vector<16x16xf32>
    %376 = tpu.matmul %373, %375, %cst_423 {dimension_numbers = #tpu.dot_dimension_numbers<[1], [0], [0], [1], [0, 0, 1, 1], [], []>} : vector<16x4xbf16>, vector<4x16xbf16>, vector<16x16xf32> -> vector<16x16xf32>
    %377 = arith.addf %370, %376 : vector<16x16xf32>
    %c0_424 = arith.constant 0 : index
    %c7_425 = arith.constant 7 : index
    %c0_426 = arith.constant 0 : index
    %c0_427 = arith.constant 0 : index
    %378 = vector.load %arg1[%c0_424, %c7_425, %c0_426, %c0_427] : memref<1x18x18x4xf32, #tpu.memory_space<vmem>>, vector<1x1x16x4xf32>
    %379 = vector.shape_cast %378 : vector<1x1x16x4xf32> to vector<16x4xf32>
    %380 = arith.truncf %379 : vector<16x4xf32> to vector<16x4xbf16>
    %c6_428 = arith.constant 6 : index
    %c0_429 = arith.constant 0 : index
    %c0_430 = arith.constant 0 : index
    %381 = vector.load %arg2[%c6_428, %c0_429, %c0_430] : memref<9x4x16xbf16, #tpu.memory_space<vmem>>, vector<1x4x16xbf16>
    %382 = vector.shape_cast %381 : vector<1x4x16xbf16> to vector<4x16xbf16>
    %cst_431 = arith.constant dense<0.000000e+00> : vector<16x16xf32>
    %383 = tpu.matmul %380, %382, %cst_431 {dimension_numbers = #tpu.dot_dimension_numbers<[1], [0], [0], [1], [0, 0, 1, 1], [], []>} : vector<16x4xbf16>, vector<4x16xbf16>, vector<16x16xf32> -> vector<16x16xf32>
    %384 = arith.addf %377, %383 : vector<16x16xf32>
    %c0_432 = arith.constant 0 : index
    %c7_433 = arith.constant 7 : index
    %c1_434 = arith.constant 1 : index
    %c0_435 = arith.constant 0 : index
    %385 = vector.load %arg1[%c0_432, %c7_433, %c1_434, %c0_435] : memref<1x18x18x4xf32, #tpu.memory_space<vmem>>, vector<1x1x16x4xf32>
    %386 = vector.shape_cast %385 : vector<1x1x16x4xf32> to vector<16x4xf32>
    %387 = arith.truncf %386 : vector<16x4xf32> to vector<16x4xbf16>
    %c7_436 = arith.constant 7 : index
    %c0_437 = arith.constant 0 : index
    %c0_438 = arith.constant 0 : index
    %388 = vector.load %arg2[%c7_436, %c0_437, %c0_438] : memref<9x4x16xbf16, #tpu.memory_space<vmem>>, vector<1x4x16xbf16>
    %389 = vector.shape_cast %388 : vector<1x4x16xbf16> to vector<4x16xbf16>
    %cst_439 = arith.constant dense<0.000000e+00> : vector<16x16xf32>
    %390 = tpu.matmul %387, %389, %cst_439 {dimension_numbers = #tpu.dot_dimension_numbers<[1], [0], [0], [1], [0, 0, 1, 1], [], []>} : vector<16x4xbf16>, vector<4x16xbf16>, vector<16x16xf32> -> vector<16x16xf32>
    %391 = arith.addf %384, %390 : vector<16x16xf32>
    %c0_440 = arith.constant 0 : index
    %c7_441 = arith.constant 7 : index
    %c2_442 = arith.constant 2 : index
    %c0_443 = arith.constant 0 : index
    %392 = vector.load %arg1[%c0_440, %c7_441, %c2_442, %c0_443] : memref<1x18x18x4xf32, #tpu.memory_space<vmem>>, vector<1x1x16x4xf32>
    %393 = vector.shape_cast %392 : vector<1x1x16x4xf32> to vector<16x4xf32>
    %394 = arith.truncf %393 : vector<16x4xf32> to vector<16x4xbf16>
    %c8_444 = arith.constant 8 : index
    %c0_445 = arith.constant 0 : index
    %c0_446 = arith.constant 0 : index
    %395 = vector.load %arg2[%c8_444, %c0_445, %c0_446] : memref<9x4x16xbf16, #tpu.memory_space<vmem>>, vector<1x4x16xbf16>
    %396 = vector.shape_cast %395 : vector<1x4x16xbf16> to vector<4x16xbf16>
    %cst_447 = arith.constant dense<0.000000e+00> : vector<16x16xf32>
    %397 = tpu.matmul %394, %396, %cst_447 {dimension_numbers = #tpu.dot_dimension_numbers<[1], [0], [0], [1], [0, 0, 1, 1], [], []>} : vector<16x4xbf16>, vector<4x16xbf16>, vector<16x16xf32> -> vector<16x16xf32>
    %398 = arith.addf %391, %397 : vector<16x16xf32>
    %c0_448 = arith.constant 0 : index
    %c5_449 = arith.constant 5 : index
    %c0_450 = arith.constant 0 : index
    %c0_451 = arith.constant 0 : index
    %399 = vector.load %arg3[%c0_448, %c5_449, %c0_450, %c0_451] : memref<1x16x16x16xf32, #tpu.memory_space<vmem>>, vector<1x1x16x16xf32>
    %400 = vector.shape_cast %399 : vector<1x1x16x16xf32> to vector<16x16xf32>
    %401 = vector.shape_cast %398 : vector<16x16xf32> to vector<1x1x16x16xf32>
    tpu.vector_store %arg3[%c0_448, %c5_449, %c0_450, %c0_451], %401 {strides = array<i32>} : memref<1x16x16x16xf32, #tpu.memory_space<vmem>>, vector<1x1x16x16xf32>,
    %cst_452 = arith.constant 0.000000e+00 : f32
    %402 = vector.broadcast %cst_452 : f32 to vector<16x16xf32>
    %c0_453 = arith.constant 0 : index
    %c6_454 = arith.constant 6 : index
    %c0_455 = arith.constant 0 : index
    %c0_456 = arith.constant 0 : index
    %403 = vector.load %arg1[%c0_453, %c6_454, %c0_455, %c0_456] : memref<1x18x18x4xf32, #tpu.memory_space<vmem>>, vector<1x1x16x4xf32>
    %404 = vector.shape_cast %403 : vector<1x1x16x4xf32> to vector<16x4xf32>
    %405 = arith.truncf %404 : vector<16x4xf32> to vector<16x4xbf16>
    %c0_457 = arith.constant 0 : index
    %c0_458 = arith.constant 0 : index
    %c0_459 = arith.constant 0 : index
    %406 = vector.load %arg2[%c0_457, %c0_458, %c0_459] : memref<9x4x16xbf16, #tpu.memory_space<vmem>>, vector<1x4x16xbf16>
    %407 = vector.shape_cast %406 : vector<1x4x16xbf16> to vector<4x16xbf16>
    %cst_460 = arith.constant dense<0.000000e+00> : vector<16x16xf32>
    %408 = tpu.matmul %405, %407, %cst_460 {dimension_numbers = #tpu.dot_dimension_numbers<[1], [0], [0], [1], [0, 0, 1, 1], [], []>} : vector<16x4xbf16>, vector<4x16xbf16>, vector<16x16xf32> -> vector<16x16xf32>
    %409 = arith.addf %402, %408 : vector<16x16xf32>
    %c0_461 = arith.constant 0 : index
    %c6_462 = arith.constant 6 : index
    %c1_463 = arith.constant 1 : index
    %c0_464 = arith.constant 0 : index
    %410 = vector.load %arg1[%c0_461, %c6_462, %c1_463, %c0_464] : memref<1x18x18x4xf32, #tpu.memory_space<vmem>>, vector<1x1x16x4xf32>
    %411 = vector.shape_cast %410 : vector<1x1x16x4xf32> to vector<16x4xf32>
    %412 = arith.truncf %411 : vector<16x4xf32> to vector<16x4xbf16>
    %c1_465 = arith.constant 1 : index
    %c0_466 = arith.constant 0 : index
    %c0_467 = arith.constant 0 : index
    %413 = vector.load %arg2[%c1_465, %c0_466, %c0_467] : memref<9x4x16xbf16, #tpu.memory_space<vmem>>, vector<1x4x16xbf16>
    %414 = vector.shape_cast %413 : vector<1x4x16xbf16> to vector<4x16xbf16>
    %cst_468 = arith.constant dense<0.000000e+00> : vector<16x16xf32>
    %415 = tpu.matmul %412, %414, %cst_468 {dimension_numbers = #tpu.dot_dimension_numbers<[1], [0], [0], [1], [0, 0, 1, 1], [], []>} : vector<16x4xbf16>, vector<4x16xbf16>, vector<16x16xf32> -> vector<16x16xf32>
    %416 = arith.addf %409, %415 : vector<16x16xf32>
    %c0_469 = arith.constant 0 : index
    %c6_470 = arith.constant 6 : index
    %c2_471 = arith.constant 2 : index
    %c0_472 = arith.constant 0 : index
    %417 = vector.load %arg1[%c0_469, %c6_470, %c2_471, %c0_472] : memref<1x18x18x4xf32, #tpu.memory_space<vmem>>, vector<1x1x16x4xf32>
    %418 = vector.shape_cast %417 : vector<1x1x16x4xf32> to vector<16x4xf32>
    %419 = arith.truncf %418 : vector<16x4xf32> to vector<16x4xbf16>
    %c2_473 = arith.constant 2 : index
    %c0_474 = arith.constant 0 : index
    %c0_475 = arith.constant 0 : index
    %420 = vector.load %arg2[%c2_473, %c0_474, %c0_475] : memref<9x4x16xbf16, #tpu.memory_space<vmem>>, vector<1x4x16xbf16>
    %421 = vector.shape_cast %420 : vector<1x4x16xbf16> to vector<4x16xbf16>
    %cst_476 = arith.constant dense<0.000000e+00> : vector<16x16xf32>
    %422 = tpu.matmul %419, %421, %cst_476 {dimension_numbers = #tpu.dot_dimension_numbers<[1], [0], [0], [1], [0, 0, 1, 1], [], []>} : vector<16x4xbf16>, vector<4x16xbf16>, vector<16x16xf32> -> vector<16x16xf32>
    %423 = arith.addf %416, %422 : vector<16x16xf32>
    %c0_477 = arith.constant 0 : index
    %c7_478 = arith.constant 7 : index
    %c0_479 = arith.constant 0 : index
    %c0_480 = arith.constant 0 : index
    %424 = vector.load %arg1[%c0_477, %c7_478, %c0_479, %c0_480] : memref<1x18x18x4xf32, #tpu.memory_space<vmem>>, vector<1x1x16x4xf32>
    %425 = vector.shape_cast %424 : vector<1x1x16x4xf32> to vector<16x4xf32>
    %426 = arith.truncf %425 : vector<16x4xf32> to vector<16x4xbf16>
    %c3_481 = arith.constant 3 : index
    %c0_482 = arith.constant 0 : index
    %c0_483 = arith.constant 0 : index
    %427 = vector.load %arg2[%c3_481, %c0_482, %c0_483] : memref<9x4x16xbf16, #tpu.memory_space<vmem>>, vector<1x4x16xbf16>
    %428 = vector.shape_cast %427 : vector<1x4x16xbf16> to vector<4x16xbf16>
    %cst_484 = arith.constant dense<0.000000e+00> : vector<16x16xf32>
    %429 = tpu.matmul %426, %428, %cst_484 {dimension_numbers = #tpu.dot_dimension_numbers<[1], [0], [0], [1], [0, 0, 1, 1], [], []>} : vector<16x4xbf16>, vector<4x16xbf16>, vector<16x16xf32> -> vector<16x16xf32>
    %430 = arith.addf %423, %429 : vector<16x16xf32>
    %c0_485 = arith.constant 0 : index
    %c7_486 = arith.constant 7 : index
    %c1_487 = arith.constant 1 : index
    %c0_488 = arith.constant 0 : index
    %431 = vector.load %arg1[%c0_485, %c7_486, %c1_487, %c0_488] : memref<1x18x18x4xf32, #tpu.memory_space<vmem>>, vector<1x1x16x4xf32>
    %432 = vector.shape_cast %431 : vector<1x1x16x4xf32> to vector<16x4xf32>
    %433 = arith.truncf %432 : vector<16x4xf32> to vector<16x4xbf16>
    %c4_489 = arith.constant 4 : index
    %c0_490 = arith.constant 0 : index
    %c0_491 = arith.constant 0 : index
    %434 = vector.load %arg2[%c4_489, %c0_490, %c0_491] : memref<9x4x16xbf16, #tpu.memory_space<vmem>>, vector<1x4x16xbf16>
    %435 = vector.shape_cast %434 : vector<1x4x16xbf16> to vector<4x16xbf16>
    %cst_492 = arith.constant dense<0.000000e+00> : vector<16x16xf32>
    %436 = tpu.matmul %433, %435, %cst_492 {dimension_numbers = #tpu.dot_dimension_numbers<[1], [0], [0], [1], [0, 0, 1, 1], [], []>} : vector<16x4xbf16>, vector<4x16xbf16>, vector<16x16xf32> -> vector<16x16xf32>
    %437 = arith.addf %430, %436 : vector<16x16xf32>
    %c0_493 = arith.constant 0 : index
    %c7_494 = arith.constant 7 : index
    %c2_495 = arith.constant 2 : index
    %c0_496 = arith.constant 0 : index
    %438 = vector.load %arg1[%c0_493, %c7_494, %c2_495, %c0_496] : memref<1x18x18x4xf32, #tpu.memory_space<vmem>>, vector<1x1x16x4xf32>
    %439 = vector.shape_cast %438 : vector<1x1x16x4xf32> to vector<16x4xf32>
    %440 = arith.truncf %439 : vector<16x4xf32> to vector<16x4xbf16>
    %c5_497 = arith.constant 5 : index
    %c0_498 = arith.constant 0 : index
    %c0_499 = arith.constant 0 : index
    %441 = vector.load %arg2[%c5_497, %c0_498, %c0_499] : memref<9x4x16xbf16, #tpu.memory_space<vmem>>, vector<1x4x16xbf16>
    %442 = vector.shape_cast %441 : vector<1x4x16xbf16> to vector<4x16xbf16>
    %cst_500 = arith.constant dense<0.000000e+00> : vector<16x16xf32>
    %443 = tpu.matmul %440, %442, %cst_500 {dimension_numbers = #tpu.dot_dimension_numbers<[1], [0], [0], [1], [0, 0, 1, 1], [], []>} : vector<16x4xbf16>, vector<4x16xbf16>, vector<16x16xf32> -> vector<16x16xf32>
    %444 = arith.addf %437, %443 : vector<16x16xf32>
    %c0_501 = arith.constant 0 : index
    %c8_502 = arith.constant 8 : index
    %c0_503 = arith.constant 0 : index
    %c0_504 = arith.constant 0 : index
    %445 = vector.load %arg1[%c0_501, %c8_502, %c0_503, %c0_504] : memref<1x18x18x4xf32, #tpu.memory_space<vmem>>, vector<1x1x16x4xf32>
    %446 = vector.shape_cast %445 : vector<1x1x16x4xf32> to vector<16x4xf32>
    %447 = arith.truncf %446 : vector<16x4xf32> to vector<16x4xbf16>
    %c6_505 = arith.constant 6 : index
    %c0_506 = arith.constant 0 : index
    %c0_507 = arith.constant 0 : index
    %448 = vector.load %arg2[%c6_505, %c0_506, %c0_507] : memref<9x4x16xbf16, #tpu.memory_space<vmem>>, vector<1x4x16xbf16>
    %449 = vector.shape_cast %448 : vector<1x4x16xbf16> to vector<4x16xbf16>
    %cst_508 = arith.constant dense<0.000000e+00> : vector<16x16xf32>
    %450 = tpu.matmul %447, %449, %cst_508 {dimension_numbers = #tpu.dot_dimension_numbers<[1], [0], [0], [1], [0, 0, 1, 1], [], []>} : vector<16x4xbf16>, vector<4x16xbf16>, vector<16x16xf32> -> vector<16x16xf32>
    %451 = arith.addf %444, %450 : vector<16x16xf32>
    %c0_509 = arith.constant 0 : index
    %c8_510 = arith.constant 8 : index
    %c1_511 = arith.constant 1 : index
    %c0_512 = arith.constant 0 : index
    %452 = vector.load %arg1[%c0_509, %c8_510, %c1_511, %c0_512] : memref<1x18x18x4xf32, #tpu.memory_space<vmem>>, vector<1x1x16x4xf32>
    %453 = vector.shape_cast %452 : vector<1x1x16x4xf32> to vector<16x4xf32>
    %454 = arith.truncf %453 : vector<16x4xf32> to vector<16x4xbf16>
    %c7_513 = arith.constant 7 : index
    %c0_514 = arith.constant 0 : index
    %c0_515 = arith.constant 0 : index
    %455 = vector.load %arg2[%c7_513, %c0_514, %c0_515] : memref<9x4x16xbf16, #tpu.memory_space<vmem>>, vector<1x4x16xbf16>
    %456 = vector.shape_cast %455 : vector<1x4x16xbf16> to vector<4x16xbf16>
    %cst_516 = arith.constant dense<0.000000e+00> : vector<16x16xf32>
    %457 = tpu.matmul %454, %456, %cst_516 {dimension_numbers = #tpu.dot_dimension_numbers<[1], [0], [0], [1], [0, 0, 1, 1], [], []>} : vector<16x4xbf16>, vector<4x16xbf16>, vector<16x16xf32> -> vector<16x16xf32>
    %458 = arith.addf %451, %457 : vector<16x16xf32>
    %c0_517 = arith.constant 0 : index
    %c8_518 = arith.constant 8 : index
    %c2_519 = arith.constant 2 : index
    %c0_520 = arith.constant 0 : index
    %459 = vector.load %arg1[%c0_517, %c8_518, %c2_519, %c0_520] : memref<1x18x18x4xf32, #tpu.memory_space<vmem>>, vector<1x1x16x4xf32>
    %460 = vector.shape_cast %459 : vector<1x1x16x4xf32> to vector<16x4xf32>
    %461 = arith.truncf %460 : vector<16x4xf32> to vector<16x4xbf16>
    %c8_521 = arith.constant 8 : index
    %c0_522 = arith.constant 0 : index
    %c0_523 = arith.constant 0 : index
    %462 = vector.load %arg2[%c8_521, %c0_522, %c0_523] : memref<9x4x16xbf16, #tpu.memory_space<vmem>>, vector<1x4x16xbf16>
    %463 = vector.shape_cast %462 : vector<1x4x16xbf16> to vector<4x16xbf16>
    %cst_524 = arith.constant dense<0.000000e+00> : vector<16x16xf32>
    %464 = tpu.matmul %461, %463, %cst_524 {dimension_numbers = #tpu.dot_dimension_numbers<[1], [0], [0], [1], [0, 0, 1, 1], [], []>} : vector<16x4xbf16>, vector<4x16xbf16>, vector<16x16xf32> -> vector<16x16xf32>
    %465 = arith.addf %458, %464 : vector<16x16xf32>
    %c0_525 = arith.constant 0 : index
    %c6_526 = arith.constant 6 : index
    %c0_527 = arith.constant 0 : index
    %c0_528 = arith.constant 0 : index
    %466 = vector.load %arg3[%c0_525, %c6_526, %c0_527, %c0_528] : memref<1x16x16x16xf32, #tpu.memory_space<vmem>>, vector<1x1x16x16xf32>
    %467 = vector.shape_cast %466 : vector<1x1x16x16xf32> to vector<16x16xf32>
    %468 = vector.shape_cast %465 : vector<16x16xf32> to vector<1x1x16x16xf32>
    tpu.vector_store %arg3[%c0_525, %c6_526, %c0_527, %c0_528], %468 {strides = array<i32>} : memref<1x16x16x16xf32, #tpu.memory_space<vmem>>, vector<1x1x16x16xf32>,
    %cst_529 = arith.constant 0.000000e+00 : f32
    %469 = vector.broadcast %cst_529 : f32 to vector<16x16xf32>
    %c0_530 = arith.constant 0 : index
    %c7_531 = arith.constant 7 : index
    %c0_532 = arith.constant 0 : index
    %c0_533 = arith.constant 0 : index
    %470 = vector.load %arg1[%c0_530, %c7_531, %c0_532, %c0_533] : memref<1x18x18x4xf32, #tpu.memory_space<vmem>>, vector<1x1x16x4xf32>
    %471 = vector.shape_cast %470 : vector<1x1x16x4xf32> to vector<16x4xf32>
    %472 = arith.truncf %471 : vector<16x4xf32> to vector<16x4xbf16>
    %c0_534 = arith.constant 0 : index
    %c0_535 = arith.constant 0 : index
    %c0_536 = arith.constant 0 : index
    %473 = vector.load %arg2[%c0_534, %c0_535, %c0_536] : memref<9x4x16xbf16, #tpu.memory_space<vmem>>, vector<1x4x16xbf16>
    %474 = vector.shape_cast %473 : vector<1x4x16xbf16> to vector<4x16xbf16>
    %cst_537 = arith.constant dense<0.000000e+00> : vector<16x16xf32>
    %475 = tpu.matmul %472, %474, %cst_537 {dimension_numbers = #tpu.dot_dimension_numbers<[1], [0], [0], [1], [0, 0, 1, 1], [], []>} : vector<16x4xbf16>, vector<4x16xbf16>, vector<16x16xf32> -> vector<16x16xf32>
    %476 = arith.addf %469, %475 : vector<16x16xf32>
    %c0_538 = arith.constant 0 : index
    %c7_539 = arith.constant 7 : index
    %c1_540 = arith.constant 1 : index
    %c0_541 = arith.constant 0 : index
    %477 = vector.load %arg1[%c0_538, %c7_539, %c1_540, %c0_541] : memref<1x18x18x4xf32, #tpu.memory_space<vmem>>, vector<1x1x16x4xf32>
    %478 = vector.shape_cast %477 : vector<1x1x16x4xf32> to vector<16x4xf32>
    %479 = arith.truncf %478 : vector<16x4xf32> to vector<16x4xbf16>
    %c1_542 = arith.constant 1 : index
    %c0_543 = arith.constant 0 : index
    %c0_544 = arith.constant 0 : index
    %480 = vector.load %arg2[%c1_542, %c0_543, %c0_544] : memref<9x4x16xbf16, #tpu.memory_space<vmem>>, vector<1x4x16xbf16>
    %481 = vector.shape_cast %480 : vector<1x4x16xbf16> to vector<4x16xbf16>
    %cst_545 = arith.constant dense<0.000000e+00> : vector<16x16xf32>
    %482 = tpu.matmul %479, %481, %cst_545 {dimension_numbers = #tpu.dot_dimension_numbers<[1], [0], [0], [1], [0, 0, 1, 1], [], []>} : vector<16x4xbf16>, vector<4x16xbf16>, vector<16x16xf32> -> vector<16x16xf32>
    %483 = arith.addf %476, %482 : vector<16x16xf32>
    %c0_546 = arith.constant 0 : index
    %c7_547 = arith.constant 7 : index
    %c2_548 = arith.constant 2 : index
    %c0_549 = arith.constant 0 : index
    %484 = vector.load %arg1[%c0_546, %c7_547, %c2_548, %c0_549] : memref<1x18x18x4xf32, #tpu.memory_space<vmem>>, vector<1x1x16x4xf32>
    %485 = vector.shape_cast %484 : vector<1x1x16x4xf32> to vector<16x4xf32>
    %486 = arith.truncf %485 : vector<16x4xf32> to vector<16x4xbf16>
    %c2_550 = arith.constant 2 : index
    %c0_551 = arith.constant 0 : index
    %c0_552 = arith.constant 0 : index
    %487 = vector.load %arg2[%c2_550, %c0_551, %c0_552] : memref<9x4x16xbf16, #tpu.memory_space<vmem>>, vector<1x4x16xbf16>
    %488 = vector.shape_cast %487 : vector<1x4x16xbf16> to vector<4x16xbf16>
    %cst_553 = arith.constant dense<0.000000e+00> : vector<16x16xf32>
    %489 = tpu.matmul %486, %488, %cst_553 {dimension_numbers = #tpu.dot_dimension_numbers<[1], [0], [0], [1], [0, 0, 1, 1], [], []>} : vector<16x4xbf16>, vector<4x16xbf16>, vector<16x16xf32> -> vector<16x16xf32>
    %490 = arith.addf %483, %489 : vector<16x16xf32>
    %c0_554 = arith.constant 0 : index
    %c8_555 = arith.constant 8 : index
    %c0_556 = arith.constant 0 : index
    %c0_557 = arith.constant 0 : index
    %491 = vector.load %arg1[%c0_554, %c8_555, %c0_556, %c0_557] : memref<1x18x18x4xf32, #tpu.memory_space<vmem>>, vector<1x1x16x4xf32>
    %492 = vector.shape_cast %491 : vector<1x1x16x4xf32> to vector<16x4xf32>
    %493 = arith.truncf %492 : vector<16x4xf32> to vector<16x4xbf16>
    %c3_558 = arith.constant 3 : index
    %c0_559 = arith.constant 0 : index
    %c0_560 = arith.constant 0 : index
    %494 = vector.load %arg2[%c3_558, %c0_559, %c0_560] : memref<9x4x16xbf16, #tpu.memory_space<vmem>>, vector<1x4x16xbf16>
    %495 = vector.shape_cast %494 : vector<1x4x16xbf16> to vector<4x16xbf16>
    %cst_561 = arith.constant dense<0.000000e+00> : vector<16x16xf32>
    %496 = tpu.matmul %493, %495, %cst_561 {dimension_numbers = #tpu.dot_dimension_numbers<[1], [0], [0], [1], [0, 0, 1, 1], [], []>} : vector<16x4xbf16>, vector<4x16xbf16>, vector<16x16xf32> -> vector<16x16xf32>
    %497 = arith.addf %490, %496 : vector<16x16xf32>
    %c0_562 = arith.constant 0 : index
    %c8_563 = arith.constant 8 : index
    %c1_564 = arith.constant 1 : index
    %c0_565 = arith.constant 0 : index
    %498 = vector.load %arg1[%c0_562, %c8_563, %c1_564, %c0_565] : memref<1x18x18x4xf32, #tpu.memory_space<vmem>>, vector<1x1x16x4xf32>
    %499 = vector.shape_cast %498 : vector<1x1x16x4xf32> to vector<16x4xf32>
    %500 = arith.truncf %499 : vector<16x4xf32> to vector<16x4xbf16>
    %c4_566 = arith.constant 4 : index
    %c0_567 = arith.constant 0 : index
    %c0_568 = arith.constant 0 : index
    %501 = vector.load %arg2[%c4_566, %c0_567, %c0_568] : memref<9x4x16xbf16, #tpu.memory_space<vmem>>, vector<1x4x16xbf16>
    %502 = vector.shape_cast %501 : vector<1x4x16xbf16> to vector<4x16xbf16>
    %cst_569 = arith.constant dense<0.000000e+00> : vector<16x16xf32>
    %503 = tpu.matmul %500, %502, %cst_569 {dimension_numbers = #tpu.dot_dimension_numbers<[1], [0], [0], [1], [0, 0, 1, 1], [], []>} : vector<16x4xbf16>, vector<4x16xbf16>, vector<16x16xf32> -> vector<16x16xf32>
    %504 = arith.addf %497, %503 : vector<16x16xf32>
    %c0_570 = arith.constant 0 : index
    %c8_571 = arith.constant 8 : index
    %c2_572 = arith.constant 2 : index
    %c0_573 = arith.constant 0 : index
    %505 = vector.load %arg1[%c0_570, %c8_571, %c2_572, %c0_573] : memref<1x18x18x4xf32, #tpu.memory_space<vmem>>, vector<1x1x16x4xf32>
    %506 = vector.shape_cast %505 : vector<1x1x16x4xf32> to vector<16x4xf32>
    %507 = arith.truncf %506 : vector<16x4xf32> to vector<16x4xbf16>
    %c5_574 = arith.constant 5 : index
    %c0_575 = arith.constant 0 : index
    %c0_576 = arith.constant 0 : index
    %508 = vector.load %arg2[%c5_574, %c0_575, %c0_576] : memref<9x4x16xbf16, #tpu.memory_space<vmem>>, vector<1x4x16xbf16>
    %509 = vector.shape_cast %508 : vector<1x4x16xbf16> to vector<4x16xbf16>
    %cst_577 = arith.constant dense<0.000000e+00> : vector<16x16xf32>
    %510 = tpu.matmul %507, %509, %cst_577 {dimension_numbers = #tpu.dot_dimension_numbers<[1], [0], [0], [1], [0, 0, 1, 1], [], []>} : vector<16x4xbf16>, vector<4x16xbf16>, vector<16x16xf32> -> vector<16x16xf32>
    %511 = arith.addf %504, %510 : vector<16x16xf32>
    %c0_578 = arith.constant 0 : index
    %c9 = arith.constant 9 : index
    %c0_579 = arith.constant 0 : index
    %c0_580 = arith.constant 0 : index
    %512 = vector.load %arg1[%c0_578, %c9, %c0_579, %c0_580] : memref<1x18x18x4xf32, #tpu.memory_space<vmem>>, vector<1x1x16x4xf32>
    %513 = vector.shape_cast %512 : vector<1x1x16x4xf32> to vector<16x4xf32>
    %514 = arith.truncf %513 : vector<16x4xf32> to vector<16x4xbf16>
    %c6_581 = arith.constant 6 : index
    %c0_582 = arith.constant 0 : index
    %c0_583 = arith.constant 0 : index
    %515 = vector.load %arg2[%c6_581, %c0_582, %c0_583] : memref<9x4x16xbf16, #tpu.memory_space<vmem>>, vector<1x4x16xbf16>
    %516 = vector.shape_cast %515 : vector<1x4x16xbf16> to vector<4x16xbf16>
    %cst_584 = arith.constant dense<0.000000e+00> : vector<16x16xf32>
    %517 = tpu.matmul %514, %516, %cst_584 {dimension_numbers = #tpu.dot_dimension_numbers<[1], [0], [0], [1], [0, 0, 1, 1], [], []>} : vector<16x4xbf16>, vector<4x16xbf16>, vector<16x16xf32> -> vector<16x16xf32>
    %518 = arith.addf %511, %517 : vector<16x16xf32>
    %c0_585 = arith.constant 0 : index
    %c9_586 = arith.constant 9 : index
    %c1_587 = arith.constant 1 : index
    %c0_588 = arith.constant 0 : index
    %519 = vector.load %arg1[%c0_585, %c9_586, %c1_587, %c0_588] : memref<1x18x18x4xf32, #tpu.memory_space<vmem>>, vector<1x1x16x4xf32>
    %520 = vector.shape_cast %519 : vector<1x1x16x4xf32> to vector<16x4xf32>
    %521 = arith.truncf %520 : vector<16x4xf32> to vector<16x4xbf16>
    %c7_589 = arith.constant 7 : index
    %c0_590 = arith.constant 0 : index
    %c0_591 = arith.constant 0 : index
    %522 = vector.load %arg2[%c7_589, %c0_590, %c0_591] : memref<9x4x16xbf16, #tpu.memory_space<vmem>>, vector<1x4x16xbf16>
    %523 = vector.shape_cast %522 : vector<1x4x16xbf16> to vector<4x16xbf16>
    %cst_592 = arith.constant dense<0.000000e+00> : vector<16x16xf32>
    %524 = tpu.matmul %521, %523, %cst_592 {dimension_numbers = #tpu.dot_dimension_numbers<[1], [0], [0], [1], [0, 0, 1, 1], [], []>} : vector<16x4xbf16>, vector<4x16xbf16>, vector<16x16xf32> -> vector<16x16xf32>
    %525 = arith.addf %518, %524 : vector<16x16xf32>
    %c0_593 = arith.constant 0 : index
    %c9_594 = arith.constant 9 : index
    %c2_595 = arith.constant 2 : index
    %c0_596 = arith.constant 0 : index
    %526 = vector.load %arg1[%c0_593, %c9_594, %c2_595, %c0_596] : memref<1x18x18x4xf32, #tpu.memory_space<vmem>>, vector<1x1x16x4xf32>
    %527 = vector.shape_cast %526 : vector<1x1x16x4xf32> to vector<16x4xf32>
    %528 = arith.truncf %527 : vector<16x4xf32> to vector<16x4xbf16>
    %c8_597 = arith.constant 8 : index
    %c0_598 = arith.constant 0 : index
    %c0_599 = arith.constant 0 : index
    %529 = vector.load %arg2[%c8_597, %c0_598, %c0_599] : memref<9x4x16xbf16, #tpu.memory_space<vmem>>, vector<1x4x16xbf16>
    %530 = vector.shape_cast %529 : vector<1x4x16xbf16> to vector<4x16xbf16>
    %cst_600 = arith.constant dense<0.000000e+00> : vector<16x16xf32>
    %531 = tpu.matmul %528, %530, %cst_600 {dimension_numbers = #tpu.dot_dimension_numbers<[1], [0], [0], [1], [0, 0, 1, 1], [], []>} : vector<16x4xbf16>, vector<4x16xbf16>, vector<16x16xf32> -> vector<16x16xf32>
    %532 = arith.addf %525, %531 : vector<16x16xf32>
    %c0_601 = arith.constant 0 : index
    %c7_602 = arith.constant 7 : index
    %c0_603 = arith.constant 0 : index
    %c0_604 = arith.constant 0 : index
    %533 = vector.load %arg3[%c0_601, %c7_602, %c0_603, %c0_604] : memref<1x16x16x16xf32, #tpu.memory_space<vmem>>, vector<1x1x16x16xf32>
    %534 = vector.shape_cast %533 : vector<1x1x16x16xf32> to vector<16x16xf32>
    %535 = vector.shape_cast %532 : vector<16x16xf32> to vector<1x1x16x16xf32>
    tpu.vector_store %arg3[%c0_601, %c7_602, %c0_603, %c0_604], %535 {strides = array<i32>} : memref<1x16x16x16xf32, #tpu.memory_space<vmem>>, vector<1x1x16x16xf32>,
    %cst_605 = arith.constant 0.000000e+00 : f32
    %536 = vector.broadcast %cst_605 : f32 to vector<16x16xf32>
    %c0_606 = arith.constant 0 : index
    %c8_607 = arith.constant 8 : index
    %c0_608 = arith.constant 0 : index
    %c0_609 = arith.constant 0 : index
    %537 = vector.load %arg1[%c0_606, %c8_607, %c0_608, %c0_609] : memref<1x18x18x4xf32, #tpu.memory_space<vmem>>, vector<1x1x16x4xf32>
    %538 = vector.shape_cast %537 : vector<1x1x16x4xf32> to vector<16x4xf32>
    %539 = arith.truncf %538 : vector<16x4xf32> to vector<16x4xbf16>
    %c0_610 = arith.constant 0 : index
    %c0_611 = arith.constant 0 : index
    %c0_612 = arith.constant 0 : index
    %540 = vector.load %arg2[%c0_610, %c0_611, %c0_612] : memref<9x4x16xbf16, #tpu.memory_space<vmem>>, vector<1x4x16xbf16>
    %541 = vector.shape_cast %540 : vector<1x4x16xbf16> to vector<4x16xbf16>
    %cst_613 = arith.constant dense<0.000000e+00> : vector<16x16xf32>
    %542 = tpu.matmul %539, %541, %cst_613 {dimension_numbers = #tpu.dot_dimension_numbers<[1], [0], [0], [1], [0, 0, 1, 1], [], []>} : vector<16x4xbf16>, vector<4x16xbf16>, vector<16x16xf32> -> vector<16x16xf32>
    %543 = arith.addf %536, %542 : vector<16x16xf32>
    %c0_614 = arith.constant 0 : index
    %c8_615 = arith.constant 8 : index
    %c1_616 = arith.constant 1 : index
    %c0_617 = arith.constant 0 : index
    %544 = vector.load %arg1[%c0_614, %c8_615, %c1_616, %c0_617] : memref<1x18x18x4xf32, #tpu.memory_space<vmem>>, vector<1x1x16x4xf32>
    %545 = vector.shape_cast %544 : vector<1x1x16x4xf32> to vector<16x4xf32>
    %546 = arith.truncf %545 : vector<16x4xf32> to vector<16x4xbf16>
    %c1_618 = arith.constant 1 : index
    %c0_619 = arith.constant 0 : index
    %c0_620 = arith.constant 0 : index
    %547 = vector.load %arg2[%c1_618, %c0_619, %c0_620] : memref<9x4x16xbf16, #tpu.memory_space<vmem>>, vector<1x4x16xbf16>
    %548 = vector.shape_cast %547 : vector<1x4x16xbf16> to vector<4x16xbf16>
    %cst_621 = arith.constant dense<0.000000e+00> : vector<16x16xf32>
    %549 = tpu.matmul %546, %548, %cst_621 {dimension_numbers = #tpu.dot_dimension_numbers<[1], [0], [0], [1], [0, 0, 1, 1], [], []>} : vector<16x4xbf16>, vector<4x16xbf16>, vector<16x16xf32> -> vector<16x16xf32>
    %550 = arith.addf %543, %549 : vector<16x16xf32>
    %c0_622 = arith.constant 0 : index
    %c8_623 = arith.constant 8 : index
    %c2_624 = arith.constant 2 : index
    %c0_625 = arith.constant 0 : index
    %551 = vector.load %arg1[%c0_622, %c8_623, %c2_624, %c0_625] : memref<1x18x18x4xf32, #tpu.memory_space<vmem>>, vector<1x1x16x4xf32>
    %552 = vector.shape_cast %551 : vector<1x1x16x4xf32> to vector<16x4xf32>
    %553 = arith.truncf %552 : vector<16x4xf32> to vector<16x4xbf16>
    %c2_626 = arith.constant 2 : index
    %c0_627 = arith.constant 0 : index
    %c0_628 = arith.constant 0 : index
    %554 = vector.load %arg2[%c2_626, %c0_627, %c0_628] : memref<9x4x16xbf16, #tpu.memory_space<vmem>>, vector<1x4x16xbf16>
    %555 = vector.shape_cast %554 : vector<1x4x16xbf16> to vector<4x16xbf16>
    %cst_629 = arith.constant dense<0.000000e+00> : vector<16x16xf32>
    %556 = tpu.matmul %553, %555, %cst_629 {dimension_numbers = #tpu.dot_dimension_numbers<[1], [0], [0], [1], [0, 0, 1, 1], [], []>} : vector<16x4xbf16>, vector<4x16xbf16>, vector<16x16xf32> -> vector<16x16xf32>
    %557 = arith.addf %550, %556 : vector<16x16xf32>
    %c0_630 = arith.constant 0 : index
    %c9_631 = arith.constant 9 : index
    %c0_632 = arith.constant 0 : index
    %c0_633 = arith.constant 0 : index
    %558 = vector.load %arg1[%c0_630, %c9_631, %c0_632, %c0_633] : memref<1x18x18x4xf32, #tpu.memory_space<vmem>>, vector<1x1x16x4xf32>
    %559 = vector.shape_cast %558 : vector<1x1x16x4xf32> to vector<16x4xf32>
    %560 = arith.truncf %559 : vector<16x4xf32> to vector<16x4xbf16>
    %c3_634 = arith.constant 3 : index
    %c0_635 = arith.constant 0 : index
    %c0_636 = arith.constant 0 : index
    %561 = vector.load %arg2[%c3_634, %c0_635, %c0_636] : memref<9x4x16xbf16, #tpu.memory_space<vmem>>, vector<1x4x16xbf16>
    %562 = vector.shape_cast %561 : vector<1x4x16xbf16> to vector<4x16xbf16>
    %cst_637 = arith.constant dense<0.000000e+00> : vector<16x16xf32>
    %563 = tpu.matmul %560, %562, %cst_637 {dimension_numbers = #tpu.dot_dimension_numbers<[1], [0], [0], [1], [0, 0, 1, 1], [], []>} : vector<16x4xbf16>, vector<4x16xbf16>, vector<16x16xf32> -> vector<16x16xf32>
    %564 = arith.addf %557, %563 : vector<16x16xf32>
    %c0_638 = arith.constant 0 : index
    %c9_639 = arith.constant 9 : index
    %c1_640 = arith.constant 1 : index
    %c0_641 = arith.constant 0 : index
    %565 = vector.load %arg1[%c0_638, %c9_639, %c1_640, %c0_641] : memref<1x18x18x4xf32, #tpu.memory_space<vmem>>, vector<1x1x16x4xf32>
    %566 = vector.shape_cast %565 : vector<1x1x16x4xf32> to vector<16x4xf32>
    %567 = arith.truncf %566 : vector<16x4xf32> to vector<16x4xbf16>
    %c4_642 = arith.constant 4 : index
    %c0_643 = arith.constant 0 : index
    %c0_644 = arith.constant 0 : index
    %568 = vector.load %arg2[%c4_642, %c0_643, %c0_644] : memref<9x4x16xbf16, #tpu.memory_space<vmem>>, vector<1x4x16xbf16>
    %569 = vector.shape_cast %568 : vector<1x4x16xbf16> to vector<4x16xbf16>
    %cst_645 = arith.constant dense<0.000000e+00> : vector<16x16xf32>
    %570 = tpu.matmul %567, %569, %cst_645 {dimension_numbers = #tpu.dot_dimension_numbers<[1], [0], [0], [1], [0, 0, 1, 1], [], []>} : vector<16x4xbf16>, vector<4x16xbf16>, vector<16x16xf32> -> vector<16x16xf32>
    %571 = arith.addf %564, %570 : vector<16x16xf32>
    %c0_646 = arith.constant 0 : index
    %c9_647 = arith.constant 9 : index
    %c2_648 = arith.constant 2 : index
    %c0_649 = arith.constant 0 : index
    %572 = vector.load %arg1[%c0_646, %c9_647, %c2_648, %c0_649] : memref<1x18x18x4xf32, #tpu.memory_space<vmem>>, vector<1x1x16x4xf32>
    %573 = vector.shape_cast %572 : vector<1x1x16x4xf32> to vector<16x4xf32>
    %574 = arith.truncf %573 : vector<16x4xf32> to vector<16x4xbf16>
    %c5_650 = arith.constant 5 : index
    %c0_651 = arith.constant 0 : index
    %c0_652 = arith.constant 0 : index
    %575 = vector.load %arg2[%c5_650, %c0_651, %c0_652] : memref<9x4x16xbf16, #tpu.memory_space<vmem>>, vector<1x4x16xbf16>
    %576 = vector.shape_cast %575 : vector<1x4x16xbf16> to vector<4x16xbf16>
    %cst_653 = arith.constant dense<0.000000e+00> : vector<16x16xf32>
    %577 = tpu.matmul %574, %576, %cst_653 {dimension_numbers = #tpu.dot_dimension_numbers<[1], [0], [0], [1], [0, 0, 1, 1], [], []>} : vector<16x4xbf16>, vector<4x16xbf16>, vector<16x16xf32> -> vector<16x16xf32>
    %578 = arith.addf %571, %577 : vector<16x16xf32>
    %c0_654 = arith.constant 0 : index
    %c10 = arith.constant 10 : index
    %c0_655 = arith.constant 0 : index
    %c0_656 = arith.constant 0 : index
    %579 = vector.load %arg1[%c0_654, %c10, %c0_655, %c0_656] : memref<1x18x18x4xf32, #tpu.memory_space<vmem>>, vector<1x1x16x4xf32>
    %580 = vector.shape_cast %579 : vector<1x1x16x4xf32> to vector<16x4xf32>
    %581 = arith.truncf %580 : vector<16x4xf32> to vector<16x4xbf16>
    %c6_657 = arith.constant 6 : index
    %c0_658 = arith.constant 0 : index
    %c0_659 = arith.constant 0 : index
    %582 = vector.load %arg2[%c6_657, %c0_658, %c0_659] : memref<9x4x16xbf16, #tpu.memory_space<vmem>>, vector<1x4x16xbf16>
    %583 = vector.shape_cast %582 : vector<1x4x16xbf16> to vector<4x16xbf16>
    %cst_660 = arith.constant dense<0.000000e+00> : vector<16x16xf32>
    %584 = tpu.matmul %581, %583, %cst_660 {dimension_numbers = #tpu.dot_dimension_numbers<[1], [0], [0], [1], [0, 0, 1, 1], [], []>} : vector<16x4xbf16>, vector<4x16xbf16>, vector<16x16xf32> -> vector<16x16xf32>
    %585 = arith.addf %578, %584 : vector<16x16xf32>
    %c0_661 = arith.constant 0 : index
    %c10_662 = arith.constant 10 : index
    %c1_663 = arith.constant 1 : index
    %c0_664 = arith.constant 0 : index
    %586 = vector.load %arg1[%c0_661, %c10_662, %c1_663, %c0_664] : memref<1x18x18x4xf32, #tpu.memory_space<vmem>>, vector<1x1x16x4xf32>
    %587 = vector.shape_cast %586 : vector<1x1x16x4xf32> to vector<16x4xf32>
    %588 = arith.truncf %587 : vector<16x4xf32> to vector<16x4xbf16>
    %c7_665 = arith.constant 7 : index
    %c0_666 = arith.constant 0 : index
    %c0_667 = arith.constant 0 : index
    %589 = vector.load %arg2[%c7_665, %c0_666, %c0_667] : memref<9x4x16xbf16, #tpu.memory_space<vmem>>, vector<1x4x16xbf16>
    %590 = vector.shape_cast %589 : vector<1x4x16xbf16> to vector<4x16xbf16>
    %cst_668 = arith.constant dense<0.000000e+00> : vector<16x16xf32>
    %591 = tpu.matmul %588, %590, %cst_668 {dimension_numbers = #tpu.dot_dimension_numbers<[1], [0], [0], [1], [0, 0, 1, 1], [], []>} : vector<16x4xbf16>, vector<4x16xbf16>, vector<16x16xf32> -> vector<16x16xf32>
    %592 = arith.addf %585, %591 : vector<16x16xf32>
    %c0_669 = arith.constant 0 : index
    %c10_670 = arith.constant 10 : index
    %c2_671 = arith.constant 2 : index
    %c0_672 = arith.constant 0 : index
    %593 = vector.load %arg1[%c0_669, %c10_670, %c2_671, %c0_672] : memref<1x18x18x4xf32, #tpu.memory_space<vmem>>, vector<1x1x16x4xf32>
    %594 = vector.shape_cast %593 : vector<1x1x16x4xf32> to vector<16x4xf32>
    %595 = arith.truncf %594 : vector<16x4xf32> to vector<16x4xbf16>
    %c8_673 = arith.constant 8 : index
    %c0_674 = arith.constant 0 : index
    %c0_675 = arith.constant 0 : index
    %596 = vector.load %arg2[%c8_673, %c0_674, %c0_675] : memref<9x4x16xbf16, #tpu.memory_space<vmem>>, vector<1x4x16xbf16>
    %597 = vector.shape_cast %596 : vector<1x4x16xbf16> to vector<4x16xbf16>
    %cst_676 = arith.constant dense<0.000000e+00> : vector<16x16xf32>
    %598 = tpu.matmul %595, %597, %cst_676 {dimension_numbers = #tpu.dot_dimension_numbers<[1], [0], [0], [1], [0, 0, 1, 1], [], []>} : vector<16x4xbf16>, vector<4x16xbf16>, vector<16x16xf32> -> vector<16x16xf32>
    %599 = arith.addf %592, %598 : vector<16x16xf32>
    %c0_677 = arith.constant 0 : index
    %c8_678 = arith.constant 8 : index
    %c0_679 = arith.constant 0 : index
    %c0_680 = arith.constant 0 : index
    %600 = vector.load %arg3[%c0_677, %c8_678, %c0_679, %c0_680] : memref<1x16x16x16xf32, #tpu.memory_space<vmem>>, vector<1x1x16x16xf32>
    %601 = vector.shape_cast %600 : vector<1x1x16x16xf32> to vector<16x16xf32>
    %602 = vector.shape_cast %599 : vector<16x16xf32> to vector<1x1x16x16xf32>
    tpu.vector_store %arg3[%c0_677, %c8_678, %c0_679, %c0_680], %602 {strides = array<i32>} : memref<1x16x16x16xf32, #tpu.memory_space<vmem>>, vector<1x1x16x16xf32>,
    %cst_681 = arith.constant 0.000000e+00 : f32
    %603 = vector.broadcast %cst_681 : f32 to vector<16x16xf32>
    %c0_682 = arith.constant 0 : index
    %c9_683 = arith.constant 9 : index
    %c0_684 = arith.constant 0 : index
    %c0_685 = arith.constant 0 : index
    %604 = vector.load %arg1[%c0_682, %c9_683, %c0_684, %c0_685] : memref<1x18x18x4xf32, #tpu.memory_space<vmem>>, vector<1x1x16x4xf32>
    %605 = vector.shape_cast %604 : vector<1x1x16x4xf32> to vector<16x4xf32>
    %606 = arith.truncf %605 : vector<16x4xf32> to vector<16x4xbf16>
    %c0_686 = arith.constant 0 : index
    %c0_687 = arith.constant 0 : index
    %c0_688 = arith.constant 0 : index
    %607 = vector.load %arg2[%c0_686, %c0_687, %c0_688] : memref<9x4x16xbf16, #tpu.memory_space<vmem>>, vector<1x4x16xbf16>
    %608 = vector.shape_cast %607 : vector<1x4x16xbf16> to vector<4x16xbf16>
    %cst_689 = arith.constant dense<0.000000e+00> : vector<16x16xf32>
    %609 = tpu.matmul %606, %608, %cst_689 {dimension_numbers = #tpu.dot_dimension_numbers<[1], [0], [0], [1], [0, 0, 1, 1], [], []>} : vector<16x4xbf16>, vector<4x16xbf16>, vector<16x16xf32> -> vector<16x16xf32>
    %610 = arith.addf %603, %609 : vector<16x16xf32>
    %c0_690 = arith.constant 0 : index
    %c9_691 = arith.constant 9 : index
    %c1_692 = arith.constant 1 : index
    %c0_693 = arith.constant 0 : index
    %611 = vector.load %arg1[%c0_690, %c9_691, %c1_692, %c0_693] : memref<1x18x18x4xf32, #tpu.memory_space<vmem>>, vector<1x1x16x4xf32>
    %612 = vector.shape_cast %611 : vector<1x1x16x4xf32> to vector<16x4xf32>
    %613 = arith.truncf %612 : vector<16x4xf32> to vector<16x4xbf16>
    %c1_694 = arith.constant 1 : index
    %c0_695 = arith.constant 0 : index
    %c0_696 = arith.constant 0 : index
    %614 = vector.load %arg2[%c1_694, %c0_695, %c0_696] : memref<9x4x16xbf16, #tpu.memory_space<vmem>>, vector<1x4x16xbf16>
    %615 = vector.shape_cast %614 : vector<1x4x16xbf16> to vector<4x16xbf16>
    %cst_697 = arith.constant dense<0.000000e+00> : vector<16x16xf32>
    %616 = tpu.matmul %613, %615, %cst_697 {dimension_numbers = #tpu.dot_dimension_numbers<[1], [0], [0], [1], [0, 0, 1, 1], [], []>} : vector<16x4xbf16>, vector<4x16xbf16>, vector<16x16xf32> -> vector<16x16xf32>
    %617 = arith.addf %610, %616 : vector<16x16xf32>
    %c0_698 = arith.constant 0 : index
    %c9_699 = arith.constant 9 : index
    %c2_700 = arith.constant 2 : index
    %c0_701 = arith.constant 0 : index
    %618 = vector.load %arg1[%c0_698, %c9_699, %c2_700, %c0_701] : memref<1x18x18x4xf32, #tpu.memory_space<vmem>>, vector<1x1x16x4xf32>
    %619 = vector.shape_cast %618 : vector<1x1x16x4xf32> to vector<16x4xf32>
    %620 = arith.truncf %619 : vector<16x4xf32> to vector<16x4xbf16>
    %c2_702 = arith.constant 2 : index
    %c0_703 = arith.constant 0 : index
    %c0_704 = arith.constant 0 : index
    %621 = vector.load %arg2[%c2_702, %c0_703, %c0_704] : memref<9x4x16xbf16, #tpu.memory_space<vmem>>, vector<1x4x16xbf16>
    %622 = vector.shape_cast %621 : vector<1x4x16xbf16> to vector<4x16xbf16>
    %cst_705 = arith.constant dense<0.000000e+00> : vector<16x16xf32>
    %623 = tpu.matmul %620, %622, %cst_705 {dimension_numbers = #tpu.dot_dimension_numbers<[1], [0], [0], [1], [0, 0, 1, 1], [], []>} : vector<16x4xbf16>, vector<4x16xbf16>, vector<16x16xf32> -> vector<16x16xf32>
    %624 = arith.addf %617, %623 : vector<16x16xf32>
    %c0_706 = arith.constant 0 : index
    %c10_707 = arith.constant 10 : index
    %c0_708 = arith.constant 0 : index
    %c0_709 = arith.constant 0 : index
    %625 = vector.load %arg1[%c0_706, %c10_707, %c0_708, %c0_709] : memref<1x18x18x4xf32, #tpu.memory_space<vmem>>, vector<1x1x16x4xf32>
    %626 = vector.shape_cast %625 : vector<1x1x16x4xf32> to vector<16x4xf32>
    %627 = arith.truncf %626 : vector<16x4xf32> to vector<16x4xbf16>
    %c3_710 = arith.constant 3 : index
    %c0_711 = arith.constant 0 : index
    %c0_712 = arith.constant 0 : index
    %628 = vector.load %arg2[%c3_710, %c0_711, %c0_712] : memref<9x4x16xbf16, #tpu.memory_space<vmem>>, vector<1x4x16xbf16>
    %629 = vector.shape_cast %628 : vector<1x4x16xbf16> to vector<4x16xbf16>
    %cst_713 = arith.constant dense<0.000000e+00> : vector<16x16xf32>
    %630 = tpu.matmul %627, %629, %cst_713 {dimension_numbers = #tpu.dot_dimension_numbers<[1], [0], [0], [1], [0, 0, 1, 1], [], []>} : vector<16x4xbf16>, vector<4x16xbf16>, vector<16x16xf32> -> vector<16x16xf32>
    %631 = arith.addf %624, %630 : vector<16x16xf32>
    %c0_714 = arith.constant 0 : index
    %c10_715 = arith.constant 10 : index
    %c1_716 = arith.constant 1 : index
    %c0_717 = arith.constant 0 : index
    %632 = vector.load %arg1[%c0_714, %c10_715, %c1_716, %c0_717] : memref<1x18x18x4xf32, #tpu.memory_space<vmem>>, vector<1x1x16x4xf32>
    %633 = vector.shape_cast %632 : vector<1x1x16x4xf32> to vector<16x4xf32>
    %634 = arith.truncf %633 : vector<16x4xf32> to vector<16x4xbf16>
    %c4_718 = arith.constant 4 : index
    %c0_719 = arith.constant 0 : index
    %c0_720 = arith.constant 0 : index
    %635 = vector.load %arg2[%c4_718, %c0_719, %c0_720] : memref<9x4x16xbf16, #tpu.memory_space<vmem>>, vector<1x4x16xbf16>
    %636 = vector.shape_cast %635 : vector<1x4x16xbf16> to vector<4x16xbf16>
    %cst_721 = arith.constant dense<0.000000e+00> : vector<16x16xf32>
    %637 = tpu.matmul %634, %636, %cst_721 {dimension_numbers = #tpu.dot_dimension_numbers<[1], [0], [0], [1], [0, 0, 1, 1], [], []>} : vector<16x4xbf16>, vector<4x16xbf16>, vector<16x16xf32> -> vector<16x16xf32>
    %638 = arith.addf %631, %637 : vector<16x16xf32>
    %c0_722 = arith.constant 0 : index
    %c10_723 = arith.constant 10 : index
    %c2_724 = arith.constant 2 : index
    %c0_725 = arith.constant 0 : index
    %639 = vector.load %arg1[%c0_722, %c10_723, %c2_724, %c0_725] : memref<1x18x18x4xf32, #tpu.memory_space<vmem>>, vector<1x1x16x4xf32>
    %640 = vector.shape_cast %639 : vector<1x1x16x4xf32> to vector<16x4xf32>
    %641 = arith.truncf %640 : vector<16x4xf32> to vector<16x4xbf16>
    %c5_726 = arith.constant 5 : index
    %c0_727 = arith.constant 0 : index
    %c0_728 = arith.constant 0 : index
    %642 = vector.load %arg2[%c5_726, %c0_727, %c0_728] : memref<9x4x16xbf16, #tpu.memory_space<vmem>>, vector<1x4x16xbf16>
    %643 = vector.shape_cast %642 : vector<1x4x16xbf16> to vector<4x16xbf16>
    %cst_729 = arith.constant dense<0.000000e+00> : vector<16x16xf32>
    %644 = tpu.matmul %641, %643, %cst_729 {dimension_numbers = #tpu.dot_dimension_numbers<[1], [0], [0], [1], [0, 0, 1, 1], [], []>} : vector<16x4xbf16>, vector<4x16xbf16>, vector<16x16xf32> -> vector<16x16xf32>
    %645 = arith.addf %638, %644 : vector<16x16xf32>
    %c0_730 = arith.constant 0 : index
    %c11 = arith.constant 11 : index
    %c0_731 = arith.constant 0 : index
    %c0_732 = arith.constant 0 : index
    %646 = vector.load %arg1[%c0_730, %c11, %c0_731, %c0_732] : memref<1x18x18x4xf32, #tpu.memory_space<vmem>>, vector<1x1x16x4xf32>
    %647 = vector.shape_cast %646 : vector<1x1x16x4xf32> to vector<16x4xf32>
    %648 = arith.truncf %647 : vector<16x4xf32> to vector<16x4xbf16>
    %c6_733 = arith.constant 6 : index
    %c0_734 = arith.constant 0 : index
    %c0_735 = arith.constant 0 : index
    %649 = vector.load %arg2[%c6_733, %c0_734, %c0_735] : memref<9x4x16xbf16, #tpu.memory_space<vmem>>, vector<1x4x16xbf16>
    %650 = vector.shape_cast %649 : vector<1x4x16xbf16> to vector<4x16xbf16>
    %cst_736 = arith.constant dense<0.000000e+00> : vector<16x16xf32>
    %651 = tpu.matmul %648, %650, %cst_736 {dimension_numbers = #tpu.dot_dimension_numbers<[1], [0], [0], [1], [0, 0, 1, 1], [], []>} : vector<16x4xbf16>, vector<4x16xbf16>, vector<16x16xf32> -> vector<16x16xf32>
    %652 = arith.addf %645, %651 : vector<16x16xf32>
    %c0_737 = arith.constant 0 : index
    %c11_738 = arith.constant 11 : index
    %c1_739 = arith.constant 1 : index
    %c0_740 = arith.constant 0 : index
    %653 = vector.load %arg1[%c0_737, %c11_738, %c1_739, %c0_740] : memref<1x18x18x4xf32, #tpu.memory_space<vmem>>, vector<1x1x16x4xf32>
    %654 = vector.shape_cast %653 : vector<1x1x16x4xf32> to vector<16x4xf32>
    %655 = arith.truncf %654 : vector<16x4xf32> to vector<16x4xbf16>
    %c7_741 = arith.constant 7 : index
    %c0_742 = arith.constant 0 : index
    %c0_743 = arith.constant 0 : index
    %656 = vector.load %arg2[%c7_741, %c0_742, %c0_743] : memref<9x4x16xbf16, #tpu.memory_space<vmem>>, vector<1x4x16xbf16>
    %657 = vector.shape_cast %656 : vector<1x4x16xbf16> to vector<4x16xbf16>
    %cst_744 = arith.constant dense<0.000000e+00> : vector<16x16xf32>
    %658 = tpu.matmul %655, %657, %cst_744 {dimension_numbers = #tpu.dot_dimension_numbers<[1], [0], [0], [1], [0, 0, 1, 1], [], []>} : vector<16x4xbf16>, vector<4x16xbf16>, vector<16x16xf32> -> vector<16x16xf32>
    %659 = arith.addf %652, %658 : vector<16x16xf32>
    %c0_745 = arith.constant 0 : index
    %c11_746 = arith.constant 11 : index
    %c2_747 = arith.constant 2 : index
    %c0_748 = arith.constant 0 : index
    %660 = vector.load %arg1[%c0_745, %c11_746, %c2_747, %c0_748] : memref<1x18x18x4xf32, #tpu.memory_space<vmem>>, vector<1x1x16x4xf32>
    %661 = vector.shape_cast %660 : vector<1x1x16x4xf32> to vector<16x4xf32>
    %662 = arith.truncf %661 : vector<16x4xf32> to vector<16x4xbf16>
    %c8_749 = arith.constant 8 : index
    %c0_750 = arith.constant 0 : index
    %c0_751 = arith.constant 0 : index
    %663 = vector.load %arg2[%c8_749, %c0_750, %c0_751] : memref<9x4x16xbf16, #tpu.memory_space<vmem>>, vector<1x4x16xbf16>
    %664 = vector.shape_cast %663 : vector<1x4x16xbf16> to vector<4x16xbf16>
    %cst_752 = arith.constant dense<0.000000e+00> : vector<16x16xf32>
    %665 = tpu.matmul %662, %664, %cst_752 {dimension_numbers = #tpu.dot_dimension_numbers<[1], [0], [0], [1], [0, 0, 1, 1], [], []>} : vector<16x4xbf16>, vector<4x16xbf16>, vector<16x16xf32> -> vector<16x16xf32>
    %666 = arith.addf %659, %665 : vector<16x16xf32>
    %c0_753 = arith.constant 0 : index
    %c9_754 = arith.constant 9 : index
    %c0_755 = arith.constant 0 : index
    %c0_756 = arith.constant 0 : index
    %667 = vector.load %arg3[%c0_753, %c9_754, %c0_755, %c0_756] : memref<1x16x16x16xf32, #tpu.memory_space<vmem>>, vector<1x1x16x16xf32>
    %668 = vector.shape_cast %667 : vector<1x1x16x16xf32> to vector<16x16xf32>
    %669 = vector.shape_cast %666 : vector<16x16xf32> to vector<1x1x16x16xf32>
    tpu.vector_store %arg3[%c0_753, %c9_754, %c0_755, %c0_756], %669 {strides = array<i32>} : memref<1x16x16x16xf32, #tpu.memory_space<vmem>>, vector<1x1x16x16xf32>,
    %cst_757 = arith.constant 0.000000e+00 : f32
    %670 = vector.broadcast %cst_757 : f32 to vector<16x16xf32>
    %c0_758 = arith.constant 0 : index
    %c10_759 = arith.constant 10 : index
    %c0_760 = arith.constant 0 : index
    %c0_761 = arith.constant 0 : index
    %671 = vector.load %arg1[%c0_758, %c10_759, %c0_760, %c0_761] : memref<1x18x18x4xf32, #tpu.memory_space<vmem>>, vector<1x1x16x4xf32>
    %672 = vector.shape_cast %671 : vector<1x1x16x4xf32> to vector<16x4xf32>
    %673 = arith.truncf %672 : vector<16x4xf32> to vector<16x4xbf16>
    %c0_762 = arith.constant 0 : index
    %c0_763 = arith.constant 0 : index
    %c0_764 = arith.constant 0 : index
    %674 = vector.load %arg2[%c0_762, %c0_763, %c0_764] : memref<9x4x16xbf16, #tpu.memory_space<vmem>>, vector<1x4x16xbf16>
    %675 = vector.shape_cast %674 : vector<1x4x16xbf16> to vector<4x16xbf16>
    %cst_765 = arith.constant dense<0.000000e+00> : vector<16x16xf32>
    %676 = tpu.matmul %673, %675, %cst_765 {dimension_numbers = #tpu.dot_dimension_numbers<[1], [0], [0], [1], [0, 0, 1, 1], [], []>} : vector<16x4xbf16>, vector<4x16xbf16>, vector<16x16xf32> -> vector<16x16xf32>
    %677 = arith.addf %670, %676 : vector<16x16xf32>
    %c0_766 = arith.constant 0 : index
    %c10_767 = arith.constant 10 : index
    %c1_768 = arith.constant 1 : index
    %c0_769 = arith.constant 0 : index
    %678 = vector.load %arg1[%c0_766, %c10_767, %c1_768, %c0_769] : memref<1x18x18x4xf32, #tpu.memory_space<vmem>>, vector<1x1x16x4xf32>
    %679 = vector.shape_cast %678 : vector<1x1x16x4xf32> to vector<16x4xf32>
    %680 = arith.truncf %679 : vector<16x4xf32> to vector<16x4xbf16>
    %c1_770 = arith.constant 1 : index
    %c0_771 = arith.constant 0 : index
    %c0_772 = arith.constant 0 : index
    %681 = vector.load %arg2[%c1_770, %c0_771, %c0_772] : memref<9x4x16xbf16, #tpu.memory_space<vmem>>, vector<1x4x16xbf16>
    %682 = vector.shape_cast %681 : vector<1x4x16xbf16> to vector<4x16xbf16>
    %cst_773 = arith.constant dense<0.000000e+00> : vector<16x16xf32>
    %683 = tpu.matmul %680, %682, %cst_773 {dimension_numbers = #tpu.dot_dimension_numbers<[1], [0], [0], [1], [0, 0, 1, 1], [], []>} : vector<16x4xbf16>, vector<4x16xbf16>, vector<16x16xf32> -> vector<16x16xf32>
    %684 = arith.addf %677, %683 : vector<16x16xf32>
    %c0_774 = arith.constant 0 : index
    %c10_775 = arith.constant 10 : index
    %c2_776 = arith.constant 2 : index
    %c0_777 = arith.constant 0 : index
    %685 = vector.load %arg1[%c0_774, %c10_775, %c2_776, %c0_777] : memref<1x18x18x4xf32, #tpu.memory_space<vmem>>, vector<1x1x16x4xf32>
    %686 = vector.shape_cast %685 : vector<1x1x16x4xf32> to vector<16x4xf32>
    %687 = arith.truncf %686 : vector<16x4xf32> to vector<16x4xbf16>
    %c2_778 = arith.constant 2 : index
    %c0_779 = arith.constant 0 : index
    %c0_780 = arith.constant 0 : index
    %688 = vector.load %arg2[%c2_778, %c0_779, %c0_780] : memref<9x4x16xbf16, #tpu.memory_space<vmem>>, vector<1x4x16xbf16>
    %689 = vector.shape_cast %688 : vector<1x4x16xbf16> to vector<4x16xbf16>
    %cst_781 = arith.constant dense<0.000000e+00> : vector<16x16xf32>
    %690 = tpu.matmul %687, %689, %cst_781 {dimension_numbers = #tpu.dot_dimension_numbers<[1], [0], [0], [1], [0, 0, 1, 1], [], []>} : vector<16x4xbf16>, vector<4x16xbf16>, vector<16x16xf32> -> vector<16x16xf32>
    %691 = arith.addf %684, %690 : vector<16x16xf32>
    %c0_782 = arith.constant 0 : index
    %c11_783 = arith.constant 11 : index
    %c0_784 = arith.constant 0 : index
    %c0_785 = arith.constant 0 : index
    %692 = vector.load %arg1[%c0_782, %c11_783, %c0_784, %c0_785] : memref<1x18x18x4xf32, #tpu.memory_space<vmem>>, vector<1x1x16x4xf32>
    %693 = vector.shape_cast %692 : vector<1x1x16x4xf32> to vector<16x4xf32>
    %694 = arith.truncf %693 : vector<16x4xf32> to vector<16x4xbf16>
    %c3_786 = arith.constant 3 : index
    %c0_787 = arith.constant 0 : index
    %c0_788 = arith.constant 0 : index
    %695 = vector.load %arg2[%c3_786, %c0_787, %c0_788] : memref<9x4x16xbf16, #tpu.memory_space<vmem>>, vector<1x4x16xbf16>
    %696 = vector.shape_cast %695 : vector<1x4x16xbf16> to vector<4x16xbf16>
    %cst_789 = arith.constant dense<0.000000e+00> : vector<16x16xf32>
    %697 = tpu.matmul %694, %696, %cst_789 {dimension_numbers = #tpu.dot_dimension_numbers<[1], [0], [0], [1], [0, 0, 1, 1], [], []>} : vector<16x4xbf16>, vector<4x16xbf16>, vector<16x16xf32> -> vector<16x16xf32>
    %698 = arith.addf %691, %697 : vector<16x16xf32>
    %c0_790 = arith.constant 0 : index
    %c11_791 = arith.constant 11 : index
    %c1_792 = arith.constant 1 : index
    %c0_793 = arith.constant 0 : index
    %699 = vector.load %arg1[%c0_790, %c11_791, %c1_792, %c0_793] : memref<1x18x18x4xf32, #tpu.memory_space<vmem>>, vector<1x1x16x4xf32>
    %700 = vector.shape_cast %699 : vector<1x1x16x4xf32> to vector<16x4xf32>
    %701 = arith.truncf %700 : vector<16x4xf32> to vector<16x4xbf16>
    %c4_794 = arith.constant 4 : index
    %c0_795 = arith.constant 0 : index
    %c0_796 = arith.constant 0 : index
    %702 = vector.load %arg2[%c4_794, %c0_795, %c0_796] : memref<9x4x16xbf16, #tpu.memory_space<vmem>>, vector<1x4x16xbf16>
    %703 = vector.shape_cast %702 : vector<1x4x16xbf16> to vector<4x16xbf16>
    %cst_797 = arith.constant dense<0.000000e+00> : vector<16x16xf32>
    %704 = tpu.matmul %701, %703, %cst_797 {dimension_numbers = #tpu.dot_dimension_numbers<[1], [0], [0], [1], [0, 0, 1, 1], [], []>} : vector<16x4xbf16>, vector<4x16xbf16>, vector<16x16xf32> -> vector<16x16xf32>
    %705 = arith.addf %698, %704 : vector<16x16xf32>
    %c0_798 = arith.constant 0 : index
    %c11_799 = arith.constant 11 : index
    %c2_800 = arith.constant 2 : index
    %c0_801 = arith.constant 0 : index
    %706 = vector.load %arg1[%c0_798, %c11_799, %c2_800, %c0_801] : memref<1x18x18x4xf32, #tpu.memory_space<vmem>>, vector<1x1x16x4xf32>
    %707 = vector.shape_cast %706 : vector<1x1x16x4xf32> to vector<16x4xf32>
    %708 = arith.truncf %707 : vector<16x4xf32> to vector<16x4xbf16>
    %c5_802 = arith.constant 5 : index
    %c0_803 = arith.constant 0 : index
    %c0_804 = arith.constant 0 : index
    %709 = vector.load %arg2[%c5_802, %c0_803, %c0_804] : memref<9x4x16xbf16, #tpu.memory_space<vmem>>, vector<1x4x16xbf16>
    %710 = vector.shape_cast %709 : vector<1x4x16xbf16> to vector<4x16xbf16>
    %cst_805 = arith.constant dense<0.000000e+00> : vector<16x16xf32>
    %711 = tpu.matmul %708, %710, %cst_805 {dimension_numbers = #tpu.dot_dimension_numbers<[1], [0], [0], [1], [0, 0, 1, 1], [], []>} : vector<16x4xbf16>, vector<4x16xbf16>, vector<16x16xf32> -> vector<16x16xf32>
    %712 = arith.addf %705, %711 : vector<16x16xf32>
    %c0_806 = arith.constant 0 : index
    %c12 = arith.constant 12 : index
    %c0_807 = arith.constant 0 : index
    %c0_808 = arith.constant 0 : index
    %713 = vector.load %arg1[%c0_806, %c12, %c0_807, %c0_808] : memref<1x18x18x4xf32, #tpu.memory_space<vmem>>, vector<1x1x16x4xf32>
    %714 = vector.shape_cast %713 : vector<1x1x16x4xf32> to vector<16x4xf32>
    %715 = arith.truncf %714 : vector<16x4xf32> to vector<16x4xbf16>
    %c6_809 = arith.constant 6 : index
    %c0_810 = arith.constant 0 : index
    %c0_811 = arith.constant 0 : index
    %716 = vector.load %arg2[%c6_809, %c0_810, %c0_811] : memref<9x4x16xbf16, #tpu.memory_space<vmem>>, vector<1x4x16xbf16>
    %717 = vector.shape_cast %716 : vector<1x4x16xbf16> to vector<4x16xbf16>
    %cst_812 = arith.constant dense<0.000000e+00> : vector<16x16xf32>
    %718 = tpu.matmul %715, %717, %cst_812 {dimension_numbers = #tpu.dot_dimension_numbers<[1], [0], [0], [1], [0, 0, 1, 1], [], []>} : vector<16x4xbf16>, vector<4x16xbf16>, vector<16x16xf32> -> vector<16x16xf32>
    %719 = arith.addf %712, %718 : vector<16x16xf32>
    %c0_813 = arith.constant 0 : index
    %c12_814 = arith.constant 12 : index
    %c1_815 = arith.constant 1 : index
    %c0_816 = arith.constant 0 : index
    %720 = vector.load %arg1[%c0_813, %c12_814, %c1_815, %c0_816] : memref<1x18x18x4xf32, #tpu.memory_space<vmem>>, vector<1x1x16x4xf32>
    %721 = vector.shape_cast %720 : vector<1x1x16x4xf32> to vector<16x4xf32>
    %722 = arith.truncf %721 : vector<16x4xf32> to vector<16x4xbf16>
    %c7_817 = arith.constant 7 : index
    %c0_818 = arith.constant 0 : index
    %c0_819 = arith.constant 0 : index
    %723 = vector.load %arg2[%c7_817, %c0_818, %c0_819] : memref<9x4x16xbf16, #tpu.memory_space<vmem>>, vector<1x4x16xbf16>
    %724 = vector.shape_cast %723 : vector<1x4x16xbf16> to vector<4x16xbf16>
    %cst_820 = arith.constant dense<0.000000e+00> : vector<16x16xf32>
    %725 = tpu.matmul %722, %724, %cst_820 {dimension_numbers = #tpu.dot_dimension_numbers<[1], [0], [0], [1], [0, 0, 1, 1], [], []>} : vector<16x4xbf16>, vector<4x16xbf16>, vector<16x16xf32> -> vector<16x16xf32>
    %726 = arith.addf %719, %725 : vector<16x16xf32>
    %c0_821 = arith.constant 0 : index
    %c12_822 = arith.constant 12 : index
    %c2_823 = arith.constant 2 : index
    %c0_824 = arith.constant 0 : index
    %727 = vector.load %arg1[%c0_821, %c12_822, %c2_823, %c0_824] : memref<1x18x18x4xf32, #tpu.memory_space<vmem>>, vector<1x1x16x4xf32>
    %728 = vector.shape_cast %727 : vector<1x1x16x4xf32> to vector<16x4xf32>
    %729 = arith.truncf %728 : vector<16x4xf32> to vector<16x4xbf16>
    %c8_825 = arith.constant 8 : index
    %c0_826 = arith.constant 0 : index
    %c0_827 = arith.constant 0 : index
    %730 = vector.load %arg2[%c8_825, %c0_826, %c0_827] : memref<9x4x16xbf16, #tpu.memory_space<vmem>>, vector<1x4x16xbf16>
    %731 = vector.shape_cast %730 : vector<1x4x16xbf16> to vector<4x16xbf16>
    %cst_828 = arith.constant dense<0.000000e+00> : vector<16x16xf32>
    %732 = tpu.matmul %729, %731, %cst_828 {dimension_numbers = #tpu.dot_dimension_numbers<[1], [0], [0], [1], [0, 0, 1, 1], [], []>} : vector<16x4xbf16>, vector<4x16xbf16>, vector<16x16xf32> -> vector<16x16xf32>
    %733 = arith.addf %726, %732 : vector<16x16xf32>
    %c0_829 = arith.constant 0 : index
    %c10_830 = arith.constant 10 : index
    %c0_831 = arith.constant 0 : index
    %c0_832 = arith.constant 0 : index
    %734 = vector.load %arg3[%c0_829, %c10_830, %c0_831, %c0_832] : memref<1x16x16x16xf32, #tpu.memory_space<vmem>>, vector<1x1x16x16xf32>
    %735 = vector.shape_cast %734 : vector<1x1x16x16xf32> to vector<16x16xf32>
    %736 = vector.shape_cast %733 : vector<16x16xf32> to vector<1x1x16x16xf32>
    tpu.vector_store %arg3[%c0_829, %c10_830, %c0_831, %c0_832], %736 {strides = array<i32>} : memref<1x16x16x16xf32, #tpu.memory_space<vmem>>, vector<1x1x16x16xf32>,
    %cst_833 = arith.constant 0.000000e+00 : f32
    %737 = vector.broadcast %cst_833 : f32 to vector<16x16xf32>
    %c0_834 = arith.constant 0 : index
    %c11_835 = arith.constant 11 : index
    %c0_836 = arith.constant 0 : index
    %c0_837 = arith.constant 0 : index
    %738 = vector.load %arg1[%c0_834, %c11_835, %c0_836, %c0_837] : memref<1x18x18x4xf32, #tpu.memory_space<vmem>>, vector<1x1x16x4xf32>
    %739 = vector.shape_cast %738 : vector<1x1x16x4xf32> to vector<16x4xf32>
    %740 = arith.truncf %739 : vector<16x4xf32> to vector<16x4xbf16>
    %c0_838 = arith.constant 0 : index
    %c0_839 = arith.constant 0 : index
    %c0_840 = arith.constant 0 : index
    %741 = vector.load %arg2[%c0_838, %c0_839, %c0_840] : memref<9x4x16xbf16, #tpu.memory_space<vmem>>, vector<1x4x16xbf16>
    %742 = vector.shape_cast %741 : vector<1x4x16xbf16> to vector<4x16xbf16>
    %cst_841 = arith.constant dense<0.000000e+00> : vector<16x16xf32>
    %743 = tpu.matmul %740, %742, %cst_841 {dimension_numbers = #tpu.dot_dimension_numbers<[1], [0], [0], [1], [0, 0, 1, 1], [], []>} : vector<16x4xbf16>, vector<4x16xbf16>, vector<16x16xf32> -> vector<16x16xf32>
    %744 = arith.addf %737, %743 : vector<16x16xf32>
    %c0_842 = arith.constant 0 : index
    %c11_843 = arith.constant 11 : index
    %c1_844 = arith.constant 1 : index
    %c0_845 = arith.constant 0 : index
    %745 = vector.load %arg1[%c0_842, %c11_843, %c1_844, %c0_845] : memref<1x18x18x4xf32, #tpu.memory_space<vmem>>, vector<1x1x16x4xf32>
    %746 = vector.shape_cast %745 : vector<1x1x16x4xf32> to vector<16x4xf32>
    %747 = arith.truncf %746 : vector<16x4xf32> to vector<16x4xbf16>
    %c1_846 = arith.constant 1 : index
    %c0_847 = arith.constant 0 : index
    %c0_848 = arith.constant 0 : index
    %748 = vector.load %arg2[%c1_846, %c0_847, %c0_848] : memref<9x4x16xbf16, #tpu.memory_space<vmem>>, vector<1x4x16xbf16>
    %749 = vector.shape_cast %748 : vector<1x4x16xbf16> to vector<4x16xbf16>
    %cst_849 = arith.constant dense<0.000000e+00> : vector<16x16xf32>
    %750 = tpu.matmul %747, %749, %cst_849 {dimension_numbers = #tpu.dot_dimension_numbers<[1], [0], [0], [1], [0, 0, 1, 1], [], []>} : vector<16x4xbf16>, vector<4x16xbf16>, vector<16x16xf32> -> vector<16x16xf32>
    %751 = arith.addf %744, %750 : vector<16x16xf32>
    %c0_850 = arith.constant 0 : index
    %c11_851 = arith.constant 11 : index
    %c2_852 = arith.constant 2 : index
    %c0_853 = arith.constant 0 : index
    %752 = vector.load %arg1[%c0_850, %c11_851, %c2_852, %c0_853] : memref<1x18x18x4xf32, #tpu.memory_space<vmem>>, vector<1x1x16x4xf32>
    %753 = vector.shape_cast %752 : vector<1x1x16x4xf32> to vector<16x4xf32>
    %754 = arith.truncf %753 : vector<16x4xf32> to vector<16x4xbf16>
    %c2_854 = arith.constant 2 : index
    %c0_855 = arith.constant 0 : index
    %c0_856 = arith.constant 0 : index
    %755 = vector.load %arg2[%c2_854, %c0_855, %c0_856] : memref<9x4x16xbf16, #tpu.memory_space<vmem>>, vector<1x4x16xbf16>
    %756 = vector.shape_cast %755 : vector<1x4x16xbf16> to vector<4x16xbf16>
    %cst_857 = arith.constant dense<0.000000e+00> : vector<16x16xf32>
    %757 = tpu.matmul %754, %756, %cst_857 {dimension_numbers = #tpu.dot_dimension_numbers<[1], [0], [0], [1], [0, 0, 1, 1], [], []>} : vector<16x4xbf16>, vector<4x16xbf16>, vector<16x16xf32> -> vector<16x16xf32>
    %758 = arith.addf %751, %757 : vector<16x16xf32>
    %c0_858 = arith.constant 0 : index
    %c12_859 = arith.constant 12 : index
    %c0_860 = arith.constant 0 : index
    %c0_861 = arith.constant 0 : index
    %759 = vector.load %arg1[%c0_858, %c12_859, %c0_860, %c0_861] : memref<1x18x18x4xf32, #tpu.memory_space<vmem>>, vector<1x1x16x4xf32>
    %760 = vector.shape_cast %759 : vector<1x1x16x4xf32> to vector<16x4xf32>
    %761 = arith.truncf %760 : vector<16x4xf32> to vector<16x4xbf16>
    %c3_862 = arith.constant 3 : index
    %c0_863 = arith.constant 0 : index
    %c0_864 = arith.constant 0 : index
    %762 = vector.load %arg2[%c3_862, %c0_863, %c0_864] : memref<9x4x16xbf16, #tpu.memory_space<vmem>>, vector<1x4x16xbf16>
    %763 = vector.shape_cast %762 : vector<1x4x16xbf16> to vector<4x16xbf16>
    %cst_865 = arith.constant dense<0.000000e+00> : vector<16x16xf32>
    %764 = tpu.matmul %761, %763, %cst_865 {dimension_numbers = #tpu.dot_dimension_numbers<[1], [0], [0], [1], [0, 0, 1, 1], [], []>} : vector<16x4xbf16>, vector<4x16xbf16>, vector<16x16xf32> -> vector<16x16xf32>
    %765 = arith.addf %758, %764 : vector<16x16xf32>
    %c0_866 = arith.constant 0 : index
    %c12_867 = arith.constant 12 : index
    %c1_868 = arith.constant 1 : index
    %c0_869 = arith.constant 0 : index
    %766 = vector.load %arg1[%c0_866, %c12_867, %c1_868, %c0_869] : memref<1x18x18x4xf32, #tpu.memory_space<vmem>>, vector<1x1x16x4xf32>
    %767 = vector.shape_cast %766 : vector<1x1x16x4xf32> to vector<16x4xf32>
    %768 = arith.truncf %767 : vector<16x4xf32> to vector<16x4xbf16>
    %c4_870 = arith.constant 4 : index
    %c0_871 = arith.constant 0 : index
    %c0_872 = arith.constant 0 : index
    %769 = vector.load %arg2[%c4_870, %c0_871, %c0_872] : memref<9x4x16xbf16, #tpu.memory_space<vmem>>, vector<1x4x16xbf16>
    %770 = vector.shape_cast %769 : vector<1x4x16xbf16> to vector<4x16xbf16>
    %cst_873 = arith.constant dense<0.000000e+00> : vector<16x16xf32>
    %771 = tpu.matmul %768, %770, %cst_873 {dimension_numbers = #tpu.dot_dimension_numbers<[1], [0], [0], [1], [0, 0, 1, 1], [], []>} : vector<16x4xbf16>, vector<4x16xbf16>, vector<16x16xf32> -> vector<16x16xf32>
    %772 = arith.addf %765, %771 : vector<16x16xf32>
    %c0_874 = arith.constant 0 : index
    %c12_875 = arith.constant 12 : index
    %c2_876 = arith.constant 2 : index
    %c0_877 = arith.constant 0 : index
    %773 = vector.load %arg1[%c0_874, %c12_875, %c2_876, %c0_877] : memref<1x18x18x4xf32, #tpu.memory_space<vmem>>, vector<1x1x16x4xf32>
    %774 = vector.shape_cast %773 : vector<1x1x16x4xf32> to vector<16x4xf32>
    %775 = arith.truncf %774 : vector<16x4xf32> to vector<16x4xbf16>
    %c5_878 = arith.constant 5 : index
    %c0_879 = arith.constant 0 : index
    %c0_880 = arith.constant 0 : index
    %776 = vector.load %arg2[%c5_878, %c0_879, %c0_880] : memref<9x4x16xbf16, #tpu.memory_space<vmem>>, vector<1x4x16xbf16>
    %777 = vector.shape_cast %776 : vector<1x4x16xbf16> to vector<4x16xbf16>
    %cst_881 = arith.constant dense<0.000000e+00> : vector<16x16xf32>
    %778 = tpu.matmul %775, %777, %cst_881 {dimension_numbers = #tpu.dot_dimension_numbers<[1], [0], [0], [1], [0, 0, 1, 1], [], []>} : vector<16x4xbf16>, vector<4x16xbf16>, vector<16x16xf32> -> vector<16x16xf32>
    %779 = arith.addf %772, %778 : vector<16x16xf32>
    %c0_882 = arith.constant 0 : index
    %c13 = arith.constant 13 : index
    %c0_883 = arith.constant 0 : index
    %c0_884 = arith.constant 0 : index
    %780 = vector.load %arg1[%c0_882, %c13, %c0_883, %c0_884] : memref<1x18x18x4xf32, #tpu.memory_space<vmem>>, vector<1x1x16x4xf32>
    %781 = vector.shape_cast %780 : vector<1x1x16x4xf32> to vector<16x4xf32>
    %782 = arith.truncf %781 : vector<16x4xf32> to vector<16x4xbf16>
    %c6_885 = arith.constant 6 : index
    %c0_886 = arith.constant 0 : index
    %c0_887 = arith.constant 0 : index
    %783 = vector.load %arg2[%c6_885, %c0_886, %c0_887] : memref<9x4x16xbf16, #tpu.memory_space<vmem>>, vector<1x4x16xbf16>
    %784 = vector.shape_cast %783 : vector<1x4x16xbf16> to vector<4x16xbf16>
    %cst_888 = arith.constant dense<0.000000e+00> : vector<16x16xf32>
    %785 = tpu.matmul %782, %784, %cst_888 {dimension_numbers = #tpu.dot_dimension_numbers<[1], [0], [0], [1], [0, 0, 1, 1], [], []>} : vector<16x4xbf16>, vector<4x16xbf16>, vector<16x16xf32> -> vector<16x16xf32>
    %786 = arith.addf %779, %785 : vector<16x16xf32>
    %c0_889 = arith.constant 0 : index
    %c13_890 = arith.constant 13 : index
    %c1_891 = arith.constant 1 : index
    %c0_892 = arith.constant 0 : index
    %787 = vector.load %arg1[%c0_889, %c13_890, %c1_891, %c0_892] : memref<1x18x18x4xf32, #tpu.memory_space<vmem>>, vector<1x1x16x4xf32>
    %788 = vector.shape_cast %787 : vector<1x1x16x4xf32> to vector<16x4xf32>
    %789 = arith.truncf %788 : vector<16x4xf32> to vector<16x4xbf16>
    %c7_893 = arith.constant 7 : index
    %c0_894 = arith.constant 0 : index
    %c0_895 = arith.constant 0 : index
    %790 = vector.load %arg2[%c7_893, %c0_894, %c0_895] : memref<9x4x16xbf16, #tpu.memory_space<vmem>>, vector<1x4x16xbf16>
    %791 = vector.shape_cast %790 : vector<1x4x16xbf16> to vector<4x16xbf16>
    %cst_896 = arith.constant dense<0.000000e+00> : vector<16x16xf32>
    %792 = tpu.matmul %789, %791, %cst_896 {dimension_numbers = #tpu.dot_dimension_numbers<[1], [0], [0], [1], [0, 0, 1, 1], [], []>} : vector<16x4xbf16>, vector<4x16xbf16>, vector<16x16xf32> -> vector<16x16xf32>
    %793 = arith.addf %786, %792 : vector<16x16xf32>
    %c0_897 = arith.constant 0 : index
    %c13_898 = arith.constant 13 : index
    %c2_899 = arith.constant 2 : index
    %c0_900 = arith.constant 0 : index
    %794 = vector.load %arg1[%c0_897, %c13_898, %c2_899, %c0_900] : memref<1x18x18x4xf32, #tpu.memory_space<vmem>>, vector<1x1x16x4xf32>
    %795 = vector.shape_cast %794 : vector<1x1x16x4xf32> to vector<16x4xf32>
    %796 = arith.truncf %795 : vector<16x4xf32> to vector<16x4xbf16>
    %c8_901 = arith.constant 8 : index
    %c0_902 = arith.constant 0 : index
    %c0_903 = arith.constant 0 : index
    %797 = vector.load %arg2[%c8_901, %c0_902, %c0_903] : memref<9x4x16xbf16, #tpu.memory_space<vmem>>, vector<1x4x16xbf16>
    %798 = vector.shape_cast %797 : vector<1x4x16xbf16> to vector<4x16xbf16>
    %cst_904 = arith.constant dense<0.000000e+00> : vector<16x16xf32>
    %799 = tpu.matmul %796, %798, %cst_904 {dimension_numbers = #tpu.dot_dimension_numbers<[1], [0], [0], [1], [0, 0, 1, 1], [], []>} : vector<16x4xbf16>, vector<4x16xbf16>, vector<16x16xf32> -> vector<16x16xf32>
    %800 = arith.addf %793, %799 : vector<16x16xf32>
    %c0_905 = arith.constant 0 : index
    %c11_906 = arith.constant 11 : index
    %c0_907 = arith.constant 0 : index
    %c0_908 = arith.constant 0 : index
    %801 = vector.load %arg3[%c0_905, %c11_906, %c0_907, %c0_908] : memref<1x16x16x16xf32, #tpu.memory_space<vmem>>, vector<1x1x16x16xf32>
    %802 = vector.shape_cast %801 : vector<1x1x16x16xf32> to vector<16x16xf32>
    %803 = vector.shape_cast %800 : vector<16x16xf32> to vector<1x1x16x16xf32>
    tpu.vector_store %arg3[%c0_905, %c11_906, %c0_907, %c0_908], %803 {strides = array<i32>} : memref<1x16x16x16xf32, #tpu.memory_space<vmem>>, vector<1x1x16x16xf32>,
    %cst_909 = arith.constant 0.000000e+00 : f32
    %804 = vector.broadcast %cst_909 : f32 to vector<16x16xf32>
    %c0_910 = arith.constant 0 : index
    %c12_911 = arith.constant 12 : index
    %c0_912 = arith.constant 0 : index
    %c0_913 = arith.constant 0 : index
    %805 = vector.load %arg1[%c0_910, %c12_911, %c0_912, %c0_913] : memref<1x18x18x4xf32, #tpu.memory_space<vmem>>, vector<1x1x16x4xf32>
    %806 = vector.shape_cast %805 : vector<1x1x16x4xf32> to vector<16x4xf32>
    %807 = arith.truncf %806 : vector<16x4xf32> to vector<16x4xbf16>
    %c0_914 = arith.constant 0 : index
    %c0_915 = arith.constant 0 : index
    %c0_916 = arith.constant 0 : index
    %808 = vector.load %arg2[%c0_914, %c0_915, %c0_916] : memref<9x4x16xbf16, #tpu.memory_space<vmem>>, vector<1x4x16xbf16>
    %809 = vector.shape_cast %808 : vector<1x4x16xbf16> to vector<4x16xbf16>
    %cst_917 = arith.constant dense<0.000000e+00> : vector<16x16xf32>
    %810 = tpu.matmul %807, %809, %cst_917 {dimension_numbers = #tpu.dot_dimension_numbers<[1], [0], [0], [1], [0, 0, 1, 1], [], []>} : vector<16x4xbf16>, vector<4x16xbf16>, vector<16x16xf32> -> vector<16x16xf32>
    %811 = arith.addf %804, %810 : vector<16x16xf32>
    %c0_918 = arith.constant 0 : index
    %c12_919 = arith.constant 12 : index
    %c1_920 = arith.constant 1 : index
    %c0_921 = arith.constant 0 : index
    %812 = vector.load %arg1[%c0_918, %c12_919, %c1_920, %c0_921] : memref<1x18x18x4xf32, #tpu.memory_space<vmem>>, vector<1x1x16x4xf32>
    %813 = vector.shape_cast %812 : vector<1x1x16x4xf32> to vector<16x4xf32>
    %814 = arith.truncf %813 : vector<16x4xf32> to vector<16x4xbf16>
    %c1_922 = arith.constant 1 : index
    %c0_923 = arith.constant 0 : index
    %c0_924 = arith.constant 0 : index
    %815 = vector.load %arg2[%c1_922, %c0_923, %c0_924] : memref<9x4x16xbf16, #tpu.memory_space<vmem>>, vector<1x4x16xbf16>
    %816 = vector.shape_cast %815 : vector<1x4x16xbf16> to vector<4x16xbf16>
    %cst_925 = arith.constant dense<0.000000e+00> : vector<16x16xf32>
    %817 = tpu.matmul %814, %816, %cst_925 {dimension_numbers = #tpu.dot_dimension_numbers<[1], [0], [0], [1], [0, 0, 1, 1], [], []>} : vector<16x4xbf16>, vector<4x16xbf16>, vector<16x16xf32> -> vector<16x16xf32>
    %818 = arith.addf %811, %817 : vector<16x16xf32>
    %c0_926 = arith.constant 0 : index
    %c12_927 = arith.constant 12 : index
    %c2_928 = arith.constant 2 : index
    %c0_929 = arith.constant 0 : index
    %819 = vector.load %arg1[%c0_926, %c12_927, %c2_928, %c0_929] : memref<1x18x18x4xf32, #tpu.memory_space<vmem>>, vector<1x1x16x4xf32>
    %820 = vector.shape_cast %819 : vector<1x1x16x4xf32> to vector<16x4xf32>
    %821 = arith.truncf %820 : vector<16x4xf32> to vector<16x4xbf16>
    %c2_930 = arith.constant 2 : index
    %c0_931 = arith.constant 0 : index
    %c0_932 = arith.constant 0 : index
    %822 = vector.load %arg2[%c2_930, %c0_931, %c0_932] : memref<9x4x16xbf16, #tpu.memory_space<vmem>>, vector<1x4x16xbf16>
    %823 = vector.shape_cast %822 : vector<1x4x16xbf16> to vector<4x16xbf16>
    %cst_933 = arith.constant dense<0.000000e+00> : vector<16x16xf32>
    %824 = tpu.matmul %821, %823, %cst_933 {dimension_numbers = #tpu.dot_dimension_numbers<[1], [0], [0], [1], [0, 0, 1, 1], [], []>} : vector<16x4xbf16>, vector<4x16xbf16>, vector<16x16xf32> -> vector<16x16xf32>
    %825 = arith.addf %818, %824 : vector<16x16xf32>
    %c0_934 = arith.constant 0 : index
    %c13_935 = arith.constant 13 : index
    %c0_936 = arith.constant 0 : index
    %c0_937 = arith.constant 0 : index
    %826 = vector.load %arg1[%c0_934, %c13_935, %c0_936, %c0_937] : memref<1x18x18x4xf32, #tpu.memory_space<vmem>>, vector<1x1x16x4xf32>
    %827 = vector.shape_cast %826 : vector<1x1x16x4xf32> to vector<16x4xf32>
    %828 = arith.truncf %827 : vector<16x4xf32> to vector<16x4xbf16>
    %c3_938 = arith.constant 3 : index
    %c0_939 = arith.constant 0 : index
    %c0_940 = arith.constant 0 : index
    %829 = vector.load %arg2[%c3_938, %c0_939, %c0_940] : memref<9x4x16xbf16, #tpu.memory_space<vmem>>, vector<1x4x16xbf16>
    %830 = vector.shape_cast %829 : vector<1x4x16xbf16> to vector<4x16xbf16>
    %cst_941 = arith.constant dense<0.000000e+00> : vector<16x16xf32>
    %831 = tpu.matmul %828, %830, %cst_941 {dimension_numbers = #tpu.dot_dimension_numbers<[1], [0], [0], [1], [0, 0, 1, 1], [], []>} : vector<16x4xbf16>, vector<4x16xbf16>, vector<16x16xf32> -> vector<16x16xf32>
    %832 = arith.addf %825, %831 : vector<16x16xf32>
    %c0_942 = arith.constant 0 : index
    %c13_943 = arith.constant 13 : index
    %c1_944 = arith.constant 1 : index
    %c0_945 = arith.constant 0 : index
    %833 = vector.load %arg1[%c0_942, %c13_943, %c1_944, %c0_945] : memref<1x18x18x4xf32, #tpu.memory_space<vmem>>, vector<1x1x16x4xf32>
    %834 = vector.shape_cast %833 : vector<1x1x16x4xf32> to vector<16x4xf32>
    %835 = arith.truncf %834 : vector<16x4xf32> to vector<16x4xbf16>
    %c4_946 = arith.constant 4 : index
    %c0_947 = arith.constant 0 : index
    %c0_948 = arith.constant 0 : index
    %836 = vector.load %arg2[%c4_946, %c0_947, %c0_948] : memref<9x4x16xbf16, #tpu.memory_space<vmem>>, vector<1x4x16xbf16>
    %837 = vector.shape_cast %836 : vector<1x4x16xbf16> to vector<4x16xbf16>
    %cst_949 = arith.constant dense<0.000000e+00> : vector<16x16xf32>
    %838 = tpu.matmul %835, %837, %cst_949 {dimension_numbers = #tpu.dot_dimension_numbers<[1], [0], [0], [1], [0, 0, 1, 1], [], []>} : vector<16x4xbf16>, vector<4x16xbf16>, vector<16x16xf32> -> vector<16x16xf32>
    %839 = arith.addf %832, %838 : vector<16x16xf32>
    %c0_950 = arith.constant 0 : index
    %c13_951 = arith.constant 13 : index
    %c2_952 = arith.constant 2 : index
    %c0_953 = arith.constant 0 : index
    %840 = vector.load %arg1[%c0_950, %c13_951, %c2_952, %c0_953] : memref<1x18x18x4xf32, #tpu.memory_space<vmem>>, vector<1x1x16x4xf32>
    %841 = vector.shape_cast %840 : vector<1x1x16x4xf32> to vector<16x4xf32>
    %842 = arith.truncf %841 : vector<16x4xf32> to vector<16x4xbf16>
    %c5_954 = arith.constant 5 : index
    %c0_955 = arith.constant 0 : index
    %c0_956 = arith.constant 0 : index
    %843 = vector.load %arg2[%c5_954, %c0_955, %c0_956] : memref<9x4x16xbf16, #tpu.memory_space<vmem>>, vector<1x4x16xbf16>
    %844 = vector.shape_cast %843 : vector<1x4x16xbf16> to vector<4x16xbf16>
    %cst_957 = arith.constant dense<0.000000e+00> : vector<16x16xf32>
    %845 = tpu.matmul %842, %844, %cst_957 {dimension_numbers = #tpu.dot_dimension_numbers<[1], [0], [0], [1], [0, 0, 1, 1], [], []>} : vector<16x4xbf16>, vector<4x16xbf16>, vector<16x16xf32> -> vector<16x16xf32>
    %846 = arith.addf %839, %845 : vector<16x16xf32>
    %c0_958 = arith.constant 0 : index
    %c14 = arith.constant 14 : index
    %c0_959 = arith.constant 0 : index
    %c0_960 = arith.constant 0 : index
    %847 = vector.load %arg1[%c0_958, %c14, %c0_959, %c0_960] : memref<1x18x18x4xf32, #tpu.memory_space<vmem>>, vector<1x1x16x4xf32>
    %848 = vector.shape_cast %847 : vector<1x1x16x4xf32> to vector<16x4xf32>
    %849 = arith.truncf %848 : vector<16x4xf32> to vector<16x4xbf16>
    %c6_961 = arith.constant 6 : index
    %c0_962 = arith.constant 0 : index
    %c0_963 = arith.constant 0 : index
    %850 = vector.load %arg2[%c6_961, %c0_962, %c0_963] : memref<9x4x16xbf16, #tpu.memory_space<vmem>>, vector<1x4x16xbf16>
    %851 = vector.shape_cast %850 : vector<1x4x16xbf16> to vector<4x16xbf16>
    %cst_964 = arith.constant dense<0.000000e+00> : vector<16x16xf32>
    %852 = tpu.matmul %849, %851, %cst_964 {dimension_numbers = #tpu.dot_dimension_numbers<[1], [0], [0], [1], [0, 0, 1, 1], [], []>} : vector<16x4xbf16>, vector<4x16xbf16>, vector<16x16xf32> -> vector<16x16xf32>
    %853 = arith.addf %846, %852 : vector<16x16xf32>
    %c0_965 = arith.constant 0 : index
    %c14_966 = arith.constant 14 : index
    %c1_967 = arith.constant 1 : index
    %c0_968 = arith.constant 0 : index
    %854 = vector.load %arg1[%c0_965, %c14_966, %c1_967, %c0_968] : memref<1x18x18x4xf32, #tpu.memory_space<vmem>>, vector<1x1x16x4xf32>
    %855 = vector.shape_cast %854 : vector<1x1x16x4xf32> to vector<16x4xf32>
    %856 = arith.truncf %855 : vector<16x4xf32> to vector<16x4xbf16>
    %c7_969 = arith.constant 7 : index
    %c0_970 = arith.constant 0 : index
    %c0_971 = arith.constant 0 : index
    %857 = vector.load %arg2[%c7_969, %c0_970, %c0_971] : memref<9x4x16xbf16, #tpu.memory_space<vmem>>, vector<1x4x16xbf16>
    %858 = vector.shape_cast %857 : vector<1x4x16xbf16> to vector<4x16xbf16>
    %cst_972 = arith.constant dense<0.000000e+00> : vector<16x16xf32>
    %859 = tpu.matmul %856, %858, %cst_972 {dimension_numbers = #tpu.dot_dimension_numbers<[1], [0], [0], [1], [0, 0, 1, 1], [], []>} : vector<16x4xbf16>, vector<4x16xbf16>, vector<16x16xf32> -> vector<16x16xf32>
    %860 = arith.addf %853, %859 : vector<16x16xf32>
    %c0_973 = arith.constant 0 : index
    %c14_974 = arith.constant 14 : index
    %c2_975 = arith.constant 2 : index
    %c0_976 = arith.constant 0 : index
    %861 = vector.load %arg1[%c0_973, %c14_974, %c2_975, %c0_976] : memref<1x18x18x4xf32, #tpu.memory_space<vmem>>, vector<1x1x16x4xf32>
    %862 = vector.shape_cast %861 : vector<1x1x16x4xf32> to vector<16x4xf32>
    %863 = arith.truncf %862 : vector<16x4xf32> to vector<16x4xbf16>
    %c8_977 = arith.constant 8 : index
    %c0_978 = arith.constant 0 : index
    %c0_979 = arith.constant 0 : index
    %864 = vector.load %arg2[%c8_977, %c0_978, %c0_979] : memref<9x4x16xbf16, #tpu.memory_space<vmem>>, vector<1x4x16xbf16>
    %865 = vector.shape_cast %864 : vector<1x4x16xbf16> to vector<4x16xbf16>
    %cst_980 = arith.constant dense<0.000000e+00> : vector<16x16xf32>
    %866 = tpu.matmul %863, %865, %cst_980 {dimension_numbers = #tpu.dot_dimension_numbers<[1], [0], [0], [1], [0, 0, 1, 1], [], []>} : vector<16x4xbf16>, vector<4x16xbf16>, vector<16x16xf32> -> vector<16x16xf32>
    %867 = arith.addf %860, %866 : vector<16x16xf32>
    %c0_981 = arith.constant 0 : index
    %c12_982 = arith.constant 12 : index
    %c0_983 = arith.constant 0 : index
    %c0_984 = arith.constant 0 : index
    %868 = vector.load %arg3[%c0_981, %c12_982, %c0_983, %c0_984] : memref<1x16x16x16xf32, #tpu.memory_space<vmem>>, vector<1x1x16x16xf32>
    %869 = vector.shape_cast %868 : vector<1x1x16x16xf32> to vector<16x16xf32>
    %870 = vector.shape_cast %867 : vector<16x16xf32> to vector<1x1x16x16xf32>
    tpu.vector_store %arg3[%c0_981, %c12_982, %c0_983, %c0_984], %870 {strides = array<i32>} : memref<1x16x16x16xf32, #tpu.memory_space<vmem>>, vector<1x1x16x16xf32>,
    %cst_985 = arith.constant 0.000000e+00 : f32
    %871 = vector.broadcast %cst_985 : f32 to vector<16x16xf32>
    %c0_986 = arith.constant 0 : index
    %c13_987 = arith.constant 13 : index
    %c0_988 = arith.constant 0 : index
    %c0_989 = arith.constant 0 : index
    %872 = vector.load %arg1[%c0_986, %c13_987, %c0_988, %c0_989] : memref<1x18x18x4xf32, #tpu.memory_space<vmem>>, vector<1x1x16x4xf32>
    %873 = vector.shape_cast %872 : vector<1x1x16x4xf32> to vector<16x4xf32>
    %874 = arith.truncf %873 : vector<16x4xf32> to vector<16x4xbf16>
    %c0_990 = arith.constant 0 : index
    %c0_991 = arith.constant 0 : index
    %c0_992 = arith.constant 0 : index
    %875 = vector.load %arg2[%c0_990, %c0_991, %c0_992] : memref<9x4x16xbf16, #tpu.memory_space<vmem>>, vector<1x4x16xbf16>
    %876 = vector.shape_cast %875 : vector<1x4x16xbf16> to vector<4x16xbf16>
    %cst_993 = arith.constant dense<0.000000e+00> : vector<16x16xf32>
    %877 = tpu.matmul %874, %876, %cst_993 {dimension_numbers = #tpu.dot_dimension_numbers<[1], [0], [0], [1], [0, 0, 1, 1], [], []>} : vector<16x4xbf16>, vector<4x16xbf16>, vector<16x16xf32> -> vector<16x16xf32>
    %878 = arith.addf %871, %877 : vector<16x16xf32>
    %c0_994 = arith.constant 0 : index
    %c13_995 = arith.constant 13 : index
    %c1_996 = arith.constant 1 : index
    %c0_997 = arith.constant 0 : index
    %879 = vector.load %arg1[%c0_994, %c13_995, %c1_996, %c0_997] : memref<1x18x18x4xf32, #tpu.memory_space<vmem>>, vector<1x1x16x4xf32>
    %880 = vector.shape_cast %879 : vector<1x1x16x4xf32> to vector<16x4xf32>
    %881 = arith.truncf %880 : vector<16x4xf32> to vector<16x4xbf16>
    %c1_998 = arith.constant 1 : index
    %c0_999 = arith.constant 0 : index
    %c0_1000 = arith.constant 0 : index
    %882 = vector.load %arg2[%c1_998, %c0_999, %c0_1000] : memref<9x4x16xbf16, #tpu.memory_space<vmem>>, vector<1x4x16xbf16>
    %883 = vector.shape_cast %882 : vector<1x4x16xbf16> to vector<4x16xbf16>
    %cst_1001 = arith.constant dense<0.000000e+00> : vector<16x16xf32>
    %884 = tpu.matmul %881, %883, %cst_1001 {dimension_numbers = #tpu.dot_dimension_numbers<[1], [0], [0], [1], [0, 0, 1, 1], [], []>} : vector<16x4xbf16>, vector<4x16xbf16>, vector<16x16xf32> -> vector<16x16xf32>
    %885 = arith.addf %878, %884 : vector<16x16xf32>
    %c0_1002 = arith.constant 0 : index
    %c13_1003 = arith.constant 13 : index
    %c2_1004 = arith.constant 2 : index
    %c0_1005 = arith.constant 0 : index
    %886 = vector.load %arg1[%c0_1002, %c13_1003, %c2_1004, %c0_1005] : memref<1x18x18x4xf32, #tpu.memory_space<vmem>>, vector<1x1x16x4xf32>
    %887 = vector.shape_cast %886 : vector<1x1x16x4xf32> to vector<16x4xf32>
    %888 = arith.truncf %887 : vector<16x4xf32> to vector<16x4xbf16>
    %c2_1006 = arith.constant 2 : index
    %c0_1007 = arith.constant 0 : index
    %c0_1008 = arith.constant 0 : index
    %889 = vector.load %arg2[%c2_1006, %c0_1007, %c0_1008] : memref<9x4x16xbf16, #tpu.memory_space<vmem>>, vector<1x4x16xbf16>
    %890 = vector.shape_cast %889 : vector<1x4x16xbf16> to vector<4x16xbf16>
    %cst_1009 = arith.constant dense<0.000000e+00> : vector<16x16xf32>
    %891 = tpu.matmul %888, %890, %cst_1009 {dimension_numbers = #tpu.dot_dimension_numbers<[1], [0], [0], [1], [0, 0, 1, 1], [], []>} : vector<16x4xbf16>, vector<4x16xbf16>, vector<16x16xf32> -> vector<16x16xf32>
    %892 = arith.addf %885, %891 : vector<16x16xf32>
    %c0_1010 = arith.constant 0 : index
    %c14_1011 = arith.constant 14 : index
    %c0_1012 = arith.constant 0 : index
    %c0_1013 = arith.constant 0 : index
    %893 = vector.load %arg1[%c0_1010, %c14_1011, %c0_1012, %c0_1013] : memref<1x18x18x4xf32, #tpu.memory_space<vmem>>, vector<1x1x16x4xf32>
    %894 = vector.shape_cast %893 : vector<1x1x16x4xf32> to vector<16x4xf32>
    %895 = arith.truncf %894 : vector<16x4xf32> to vector<16x4xbf16>
    %c3_1014 = arith.constant 3 : index
    %c0_1015 = arith.constant 0 : index
    %c0_1016 = arith.constant 0 : index
    %896 = vector.load %arg2[%c3_1014, %c0_1015, %c0_1016] : memref<9x4x16xbf16, #tpu.memory_space<vmem>>, vector<1x4x16xbf16>
    %897 = vector.shape_cast %896 : vector<1x4x16xbf16> to vector<4x16xbf16>
    %cst_1017 = arith.constant dense<0.000000e+00> : vector<16x16xf32>
    %898 = tpu.matmul %895, %897, %cst_1017 {dimension_numbers = #tpu.dot_dimension_numbers<[1], [0], [0], [1], [0, 0, 1, 1], [], []>} : vector<16x4xbf16>, vector<4x16xbf16>, vector<16x16xf32> -> vector<16x16xf32>
    %899 = arith.addf %892, %898 : vector<16x16xf32>
    %c0_1018 = arith.constant 0 : index
    %c14_1019 = arith.constant 14 : index
    %c1_1020 = arith.constant 1 : index
    %c0_1021 = arith.constant 0 : index
    %900 = vector.load %arg1[%c0_1018, %c14_1019, %c1_1020, %c0_1021] : memref<1x18x18x4xf32, #tpu.memory_space<vmem>>, vector<1x1x16x4xf32>
    %901 = vector.shape_cast %900 : vector<1x1x16x4xf32> to vector<16x4xf32>
    %902 = arith.truncf %901 : vector<16x4xf32> to vector<16x4xbf16>
    %c4_1022 = arith.constant 4 : index
    %c0_1023 = arith.constant 0 : index
    %c0_1024 = arith.constant 0 : index
    %903 = vector.load %arg2[%c4_1022, %c0_1023, %c0_1024] : memref<9x4x16xbf16, #tpu.memory_space<vmem>>, vector<1x4x16xbf16>
    %904 = vector.shape_cast %903 : vector<1x4x16xbf16> to vector<4x16xbf16>
    %cst_1025 = arith.constant dense<0.000000e+00> : vector<16x16xf32>
    %905 = tpu.matmul %902, %904, %cst_1025 {dimension_numbers = #tpu.dot_dimension_numbers<[1], [0], [0], [1], [0, 0, 1, 1], [], []>} : vector<16x4xbf16>, vector<4x16xbf16>, vector<16x16xf32> -> vector<16x16xf32>
    %906 = arith.addf %899, %905 : vector<16x16xf32>
    %c0_1026 = arith.constant 0 : index
    %c14_1027 = arith.constant 14 : index
    %c2_1028 = arith.constant 2 : index
    %c0_1029 = arith.constant 0 : index
    %907 = vector.load %arg1[%c0_1026, %c14_1027, %c2_1028, %c0_1029] : memref<1x18x18x4xf32, #tpu.memory_space<vmem>>, vector<1x1x16x4xf32>
    %908 = vector.shape_cast %907 : vector<1x1x16x4xf32> to vector<16x4xf32>
    %909 = arith.truncf %908 : vector<16x4xf32> to vector<16x4xbf16>
    %c5_1030 = arith.constant 5 : index
    %c0_1031 = arith.constant 0 : index
    %c0_1032 = arith.constant 0 : index
    %910 = vector.load %arg2[%c5_1030, %c0_1031, %c0_1032] : memref<9x4x16xbf16, #tpu.memory_space<vmem>>, vector<1x4x16xbf16>
    %911 = vector.shape_cast %910 : vector<1x4x16xbf16> to vector<4x16xbf16>
    %cst_1033 = arith.constant dense<0.000000e+00> : vector<16x16xf32>
    %912 = tpu.matmul %909, %911, %cst_1033 {dimension_numbers = #tpu.dot_dimension_numbers<[1], [0], [0], [1], [0, 0, 1, 1], [], []>} : vector<16x4xbf16>, vector<4x16xbf16>, vector<16x16xf32> -> vector<16x16xf32>
    %913 = arith.addf %906, %912 : vector<16x16xf32>
    %c0_1034 = arith.constant 0 : index
    %c15 = arith.constant 15 : index
    %c0_1035 = arith.constant 0 : index
    %c0_1036 = arith.constant 0 : index
    %914 = vector.load %arg1[%c0_1034, %c15, %c0_1035, %c0_1036] : memref<1x18x18x4xf32, #tpu.memory_space<vmem>>, vector<1x1x16x4xf32>
    %915 = vector.shape_cast %914 : vector<1x1x16x4xf32> to vector<16x4xf32>
    %916 = arith.truncf %915 : vector<16x4xf32> to vector<16x4xbf16>
    %c6_1037 = arith.constant 6 : index
    %c0_1038 = arith.constant 0 : index
    %c0_1039 = arith.constant 0 : index
    %917 = vector.load %arg2[%c6_1037, %c0_1038, %c0_1039] : memref<9x4x16xbf16, #tpu.memory_space<vmem>>, vector<1x4x16xbf16>
    %918 = vector.shape_cast %917 : vector<1x4x16xbf16> to vector<4x16xbf16>
    %cst_1040 = arith.constant dense<0.000000e+00> : vector<16x16xf32>
    %919 = tpu.matmul %916, %918, %cst_1040 {dimension_numbers = #tpu.dot_dimension_numbers<[1], [0], [0], [1], [0, 0, 1, 1], [], []>} : vector<16x4xbf16>, vector<4x16xbf16>, vector<16x16xf32> -> vector<16x16xf32>
    %920 = arith.addf %913, %919 : vector<16x16xf32>
    %c0_1041 = arith.constant 0 : index
    %c15_1042 = arith.constant 15 : index
    %c1_1043 = arith.constant 1 : index
    %c0_1044 = arith.constant 0 : index
    %921 = vector.load %arg1[%c0_1041, %c15_1042, %c1_1043, %c0_1044] : memref<1x18x18x4xf32, #tpu.memory_space<vmem>>, vector<1x1x16x4xf32>
    %922 = vector.shape_cast %921 : vector<1x1x16x4xf32> to vector<16x4xf32>
    %923 = arith.truncf %922 : vector<16x4xf32> to vector<16x4xbf16>
    %c7_1045 = arith.constant 7 : index
    %c0_1046 = arith.constant 0 : index
    %c0_1047 = arith.constant 0 : index
    %924 = vector.load %arg2[%c7_1045, %c0_1046, %c0_1047] : memref<9x4x16xbf16, #tpu.memory_space<vmem>>, vector<1x4x16xbf16>
    %925 = vector.shape_cast %924 : vector<1x4x16xbf16> to vector<4x16xbf16>
    %cst_1048 = arith.constant dense<0.000000e+00> : vector<16x16xf32>
    %926 = tpu.matmul %923, %925, %cst_1048 {dimension_numbers = #tpu.dot_dimension_numbers<[1], [0], [0], [1], [0, 0, 1, 1], [], []>} : vector<16x4xbf16>, vector<4x16xbf16>, vector<16x16xf32> -> vector<16x16xf32>
    %927 = arith.addf %920, %926 : vector<16x16xf32>
    %c0_1049 = arith.constant 0 : index
    %c15_1050 = arith.constant 15 : index
    %c2_1051 = arith.constant 2 : index
    %c0_1052 = arith.constant 0 : index
    %928 = vector.load %arg1[%c0_1049, %c15_1050, %c2_1051, %c0_1052] : memref<1x18x18x4xf32, #tpu.memory_space<vmem>>, vector<1x1x16x4xf32>
    %929 = vector.shape_cast %928 : vector<1x1x16x4xf32> to vector<16x4xf32>
    %930 = arith.truncf %929 : vector<16x4xf32> to vector<16x4xbf16>
    %c8_1053 = arith.constant 8 : index
    %c0_1054 = arith.constant 0 : index
    %c0_1055 = arith.constant 0 : index
    %931 = vector.load %arg2[%c8_1053, %c0_1054, %c0_1055] : memref<9x4x16xbf16, #tpu.memory_space<vmem>>, vector<1x4x16xbf16>
    %932 = vector.shape_cast %931 : vector<1x4x16xbf16> to vector<4x16xbf16>
    %cst_1056 = arith.constant dense<0.000000e+00> : vector<16x16xf32>
    %933 = tpu.matmul %930, %932, %cst_1056 {dimension_numbers = #tpu.dot_dimension_numbers<[1], [0], [0], [1], [0, 0, 1, 1], [], []>} : vector<16x4xbf16>, vector<4x16xbf16>, vector<16x16xf32> -> vector<16x16xf32>
    %934 = arith.addf %927, %933 : vector<16x16xf32>
    %c0_1057 = arith.constant 0 : index
    %c13_1058 = arith.constant 13 : index
    %c0_1059 = arith.constant 0 : index
    %c0_1060 = arith.constant 0 : index
    %935 = vector.load %arg3[%c0_1057, %c13_1058, %c0_1059, %c0_1060] : memref<1x16x16x16xf32, #tpu.memory_space<vmem>>, vector<1x1x16x16xf32>
    %936 = vector.shape_cast %935 : vector<1x1x16x16xf32> to vector<16x16xf32>
    %937 = vector.shape_cast %934 : vector<16x16xf32> to vector<1x1x16x16xf32>
    tpu.vector_store %arg3[%c0_1057, %c13_1058, %c0_1059, %c0_1060], %937 {strides = array<i32>} : memref<1x16x16x16xf32, #tpu.memory_space<vmem>>, vector<1x1x16x16xf32>,
    %cst_1061 = arith.constant 0.000000e+00 : f32
    %938 = vector.broadcast %cst_1061 : f32 to vector<16x16xf32>
    %c0_1062 = arith.constant 0 : index
    %c14_1063 = arith.constant 14 : index
    %c0_1064 = arith.constant 0 : index
    %c0_1065 = arith.constant 0 : index
    %939 = vector.load %arg1[%c0_1062, %c14_1063, %c0_1064, %c0_1065] : memref<1x18x18x4xf32, #tpu.memory_space<vmem>>, vector<1x1x16x4xf32>
    %940 = vector.shape_cast %939 : vector<1x1x16x4xf32> to vector<16x4xf32>
    %941 = arith.truncf %940 : vector<16x4xf32> to vector<16x4xbf16>
    %c0_1066 = arith.constant 0 : index
    %c0_1067 = arith.constant 0 : index
    %c0_1068 = arith.constant 0 : index
    %942 = vector.load %arg2[%c0_1066, %c0_1067, %c0_1068] : memref<9x4x16xbf16, #tpu.memory_space<vmem>>, vector<1x4x16xbf16>
    %943 = vector.shape_cast %942 : vector<1x4x16xbf16> to vector<4x16xbf16>
    %cst_1069 = arith.constant dense<0.000000e+00> : vector<16x16xf32>
    %944 = tpu.matmul %941, %943, %cst_1069 {dimension_numbers = #tpu.dot_dimension_numbers<[1], [0], [0], [1], [0, 0, 1, 1], [], []>} : vector<16x4xbf16>, vector<4x16xbf16>, vector<16x16xf32> -> vector<16x16xf32>
    %945 = arith.addf %938, %944 : vector<16x16xf32>
    %c0_1070 = arith.constant 0 : index
    %c14_1071 = arith.constant 14 : index
    %c1_1072 = arith.constant 1 : index
    %c0_1073 = arith.constant 0 : index
    %946 = vector.load %arg1[%c0_1070, %c14_1071, %c1_1072, %c0_1073] : memref<1x18x18x4xf32, #tpu.memory_space<vmem>>, vector<1x1x16x4xf32>
    %947 = vector.shape_cast %946 : vector<1x1x16x4xf32> to vector<16x4xf32>
    %948 = arith.truncf %947 : vector<16x4xf32> to vector<16x4xbf16>
    %c1_1074 = arith.constant 1 : index
    %c0_1075 = arith.constant 0 : index
    %c0_1076 = arith.constant 0 : index
    %949 = vector.load %arg2[%c1_1074, %c0_1075, %c0_1076] : memref<9x4x16xbf16, #tpu.memory_space<vmem>>, vector<1x4x16xbf16>
    %950 = vector.shape_cast %949 : vector<1x4x16xbf16> to vector<4x16xbf16>
    %cst_1077 = arith.constant dense<0.000000e+00> : vector<16x16xf32>
    %951 = tpu.matmul %948, %950, %cst_1077 {dimension_numbers = #tpu.dot_dimension_numbers<[1], [0], [0], [1], [0, 0, 1, 1], [], []>} : vector<16x4xbf16>, vector<4x16xbf16>, vector<16x16xf32> -> vector<16x16xf32>
    %952 = arith.addf %945, %951 : vector<16x16xf32>
    %c0_1078 = arith.constant 0 : index
    %c14_1079 = arith.constant 14 : index
    %c2_1080 = arith.constant 2 : index
    %c0_1081 = arith.constant 0 : index
    %953 = vector.load %arg1[%c0_1078, %c14_1079, %c2_1080, %c0_1081] : memref<1x18x18x4xf32, #tpu.memory_space<vmem>>, vector<1x1x16x4xf32>
    %954 = vector.shape_cast %953 : vector<1x1x16x4xf32> to vector<16x4xf32>
    %955 = arith.truncf %954 : vector<16x4xf32> to vector<16x4xbf16>
    %c2_1082 = arith.constant 2 : index
    %c0_1083 = arith.constant 0 : index
    %c0_1084 = arith.constant 0 : index
    %956 = vector.load %arg2[%c2_1082, %c0_1083, %c0_1084] : memref<9x4x16xbf16, #tpu.memory_space<vmem>>, vector<1x4x16xbf16>
    %957 = vector.shape_cast %956 : vector<1x4x16xbf16> to vector<4x16xbf16>
    %cst_1085 = arith.constant dense<0.000000e+00> : vector<16x16xf32>
    %958 = tpu.matmul %955, %957, %cst_1085 {dimension_numbers = #tpu.dot_dimension_numbers<[1], [0], [0], [1], [0, 0, 1, 1], [], []>} : vector<16x4xbf16>, vector<4x16xbf16>, vector<16x16xf32> -> vector<16x16xf32>
    %959 = arith.addf %952, %958 : vector<16x16xf32>
    %c0_1086 = arith.constant 0 : index
    %c15_1087 = arith.constant 15 : index
    %c0_1088 = arith.constant 0 : index
    %c0_1089 = arith.constant 0 : index
    %960 = vector.load %arg1[%c0_1086, %c15_1087, %c0_1088, %c0_1089] : memref<1x18x18x4xf32, #tpu.memory_space<vmem>>, vector<1x1x16x4xf32>
    %961 = vector.shape_cast %960 : vector<1x1x16x4xf32> to vector<16x4xf32>
    %962 = arith.truncf %961 : vector<16x4xf32> to vector<16x4xbf16>
    %c3_1090 = arith.constant 3 : index
    %c0_1091 = arith.constant 0 : index
    %c0_1092 = arith.constant 0 : index
    %963 = vector.load %arg2[%c3_1090, %c0_1091, %c0_1092] : memref<9x4x16xbf16, #tpu.memory_space<vmem>>, vector<1x4x16xbf16>
    %964 = vector.shape_cast %963 : vector<1x4x16xbf16> to vector<4x16xbf16>
    %cst_1093 = arith.constant dense<0.000000e+00> : vector<16x16xf32>
    %965 = tpu.matmul %962, %964, %cst_1093 {dimension_numbers = #tpu.dot_dimension_numbers<[1], [0], [0], [1], [0, 0, 1, 1], [], []>} : vector<16x4xbf16>, vector<4x16xbf16>, vector<16x16xf32> -> vector<16x16xf32>
    %966 = arith.addf %959, %965 : vector<16x16xf32>
    %c0_1094 = arith.constant 0 : index
    %c15_1095 = arith.constant 15 : index
    %c1_1096 = arith.constant 1 : index
    %c0_1097 = arith.constant 0 : index
    %967 = vector.load %arg1[%c0_1094, %c15_1095, %c1_1096, %c0_1097] : memref<1x18x18x4xf32, #tpu.memory_space<vmem>>, vector<1x1x16x4xf32>
    %968 = vector.shape_cast %967 : vector<1x1x16x4xf32> to vector<16x4xf32>
    %969 = arith.truncf %968 : vector<16x4xf32> to vector<16x4xbf16>
    %c4_1098 = arith.constant 4 : index
    %c0_1099 = arith.constant 0 : index
    %c0_1100 = arith.constant 0 : index
    %970 = vector.load %arg2[%c4_1098, %c0_1099, %c0_1100] : memref<9x4x16xbf16, #tpu.memory_space<vmem>>, vector<1x4x16xbf16>
    %971 = vector.shape_cast %970 : vector<1x4x16xbf16> to vector<4x16xbf16>
    %cst_1101 = arith.constant dense<0.000000e+00> : vector<16x16xf32>
    %972 = tpu.matmul %969, %971, %cst_1101 {dimension_numbers = #tpu.dot_dimension_numbers<[1], [0], [0], [1], [0, 0, 1, 1], [], []>} : vector<16x4xbf16>, vector<4x16xbf16>, vector<16x16xf32> -> vector<16x16xf32>
    %973 = arith.addf %966, %972 : vector<16x16xf32>
    %c0_1102 = arith.constant 0 : index
    %c15_1103 = arith.constant 15 : index
    %c2_1104 = arith.constant 2 : index
    %c0_1105 = arith.constant 0 : index
    %974 = vector.load %arg1[%c0_1102, %c15_1103, %c2_1104, %c0_1105] : memref<1x18x18x4xf32, #tpu.memory_space<vmem>>, vector<1x1x16x4xf32>
    %975 = vector.shape_cast %974 : vector<1x1x16x4xf32> to vector<16x4xf32>
    %976 = arith.truncf %975 : vector<16x4xf32> to vector<16x4xbf16>
    %c5_1106 = arith.constant 5 : index
    %c0_1107 = arith.constant 0 : index
    %c0_1108 = arith.constant 0 : index
    %977 = vector.load %arg2[%c5_1106, %c0_1107, %c0_1108] : memref<9x4x16xbf16, #tpu.memory_space<vmem>>, vector<1x4x16xbf16>
    %978 = vector.shape_cast %977 : vector<1x4x16xbf16> to vector<4x16xbf16>
    %cst_1109 = arith.constant dense<0.000000e+00> : vector<16x16xf32>
    %979 = tpu.matmul %976, %978, %cst_1109 {dimension_numbers = #tpu.dot_dimension_numbers<[1], [0], [0], [1], [0, 0, 1, 1], [], []>} : vector<16x4xbf16>, vector<4x16xbf16>, vector<16x16xf32> -> vector<16x16xf32>
    %980 = arith.addf %973, %979 : vector<16x16xf32>
    %c0_1110 = arith.constant 0 : index
    %c16 = arith.constant 16 : index
    %c0_1111 = arith.constant 0 : index
    %c0_1112 = arith.constant 0 : index
    %981 = vector.load %arg1[%c0_1110, %c16, %c0_1111, %c0_1112] : memref<1x18x18x4xf32, #tpu.memory_space<vmem>>, vector<1x1x16x4xf32>
    %982 = vector.shape_cast %981 : vector<1x1x16x4xf32> to vector<16x4xf32>
    %983 = arith.truncf %982 : vector<16x4xf32> to vector<16x4xbf16>
    %c6_1113 = arith.constant 6 : index
    %c0_1114 = arith.constant 0 : index
    %c0_1115 = arith.constant 0 : index
    %984 = vector.load %arg2[%c6_1113, %c0_1114, %c0_1115] : memref<9x4x16xbf16, #tpu.memory_space<vmem>>, vector<1x4x16xbf16>
    %985 = vector.shape_cast %984 : vector<1x4x16xbf16> to vector<4x16xbf16>
    %cst_1116 = arith.constant dense<0.000000e+00> : vector<16x16xf32>
    %986 = tpu.matmul %983, %985, %cst_1116 {dimension_numbers = #tpu.dot_dimension_numbers<[1], [0], [0], [1], [0, 0, 1, 1], [], []>} : vector<16x4xbf16>, vector<4x16xbf16>, vector<16x16xf32> -> vector<16x16xf32>
    %987 = arith.addf %980, %986 : vector<16x16xf32>
    %c0_1117 = arith.constant 0 : index
    %c16_1118 = arith.constant 16 : index
    %c1_1119 = arith.constant 1 : index
    %c0_1120 = arith.constant 0 : index
    %988 = vector.load %arg1[%c0_1117, %c16_1118, %c1_1119, %c0_1120] : memref<1x18x18x4xf32, #tpu.memory_space<vmem>>, vector<1x1x16x4xf32>
    %989 = vector.shape_cast %988 : vector<1x1x16x4xf32> to vector<16x4xf32>
    %990 = arith.truncf %989 : vector<16x4xf32> to vector<16x4xbf16>
    %c7_1121 = arith.constant 7 : index
    %c0_1122 = arith.constant 0 : index
    %c0_1123 = arith.constant 0 : index
    %991 = vector.load %arg2[%c7_1121, %c0_1122, %c0_1123] : memref<9x4x16xbf16, #tpu.memory_space<vmem>>, vector<1x4x16xbf16>
    %992 = vector.shape_cast %991 : vector<1x4x16xbf16> to vector<4x16xbf16>
    %cst_1124 = arith.constant dense<0.000000e+00> : vector<16x16xf32>
    %993 = tpu.matmul %990, %992, %cst_1124 {dimension_numbers = #tpu.dot_dimension_numbers<[1], [0], [0], [1], [0, 0, 1, 1], [], []>} : vector<16x4xbf16>, vector<4x16xbf16>, vector<16x16xf32> -> vector<16x16xf32>
    %994 = arith.addf %987, %993 : vector<16x16xf32>
    %c0_1125 = arith.constant 0 : index
    %c16_1126 = arith.constant 16 : index
    %c2_1127 = arith.constant 2 : index
    %c0_1128 = arith.constant 0 : index
    %995 = vector.load %arg1[%c0_1125, %c16_1126, %c2_1127, %c0_1128] : memref<1x18x18x4xf32, #tpu.memory_space<vmem>>, vector<1x1x16x4xf32>
    %996 = vector.shape_cast %995 : vector<1x1x16x4xf32> to vector<16x4xf32>
    %997 = arith.truncf %996 : vector<16x4xf32> to vector<16x4xbf16>
    %c8_1129 = arith.constant 8 : index
    %c0_1130 = arith.constant 0 : index
    %c0_1131 = arith.constant 0 : index
    %998 = vector.load %arg2[%c8_1129, %c0_1130, %c0_1131] : memref<9x4x16xbf16, #tpu.memory_space<vmem>>, vector<1x4x16xbf16>
    %999 = vector.shape_cast %998 : vector<1x4x16xbf16> to vector<4x16xbf16>
    %cst_1132 = arith.constant dense<0.000000e+00> : vector<16x16xf32>
    %1000 = tpu.matmul %997, %999, %cst_1132 {dimension_numbers = #tpu.dot_dimension_numbers<[1], [0], [0], [1], [0, 0, 1, 1], [], []>} : vector<16x4xbf16>, vector<4x16xbf16>, vector<16x16xf32> -> vector<16x16xf32>
    %1001 = arith.addf %994, %1000 : vector<16x16xf32>
    %c0_1133 = arith.constant 0 : index
    %c14_1134 = arith.constant 14 : index
    %c0_1135 = arith.constant 0 : index
    %c0_1136 = arith.constant 0 : index
    %1002 = vector.load %arg3[%c0_1133, %c14_1134, %c0_1135, %c0_1136] : memref<1x16x16x16xf32, #tpu.memory_space<vmem>>, vector<1x1x16x16xf32>
    %1003 = vector.shape_cast %1002 : vector<1x1x16x16xf32> to vector<16x16xf32>
    %1004 = vector.shape_cast %1001 : vector<16x16xf32> to vector<1x1x16x16xf32>
    tpu.vector_store %arg3[%c0_1133, %c14_1134, %c0_1135, %c0_1136], %1004 {strides = array<i32>} : memref<1x16x16x16xf32, #tpu.memory_space<vmem>>, vector<1x1x16x16xf32>,
    %cst_1137 = arith.constant 0.000000e+00 : f32
    %1005 = vector.broadcast %cst_1137 : f32 to vector<16x16xf32>
    %c0_1138 = arith.constant 0 : index
    %c15_1139 = arith.constant 15 : index
    %c0_1140 = arith.constant 0 : index
    %c0_1141 = arith.constant 0 : index
    %1006 = vector.load %arg1[%c0_1138, %c15_1139, %c0_1140, %c0_1141] : memref<1x18x18x4xf32, #tpu.memory_space<vmem>>, vector<1x1x16x4xf32>
    %1007 = vector.shape_cast %1006 : vector<1x1x16x4xf32> to vector<16x4xf32>
    %1008 = arith.truncf %1007 : vector<16x4xf32> to vector<16x4xbf16>
    %c0_1142 = arith.constant 0 : index
    %c0_1143 = arith.constant 0 : index
    %c0_1144 = arith.constant 0 : index
    %1009 = vector.load %arg2[%c0_1142, %c0_1143, %c0_1144] : memref<9x4x16xbf16, #tpu.memory_space<vmem>>, vector<1x4x16xbf16>
    %1010 = vector.shape_cast %1009 : vector<1x4x16xbf16> to vector<4x16xbf16>
    %cst_1145 = arith.constant dense<0.000000e+00> : vector<16x16xf32>
    %1011 = tpu.matmul %1008, %1010, %cst_1145 {dimension_numbers = #tpu.dot_dimension_numbers<[1], [0], [0], [1], [0, 0, 1, 1], [], []>} : vector<16x4xbf16>, vector<4x16xbf16>, vector<16x16xf32> -> vector<16x16xf32>
    %1012 = arith.addf %1005, %1011 : vector<16x16xf32>
    %c0_1146 = arith.constant 0 : index
    %c15_1147 = arith.constant 15 : index
    %c1_1148 = arith.constant 1 : index
    %c0_1149 = arith.constant 0 : index
    %1013 = vector.load %arg1[%c0_1146, %c15_1147, %c1_1148, %c0_1149] : memref<1x18x18x4xf32, #tpu.memory_space<vmem>>, vector<1x1x16x4xf32>
    %1014 = vector.shape_cast %1013 : vector<1x1x16x4xf32> to vector<16x4xf32>
    %1015 = arith.truncf %1014 : vector<16x4xf32> to vector<16x4xbf16>
    %c1_1150 = arith.constant 1 : index
    %c0_1151 = arith.constant 0 : index
    %c0_1152 = arith.constant 0 : index
    %1016 = vector.load %arg2[%c1_1150, %c0_1151, %c0_1152] : memref<9x4x16xbf16, #tpu.memory_space<vmem>>, vector<1x4x16xbf16>
    %1017 = vector.shape_cast %1016 : vector<1x4x16xbf16> to vector<4x16xbf16>
    %cst_1153 = arith.constant dense<0.000000e+00> : vector<16x16xf32>
    %1018 = tpu.matmul %1015, %1017, %cst_1153 {dimension_numbers = #tpu.dot_dimension_numbers<[1], [0], [0], [1], [0, 0, 1, 1], [], []>} : vector<16x4xbf16>, vector<4x16xbf16>, vector<16x16xf32> -> vector<16x16xf32>
    %1019 = arith.addf %1012, %1018 : vector<16x16xf32>
    %c0_1154 = arith.constant 0 : index
    %c15_1155 = arith.constant 15 : index
    %c2_1156 = arith.constant 2 : index
    %c0_1157 = arith.constant 0 : index
    %1020 = vector.load %arg1[%c0_1154, %c15_1155, %c2_1156, %c0_1157] : memref<1x18x18x4xf32, #tpu.memory_space<vmem>>, vector<1x1x16x4xf32>
    %1021 = vector.shape_cast %1020 : vector<1x1x16x4xf32> to vector<16x4xf32>
    %1022 = arith.truncf %1021 : vector<16x4xf32> to vector<16x4xbf16>
    %c2_1158 = arith.constant 2 : index
    %c0_1159 = arith.constant 0 : index
    %c0_1160 = arith.constant 0 : index
    %1023 = vector.load %arg2[%c2_1158, %c0_1159, %c0_1160] : memref<9x4x16xbf16, #tpu.memory_space<vmem>>, vector<1x4x16xbf16>
    %1024 = vector.shape_cast %1023 : vector<1x4x16xbf16> to vector<4x16xbf16>
    %cst_1161 = arith.constant dense<0.000000e+00> : vector<16x16xf32>
    %1025 = tpu.matmul %1022, %1024, %cst_1161 {dimension_numbers = #tpu.dot_dimension_numbers<[1], [0], [0], [1], [0, 0, 1, 1], [], []>} : vector<16x4xbf16>, vector<4x16xbf16>, vector<16x16xf32> -> vector<16x16xf32>
    %1026 = arith.addf %1019, %1025 : vector<16x16xf32>
    %c0_1162 = arith.constant 0 : index
    %c16_1163 = arith.constant 16 : index
    %c0_1164 = arith.constant 0 : index
    %c0_1165 = arith.constant 0 : index
    %1027 = vector.load %arg1[%c0_1162, %c16_1163, %c0_1164, %c0_1165] : memref<1x18x18x4xf32, #tpu.memory_space<vmem>>, vector<1x1x16x4xf32>
    %1028 = vector.shape_cast %1027 : vector<1x1x16x4xf32> to vector<16x4xf32>
    %1029 = arith.truncf %1028 : vector<16x4xf32> to vector<16x4xbf16>
    %c3_1166 = arith.constant 3 : index
    %c0_1167 = arith.constant 0 : index
    %c0_1168 = arith.constant 0 : index
    %1030 = vector.load %arg2[%c3_1166, %c0_1167, %c0_1168] : memref<9x4x16xbf16, #tpu.memory_space<vmem>>, vector<1x4x16xbf16>
    %1031 = vector.shape_cast %1030 : vector<1x4x16xbf16> to vector<4x16xbf16>
    %cst_1169 = arith.constant dense<0.000000e+00> : vector<16x16xf32>
    %1032 = tpu.matmul %1029, %1031, %cst_1169 {dimension_numbers = #tpu.dot_dimension_numbers<[1], [0], [0], [1], [0, 0, 1, 1], [], []>} : vector<16x4xbf16>, vector<4x16xbf16>, vector<16x16xf32> -> vector<16x16xf32>
    %1033 = arith.addf %1026, %1032 : vector<16x16xf32>
    %c0_1170 = arith.constant 0 : index
    %c16_1171 = arith.constant 16 : index
    %c1_1172 = arith.constant 1 : index
    %c0_1173 = arith.constant 0 : index
    %1034 = vector.load %arg1[%c0_1170, %c16_1171, %c1_1172, %c0_1173] : memref<1x18x18x4xf32, #tpu.memory_space<vmem>>, vector<1x1x16x4xf32>
    %1035 = vector.shape_cast %1034 : vector<1x1x16x4xf32> to vector<16x4xf32>
    %1036 = arith.truncf %1035 : vector<16x4xf32> to vector<16x4xbf16>
    %c4_1174 = arith.constant 4 : index
    %c0_1175 = arith.constant 0 : index
    %c0_1176 = arith.constant 0 : index
    %1037 = vector.load %arg2[%c4_1174, %c0_1175, %c0_1176] : memref<9x4x16xbf16, #tpu.memory_space<vmem>>, vector<1x4x16xbf16>
    %1038 = vector.shape_cast %1037 : vector<1x4x16xbf16> to vector<4x16xbf16>
    %cst_1177 = arith.constant dense<0.000000e+00> : vector<16x16xf32>
    %1039 = tpu.matmul %1036, %1038, %cst_1177 {dimension_numbers = #tpu.dot_dimension_numbers<[1], [0], [0], [1], [0, 0, 1, 1], [], []>} : vector<16x4xbf16>, vector<4x16xbf16>, vector<16x16xf32> -> vector<16x16xf32>
    %1040 = arith.addf %1033, %1039 : vector<16x16xf32>
    %c0_1178 = arith.constant 0 : index
    %c16_1179 = arith.constant 16 : index
    %c2_1180 = arith.constant 2 : index
    %c0_1181 = arith.constant 0 : index
    %1041 = vector.load %arg1[%c0_1178, %c16_1179, %c2_1180, %c0_1181] : memref<1x18x18x4xf32, #tpu.memory_space<vmem>>, vector<1x1x16x4xf32>
    %1042 = vector.shape_cast %1041 : vector<1x1x16x4xf32> to vector<16x4xf32>
    %1043 = arith.truncf %1042 : vector<16x4xf32> to vector<16x4xbf16>
    %c5_1182 = arith.constant 5 : index
    %c0_1183 = arith.constant 0 : index
    %c0_1184 = arith.constant 0 : index
    %1044 = vector.load %arg2[%c5_1182, %c0_1183, %c0_1184] : memref<9x4x16xbf16, #tpu.memory_space<vmem>>, vector<1x4x16xbf16>
    %1045 = vector.shape_cast %1044 : vector<1x4x16xbf16> to vector<4x16xbf16>
    %cst_1185 = arith.constant dense<0.000000e+00> : vector<16x16xf32>
    %1046 = tpu.matmul %1043, %1045, %cst_1185 {dimension_numbers = #tpu.dot_dimension_numbers<[1], [0], [0], [1], [0, 0, 1, 1], [], []>} : vector<16x4xbf16>, vector<4x16xbf16>, vector<16x16xf32> -> vector<16x16xf32>
    %1047 = arith.addf %1040, %1046 : vector<16x16xf32>
    %c0_1186 = arith.constant 0 : index
    %c17 = arith.constant 17 : index
    %c0_1187 = arith.constant 0 : index
    %c0_1188 = arith.constant 0 : index
    %1048 = vector.load %arg1[%c0_1186, %c17, %c0_1187, %c0_1188] : memref<1x18x18x4xf32, #tpu.memory_space<vmem>>, vector<1x1x16x4xf32>
    %1049 = vector.shape_cast %1048 : vector<1x1x16x4xf32> to vector<16x4xf32>
    %1050 = arith.truncf %1049 : vector<16x4xf32> to vector<16x4xbf16>
    %c6_1189 = arith.constant 6 : index
    %c0_1190 = arith.constant 0 : index
    %c0_1191 = arith.constant 0 : index
    %1051 = vector.load %arg2[%c6_1189, %c0_1190, %c0_1191] : memref<9x4x16xbf16, #tpu.memory_space<vmem>>, vector<1x4x16xbf16>
    %1052 = vector.shape_cast %1051 : vector<1x4x16xbf16> to vector<4x16xbf16>
    %cst_1192 = arith.constant dense<0.000000e+00> : vector<16x16xf32>
    %1053 = tpu.matmul %1050, %1052, %cst_1192 {dimension_numbers = #tpu.dot_dimension_numbers<[1], [0], [0], [1], [0, 0, 1, 1], [], []>} : vector<16x4xbf16>, vector<4x16xbf16>, vector<16x16xf32> -> vector<16x16xf32>
    %1054 = arith.addf %1047, %1053 : vector<16x16xf32>
    %c0_1193 = arith.constant 0 : index
    %c17_1194 = arith.constant 17 : index
    %c1_1195 = arith.constant 1 : index
    %c0_1196 = arith.constant 0 : index
    %1055 = vector.load %arg1[%c0_1193, %c17_1194, %c1_1195, %c0_1196] : memref<1x18x18x4xf32, #tpu.memory_space<vmem>>, vector<1x1x16x4xf32>
    %1056 = vector.shape_cast %1055 : vector<1x1x16x4xf32> to vector<16x4xf32>
    %1057 = arith.truncf %1056 : vector<16x4xf32> to vector<16x4xbf16>
    %c7_1197 = arith.constant 7 : index
    %c0_1198 = arith.constant 0 : index
    %c0_1199 = arith.constant 0 : index
    %1058 = vector.load %arg2[%c7_1197, %c0_1198, %c0_1199] : memref<9x4x16xbf16, #tpu.memory_space<vmem>>, vector<1x4x16xbf16>
    %1059 = vector.shape_cast %1058 : vector<1x4x16xbf16> to vector<4x16xbf16>
    %cst_1200 = arith.constant dense<0.000000e+00> : vector<16x16xf32>
    %1060 = tpu.matmul %1057, %1059, %cst_1200 {dimension_numbers = #tpu.dot_dimension_numbers<[1], [0], [0], [1], [0, 0, 1, 1], [], []>} : vector<16x4xbf16>, vector<4x16xbf16>, vector<16x16xf32> -> vector<16x16xf32>
    %1061 = arith.addf %1054, %1060 : vector<16x16xf32>
    %c0_1201 = arith.constant 0 : index
    %c17_1202 = arith.constant 17 : index
    %c2_1203 = arith.constant 2 : index
    %c0_1204 = arith.constant 0 : index
    %1062 = vector.load %arg1[%c0_1201, %c17_1202, %c2_1203, %c0_1204] : memref<1x18x18x4xf32, #tpu.memory_space<vmem>>, vector<1x1x16x4xf32>
    %1063 = vector.shape_cast %1062 : vector<1x1x16x4xf32> to vector<16x4xf32>
    %1064 = arith.truncf %1063 : vector<16x4xf32> to vector<16x4xbf16>
    %c8_1205 = arith.constant 8 : index
    %c0_1206 = arith.constant 0 : index
    %c0_1207 = arith.constant 0 : index
    %1065 = vector.load %arg2[%c8_1205, %c0_1206, %c0_1207] : memref<9x4x16xbf16, #tpu.memory_space<vmem>>, vector<1x4x16xbf16>
    %1066 = vector.shape_cast %1065 : vector<1x4x16xbf16> to vector<4x16xbf16>
    %cst_1208 = arith.constant dense<0.000000e+00> : vector<16x16xf32>
    %1067 = tpu.matmul %1064, %1066, %cst_1208 {dimension_numbers = #tpu.dot_dimension_numbers<[1], [0], [0], [1], [0, 0, 1, 1], [], []>} : vector<16x4xbf16>, vector<4x16xbf16>, vector<16x16xf32> -> vector<16x16xf32>
    %1068 = arith.addf %1061, %1067 : vector<16x16xf32>
    %c0_1209 = arith.constant 0 : index
    %c15_1210 = arith.constant 15 : index
    %c0_1211 = arith.constant 0 : index
    %c0_1212 = arith.constant 0 : index
    %1069 = vector.load %arg3[%c0_1209, %c15_1210, %c0_1211, %c0_1212] : memref<1x16x16x16xf32, #tpu.memory_space<vmem>>, vector<1x1x16x16xf32>
    %1070 = vector.shape_cast %1069 : vector<1x1x16x16xf32> to vector<16x16xf32>
    %1071 = vector.shape_cast %1068 : vector<16x16xf32> to vector<1x1x16x16xf32>
    tpu.vector_store %arg3[%c0_1209, %c15_1210, %c0_1211, %c0_1212], %1071 {strides = array<i32>} : memref<1x16x16x16xf32, #tpu.memory_space<vmem>>, vector<1x1x16x16xf32>,
    return
  }
  func.func @transform_0(%arg0: i32) -> (i32, i32, i32, i32) {
    %c0_i32 = arith.constant 0 : i32
    %c0_i32_0 = arith.constant 0 : i32
    %c0_i32_1 = arith.constant 0 : i32
    %c0_i32_2 = arith.constant 0 : i32
    return %arg0, %c0_i32, %c0_i32_0, %c0_i32_1 : i32, i32, i32, i32
  }
  func.func @transform_1(%arg0: i32) -> (i32, i32, i32) {
    %c0_i32 = arith.constant 0 : i32
    %c0_i32_0 = arith.constant 0 : i32
    %c0_i32_1 = arith.constant 0 : i32
    %c0_i32_2 = arith.constant 0 : i32
    return %c0_i32, %c0_i32_0, %c0_i32_1 : i32, i32, i32
  }
  func.func @transform_2(%arg0: i32) -> (i32, i32, i32, i32) {
    %c0_i32 = arith.constant 0 : i32
    %c0_i32_0 = arith.constant 0 : i32
    %c0_i32_1 = arith.constant 0 : i32
    %c0_i32_2 = arith.constant 0 : i32
    return %arg0, %c0_i32, %c0_i32_0, %c0_i32_1 : i32, i32, i32, i32
  }
}

</mosaic_0001>

<bundles_post_ra>
// kernel: tpu_custom_call.1
= control target key start
LH: loop header
LB: loop body
LE: loop exit
PB: predicated region body
PF: predicated region fallthrough
CT: control target
= control target key end

     0   :  { %7 = vsyncpa [#allocation3], 0  ;;  %s5890_s0 = inlined_call_operand.vmem [shape: f32[2,18,18,4], index: 0, kind: input, shape index: {}]   ;;  %s5891_s1 = inlined_call_operand.vmem [shape: bf16[9,4,16], index: 1, kind: input, shape index: {}]   ;;  %s5892_s2 = inlined_call_operand.hbm [shape: f32[2,16,16,16], index: 2, kind: output, shape index: {}]  }
   0x1   :  { %9 = vsyncpa [#allocation3 + $0x1], 0  ;;  %s4695_s9 = smov 0   ;;  %s4697_s10 = smov 0  }
   0x2   :  { %s4699_s11 = smov 0   ;;  %s4701_s12 = smov 0  }
   0x3 LB: > { %s4716_s13 = sadd.s32 4294967295, %s4676_s12   ;;  %s3976_s14 = sadd.s32 4294967294, %s4676_s12   ;;  %s4676_s12 = sphi %s4701_s12, %s5898_s12   ;;  %s4672_s11 = sphi %s4699_s11, %s5897_s11   ;;  %s4668_s10 = sphi %s4697_s10, %s5896_s10   ;;  %s4664_s9 = sphi %s4695_s9, %s5895_s9  }
   0x4   : > { %s4720_s15 = sadd.s32 1, %s4676_s12   ;;  %s69_s16 = sadd.s32 1, %s4672_s11 }
   0x5   : > { %s66_s17 = ssub.s32 %s4676_s12, %s4720_s15  ;;  %p79_p0 = scmp.ne.s32.totalorder %s4672_s11, %s4668_s10 }
   0x6   : > { %p67_p1 = scmp.eq.s32.totalorder %s66_s17, 0  ;;  %p80_p2 = scmp.eq.s32.totalorder %s4716_s13, 1 }
   0x7   : > { %p85_p3 = scmp.ne.s32.totalorder %s4668_s10, %s4664_s9  ;;  %p86_p4 = scmp.eq.s32.totalorder %s3976_s14, 1 }
   0x8   : > { %s4731_s18 = scalar_select %p67_p1, %s4672_s11, %s69_s16  }
   0x9   : > { %p4733_p5 = por %p80_p2, %p79_p0  ;;  %p4737_p6 = por %p86_p4, %p85_p3 }
   0xa   : > { %p3979_p7 = scmp.ge.s32.totalorder %s4676_s12, 1  ;;  %p115_p8 = scmp.lt.s32.totalorder %s4676_s12, 3 }
   0xc   : > { %p116_p9 = pnand %p3979_p7, %p115_p8 }
   0xd   : > { %p137_p10 = scmp.lt.s32.totalorder (!%p116_p9), %s4716_s13, 1  ;;  %s134_s3 = sand.u32 (!%p116_p9), 1, %s4668_s10  }
   0xe   : > { %119 = sbr.rel (%p116_p9) target bundleno = 739 (0x2e3), region = 28  ;;  %s3980_s4 = sshll.u32 (!%p116_p9), %s134_s3, 8 }
   0xf   : > { %s5092_s22 = scalar_lea.vmem (!%p116_p9), [#allocation2], %s3980_s4  ;;  %s4634_s25 = scalar_lea.hbm (!%p116_p9), %s5892_s2, 512 }
  0x13   : > { %v3982_v0 = vld [vmem:[%s5891_s1 + $0x2] sm:$0x3]  ;;  %vm156_vm0 = vcmask 1041408   ;;  %v146_v1 = vld [vmem:[%s5891_s1] sm:$0x3]  ;;  %s138_s29 = scalar_select %p137_p10, %s4716_s13, 1 }
  0x14   : > { %v158_v2 = vsel %vm156_vm0, %v3982_v0, 0  ;;  %v178_v3 = vsel %vm156_vm0, %v146_v1, 0  ;;  %v3985_v4 = vld [vmem:[%s5891_s1 + $0x4] sm:$0x3]  ;;  %v3989_v5 = vld [vmem:[%s5891_s1 + $0x6] sm:$0x3] }
  0x15   : > { %167 = vmatpush.bf16.msra.mxu0 %v158_v2  ;;  %187 = vmatpush.bf16.msra.mxu1 %v178_v3  ;;  %v203_v6 = vsel %vm156_vm0, %v3985_v4, 0  ;;  %v231_v7 = vsel %vm156_vm0, %v3989_v5, 0  ;;  %v4001_v8 = vld [vmem:[%s5891_s1 + $0xc] sm:$0x3]  ;;  %v3993_v10 = vld [vmem:[%s5891_s1 + $0x8] sm:$0x3] }
  0x16   : > { %212 = vmatpush.bf16.msra.mxu2 %v203_v6  ;;  %240 = vmatpush.bf16.msra.mxu3 %v231_v7  ;;  %v313_v9 = vsel %vm156_vm0, %v4001_v8, 0  ;;  %v4005_v11 = vld [vmem:[%s5891_s1 + $0xe] sm:$0x3]  ;;  %s4572_s8 = smul.u32 432, %s138_s29  ;;  %v258_v12 = vsel %vm156_vm0, %v3993_v10, 0  ;;  %vm152_vm1 = vcmask 31744  }
  0x17   : > { %v340_v13 = vsel %vm156_vm0, %v4005_v11, 0  ;;  %v3997_v14 = vld [vmem:[%s5891_s1 + $0xa] sm:$0x3]  ;;  %v391_v16 = vld [vmem:[%s5891_s1] sm:$0x3]  ;;  %vm385_vm2 = vcmask 130048  }
  0x18   : > { %v285_v15 = vsel %vm156_vm0, %v3997_v14, 0  ;;  %s4783_s24 = scalar_lea.vmem %s5890_s0, %s4572_s8  ;;  %v4009_v17 = vld [vmem:[%s5891_s1 + $0x10] sm:$0x3]  ;;  %v4020_v18 = vld [vmem:[%s5891_s1 + $0x4] sm:$0x3]  ;;  %v420_v31 = vsel %vm156_vm0, %v391_v16, 0 }
  0x19   : > { %267 = vmatpush.bf16.msrb.mxu0 %v258_v12  ;;  %294 = vmatpush.bf16.msrb.mxu1 %v285_v15  ;;  %v4015_v19 = vld [vmem:[%s5891_s1 + $0x2] sm:$0x3]  ;;  %v148_v21 = vld [vmem:[%s4783_s24 + $0x9] sm:$0xff]  ;;  %v3987_v29 = vld [vmem:[%s4783_s24 + $0x18] sm:$0xff]  ;;  %v367_v33 = vsel %vm156_vm0, %v4009_v17, 0  ;;  %v444_v34 = vsel %vm156_vm0, %v4020_v18, 0 }
  0x1a   : > { %322 = vmatpush.bf16.msrb.mxu2 %v313_v9  ;;  %349 = vmatpush.bf16.msrb.mxu3 %v340_v13  ;;  %v147_v20 = vld [vmem:[%s4783_s24 + $0x1] sm:$0xff]  ;;  %v195_v26 = vld [vmem:[%s4783_s24 + $0xa] sm:$0xff]  ;;  %v400_v35 = vsel %vm156_vm0, %v4015_v19, 0  ;;  %v3991_v36 = vld [vmem:[%s4783_s24 + $0x19] sm:$0xff]  ;;  %s3911_s8 = sshll.u32 %s5092_s22, 4  ;;  %s3912_s8 = int_to_ptr.vmem [resolvable:$true] %s3911_s8 }
  0x1b   : > { %v143_v22 = vld [vmem:[%s4783_s24] sm:$0xff]  ;;  %v149_v23 = vpack.c.bf16 %v148_v21, %v147_v20  ;;  %v144_v24 = vld [vmem:[%s4783_s24 + $0x8] sm:$0xff]  ;;  %v3999_v40 = vld [vmem:[%s4783_s24 + $0x30] sm:$0xff] }
  0x1c   : > { %v194_v25 = vld [vmem:[%s4783_s24 + $0x2] sm:$0xff]  ;;  %v145_v27 = vpack.c.bf16 %v144_v24, %v143_v22  ;;  %v3995_v38 = vld [vmem:[%s4783_s24 + $0x1a] sm:$0xff]  ;;  %v4003_v42 = vld [vmem:[%s4783_s24 + $0x31] sm:$0xff] }
  0x1d   : > { %v196_v28 = vpack.c.bf16 %v195_v26, %v194_v25  ;;  %v3988_v30 = vld [vmem:[%s4783_s24 + $0x20] sm:$0xff]  ;;  %3983 = vmatmul.msk.bf16.vlgmr.msra.gmra.mxu0 %vm152_vm1, %v149_v23  ;;  %v4000_v41 = vld [vmem:[%s4783_s24 + $0x38] sm:$0xff]  ;;  %v4032_v45 = vld [vmem:[%s5891_s1 + $0xa] sm:$0x3] }
  0x1e   : > { %v224_v32 = vpack.c.bf16 %v3988_v30, %v3987_v29  ;;  %3984 = vmatmul.msk.bf16.vlgmr.msra.gmra.mxu1 %vm152_vm1, %v145_v27  ;;  %376 = vmatpush.bf16.msra.mxu0 %v367_v33  ;;  %v3992_v37 = vld [vmem:[%s4783_s24 + $0x21] sm:$0xff]  ;;  %v4004_v43 = vld [vmem:[%s4783_s24 + $0x39] sm:$0xff]  ;;  %v4821_v47 = vpack.c.bf16 %v4000_v41, %v3999_v40  ;;  %v4036_v49 = vld [vmem:[%s5891_s1 + $0xc] sm:$0x3]  ;;  %v522_v52 = vsel %vm156_vm0, %v4032_v45, 0 }
  0x1f   : > { %3986 = vmatmul.msk.bf16.vlgmr.msra.gmra.mxu2 %vm152_vm1, %v196_v28  ;;  %409 = vmatpush.bf16.msra.mxu1 %v400_v35  ;;  %v3996_v39 = vld [vmem:[%s4783_s24 + $0x22] sm:$0xff]  ;;  %v251_v44 = vpack.c.bf16 %v3992_v37, %v3991_v36  ;;  %v4829_v50 = vpack.c.bf16 %v4004_v43, %v4003_v42  ;;  %v549_v54 = vsel %vm156_vm0, %v4036_v49, 0  ;;  %v4007_v56 = vld [vmem:[%s4783_s24 + $0x32] sm:$0xff]  ;;  %v4008_v57 = vld [vmem:[%s4783_s24 + $0x3a] sm:$0xff] }
  0x20   : > { %3990 = vmatmul.msk.bf16.vlgmr.msra.gmra.mxu3 %vm152_vm1, %v224_v32  ;;  %429 = vmatpush.bf16.msra.mxu2 %v420_v31  ;;  %v278_v46 = vpack.c.bf16 %v3996_v39, %v3995_v38  ;;  %v4024_v48 = vld [vmem:[%s5891_s1 + $0x6] sm:$0x3]  ;;  %v4028_v51 = vld [vmem:[%s5891_s1 + $0x8] sm:$0x3]  ;;  %v4846_v58 = vpack.c.bf16 %v4008_v57, %v4007_v56  ;;  %v4052_v59 = vld [vmem:[%s5891_s1 + $0x2] sm:$0x3] }
  0x21   : > { %453 = vmatpush.bf16.msra.mxu3 %v444_v34  ;;  %v470_v53 = vsel %vm156_vm0, %v4024_v48, 0  ;;  %v496_v55 = vsel %vm156_vm0, %v4028_v51, 0  ;;  %v4040_v60 = vld [vmem:[%s5891_s1 + $0xe] sm:$0x3]  ;;  %v625_v61 = vld [vmem:[%s5891_s1] sm:$0x3] }
  0x22   : > { %v4044_v62 = vld [vmem:[%s5891_s1 + $0x10] sm:$0x3]  ;;  %v634_v63 = vsel %vm156_vm0, %v4052_v59, 0  ;;  %v575_v0 = vsel %vm156_vm0, %v4040_v60, 0  ;;  %v654_v1 = vsel %vm156_vm0, %v625_v61, 0  ;;  %v4034_v3 = vld [vmem:[%s4783_s24 + $0x48] sm:$0xff] }
  0x23   : > { %v601_v2 = vsel %vm156_vm0, %v4044_v62, 0  ;;  %v4035_v4 = vld [vmem:[%s4783_s24 + $0x50] sm:$0xff]  ;;  %v4065_v5 = vld [vmem:[%s5891_s1 + $0x8] sm:$0x3]  ;;  %v4057_v6 = vld [vmem:[%s5891_s1 + $0x4] sm:$0x3] }
  0x24   : > { %v4069_v7 = vld [vmem:[%s5891_s1 + $0xa] sm:$0x3]  ;;  %v4880_v8 = vpack.c.bf16 %v4035_v4, %v4034_v3  ;;  %v4061_v9 = vld [vmem:[%s5891_s1 + $0x6] sm:$0x3]  ;;  %v730_v10 = vsel %vm156_vm0, %v4065_v5, 0  ;;  %v678_v11 = vsel %vm156_vm0, %v4057_v6, 0 }
  0x25   : > { %v756_v12 = vsel %vm156_vm0, %v4069_v7, 0  ;;  %v704_v13 = vsel %vm156_vm0, %v4061_v9, 0  ;;  %v4038_v14 = vld [vmem:[%s4783_s24 + $0x49] sm:$0xff]  ;;  %v4039_v15 = vld [vmem:[%s4783_s24 + $0x51] sm:$0xff]  ;;  %v4089_v22 = vld [vmem:[%s5891_s1 + $0x2] sm:$0x3] }
  0x26   : > { %v4042_v16 = vld [vmem:[%s4783_s24 + $0x4a] sm:$0xff]  ;;  %v4043_v17 = vld [vmem:[%s4783_s24 + $0x52] sm:$0xff]  ;;  %v569_v18 = vpack.c.bf16 %v4039_v15, %v4038_v14  ;;  %v868_v26 = vsel %vm156_vm0, %v4089_v22, 0  ;;  %v4098_v28 = vld [vmem:[%s5891_s1 + $0x6] sm:$0x3] }
  0x27   : > { %v4081_v19 = vld [vmem:[%s5891_s1 + $0x10] sm:$0x3]  ;;  %v4904_v20 = vpack.c.bf16 %v4043_v17, %v4042_v16  ;;  %v4073_v21 = vld [vmem:[%s5891_s1 + $0xc] sm:$0x3]  ;;  %v4077_v23 = vld [vmem:[%s5891_s1 + $0xe] sm:$0x3] }
  0x28   : > { %v835_v24 = vsel %vm156_vm0, %v4081_v19, 0  ;;  %v783_v25 = vsel %vm156_vm0, %v4073_v21, 0  ;;  %v809_v27 = vsel %vm156_vm0, %v4077_v23, 0  ;;  %v859_v29 = vld [vmem:[%s5891_s1] sm:$0x3]  ;;  %v4072_v37 = vld [vmem:[%s4783_s24 + $0x68] sm:$0xff] }
  0x29   : > { %v4102_v30 = vld [vmem:[%s5891_s1 + $0x8] sm:$0x3]  ;;  %v4094_v31 = vld [vmem:[%s5891_s1 + $0x4] sm:$0x3]  ;;  %v888_v33 = vsel %vm156_vm0, %v859_v29, 0  ;;  %v4080_v41 = vld [vmem:[%s4783_s24 + $0x6a] sm:$0xff] }
  0x2a   : > { %v964_v34 = vsel %vm156_vm0, %v4102_v30, 0  ;;  %v912_v35 = vsel %vm156_vm0, %v4094_v31, 0  ;;  %v4071_v36 = vld [vmem:[%s4783_s24 + $0x60] sm:$0xff]  ;;  %v4076_v39 = vld [vmem:[%s4783_s24 + $0x69] sm:$0xff]  ;;  %v4108_v61 = vld [vmem:[%s4783_s24 + $0x78] sm:$0xff] }
  0x2b   : > { %v4075_v38 = vld [vmem:[%s4783_s24 + $0x61] sm:$0xff]  ;;  %v4955_v42 = vpack.c.bf16 %v4072_v37, %v4071_v36  ;;  %v4114_v43 = vld [vmem:[%s5891_s1 + $0xe] sm:$0x3]  ;;  %v4110_v48 = vld [vmem:[%s5891_s1 + $0xc] sm:$0x3] }
  0x2c   : > { %v4079_v40 = vld [vmem:[%s4783_s24 + $0x62] sm:$0xff]  ;;  %v1043_v49 = vsel %vm156_vm0, %v4114_v43, 0  ;;  %v1093_v56 = vld [vmem:[%s5891_s1] sm:$0x3]  ;;  %v4147_v3 = vld [vmem:[%s5891_s1 + $0xc] sm:$0x3] }
  0x2d   : > { %3994 = vmatmul.msk.bf16.vlgmr.msrb.gmra.mxu0 %vm152_vm1, %v251_v44  ;;  %v4962_v45 = vpack.c.bf16 %v4080_v41, %v4079_v40  ;;  %v1122_v60 = vsel %vm156_vm0, %v1093_v56, 0  ;;  %v4109_v62 = vld [vmem:[%s4783_s24 + $0x80] sm:$0xff]  ;;  %v4139_v7 = vld [vmem:[%s5891_s1 + $0x8] sm:$0x3] }
  0x2e   : > { %3998 = vmatmul.msk.bf16.vlgmr.msrb.gmra.mxu1 %vm152_vm1, %v278_v46  ;;  %479 = vmatpush.bf16.msrb.mxu0 %v470_v53  ;;  %v4131_v53 = vld [vmem:[%s5891_s1 + $0x4] sm:$0x3]  ;;  %v5017_v5 = vpack.c.bf16 %v4109_v62, %v4108_v61  ;;  %v1327_v23 = vld [vmem:[%s5891_s1] sm:$0x3]  ;;  %v4163_v29 = vld [vmem:[%s5891_s1 + $0x2] sm:$0x3] }
  0x2f   : > { %4002 = vmatmul.msk.bf16.vlgmr.msrb.gmra.mxu2 %vm152_vm1, %v4821_v47  ;;  %505 = vmatpush.bf16.msrb.mxu1 %v496_v55  ;;  %v4135_v55 = vld [vmem:[%s5891_s1 + $0x6] sm:$0x3]  ;;  %v1146_v57 = vsel %vm156_vm0, %v4131_v53, 0  ;;  %v1356_v30 = vsel %vm156_vm0, %v1327_v23, 0  ;;  %v4176_v62 = vld [vmem:[%s5891_s1 + $0x8] sm:$0x3] }
  0x30   : > { %4006 = vmatmul.msk.bf16.vlgmr.msrb.gmra.mxu3 %vm152_vm1, %v4829_v50  ;;  %531 = vmatpush.bf16.msrb.mxu2 %v522_v52  ;;  %v1017_v52 = vsel %vm156_vm0, %v4110_v48, 0  ;;  %v1172_v59 = vsel %vm156_vm0, %v4135_v55, 0  ;;  %v4149_v48 = vld [vmem:[%s4783_s24 + $0x91] sm:$0xff]  ;;  %v4172_v56 = vld [vmem:[%s5891_s1 + $0x6] sm:$0x3] }
  0x31   : > { %558 = vmatpush.bf16.msrb.mxu3 %v549_v54  ;;  %v4126_v54 = vld [vmem:[%s5891_s1 + $0x2] sm:$0x3] }
  0x3d   : > { %4010 = vmatmul.msk.bf16.vlgmr.msra.gmra.mxu0 %vm152_vm1, %v4846_v58 }
  0x3e   : > { %4016 = vmatmul.msk.bf16.vlgmr.msra.gmra.mxu1 %vm152_vm1, %v251_v44  ;;  %584 = vmatpush.bf16.msra.mxu0 %v575_v0  ;;  %v4960_v44 = vpack.c.bf16 %v4076_v39, %v4075_v38  ;;  %v4113_v0 = vld [vmem:[%s4783_s24 + $0x81] sm:$0xff] }
  0x3f   : > { %4017 = vmatmul.msk.bf16.vlgmr.msra.gmra.mxu2 %vm152_vm1, %v224_v32  ;;  %610 = vmatpush.bf16.msra.mxu1 %v601_v2  ;;  %v938_v32 = vsel %vm156_vm0, %v4098_v28, 0  ;;  %v4117_v2 = vld [vmem:[%s4783_s24 + $0x82] sm:$0xff] }
  0x40   : > { %4021 = vmatmul.msk.bf16.vlgmr.msra.gmra.mxu3 %vm152_vm1, %v278_v46  ;;  %643 = vmatpush.bf16.msra.mxu2 %v634_v63  ;;  %v4106_v46 = vld [vmem:[%s5891_s1 + $0xa] sm:$0x3]  ;;  %v4112_v63 = vld [vmem:[%s4783_s24 + $0x79] sm:$0xff] }
  0x41   : > { %663 = vmatpush.bf16.msra.mxu3 %v654_v1  ;;  %v4116_v1 = vld [vmem:[%s4783_s24 + $0x7a] sm:$0xff]  ;;  %v5019_v6 = vpack.c.bf16 %v4113_v0, %v4112_v63 }
  0x4d   : > { %4025 = vmatmul.msk.bf16.vlgmr.msrb.gmra.mxu0 %vm152_vm1, %v4821_v47 }
  0x4e   : > { %4029 = vmatmul.msk.bf16.vlgmr.msrb.gmra.mxu1 %vm152_vm1, %v4829_v50  ;;  %687 = vmatpush.bf16.msrb.mxu0 %v678_v11  ;;  %v4143_v11 = vld [vmem:[%s5891_s1 + $0xa] sm:$0x3] }
  0x4f   : > { %4033 = vmatmul.msk.bf16.vlgmr.msrb.gmra.mxu2 %vm152_vm1, %v4846_v58  ;;  %713 = vmatpush.bf16.msrb.mxu1 %v704_v13  ;;  %v1198_v13 = vsel %vm156_vm0, %v4139_v7, 0  ;;  %v1224_v15 = vsel %vm156_vm0, %v4143_v11, 0 }
  0x50   : > { %4037 = vmatmul.msk.bf16.vlgmr.msrb.gmra.mxu3 %vm152_vm1, %v4880_v8  ;;  %739 = vmatpush.bf16.msrb.mxu2 %v730_v10  ;;  %v5027_v10 = vpack.c.bf16 %v4117_v2, %v4116_v1  ;;  %v1406_v1 = vsel %vm156_vm0, %v4172_v56, 0 }
  0x51   : > { %765 = vmatpush.bf16.msrb.mxu3 %v756_v12  ;;  %v1251_v12 = vsel %vm156_vm0, %v4147_v3, 0  ;;  %v1432_v3 = vsel %vm156_vm0, %v4176_v62, 0 }
  0x5d   : > { %4041 = vmatmul.msk.bf16.vlgmr.msra.gmra.mxu0 %vm152_vm1, %v569_v18 }
  0x5e   : > { %4045 = vmatmul.msk.bf16.vlgmr.msra.gmra.mxu1 %vm152_vm1, %v4904_v20  ;;  %792 = vmatpush.bf16.msra.mxu0 %v783_v25 }
  0x5f   : > { %4053 = vmatmul.msk.bf16.vlgmr.msra.gmra.mxu2 %vm152_vm1, %v4829_v50  ;;  %818 = vmatpush.bf16.msra.mxu1 %v809_v27  ;;  %v990_v50 = vsel %vm156_vm0, %v4106_v46, 0  ;;  %v4168_v27 = vld [vmem:[%s5891_s1 + $0x4] sm:$0x3]  ;;  %v4145_v46 = vld [vmem:[%s4783_s24 + $0x90] sm:$0xff] }
  0x60   : > { %4054 = vmatmul.msk.bf16.vlgmr.msra.gmra.mxu3 %vm152_vm1, %v4821_v47  ;;  %844 = vmatpush.bf16.msra.mxu2 %v835_v24  ;;  %v4118_v47 = vld [vmem:[%s5891_s1 + $0x10] sm:$0x3] }
  0x61   : > { %877 = vmatpush.bf16.msra.mxu3 %v868_v26  ;;  %v1069_v51 = vsel %vm156_vm0, %v4118_v47, 0  ;;  %v4155_v26 = vld [vmem:[%s5891_s1 + $0x10] sm:$0x3]  ;;  %v4146_v47 = vld [vmem:[%s4783_s24 + $0x98] sm:$0xff] }
  0x62   : > { %v5078_v55 = vpack.c.bf16 %v4146_v47, %v4145_v46 }
  0x6d   : > { %4058 = vmatmul.msk.bf16.vlgmr.msrb.gmra.mxu0 %vm152_vm1, %v4846_v58  ;;  %v1102_v58 = vsel %vm156_vm0, %v4126_v54, 0 }
  0x6e   : > { %4062 = vmatmul.msk.bf16.vlgmr.msrb.gmra.mxu1 %vm152_vm1, %v4880_v8  ;;  %897 = vmatpush.bf16.msrb.mxu0 %v888_v33  ;;  %v1380_v33 = vsel %vm156_vm0, %v4168_v27, 0 }
  0x6f   : > { %4066 = vmatmul.msk.bf16.vlgmr.msrb.gmra.mxu2 %vm152_vm1, %v569_v18  ;;  %921 = vmatpush.bf16.msrb.mxu1 %v912_v35 }
  0x70   : > { %4070 = vmatmul.msk.bf16.vlgmr.msrb.gmra.mxu3 %vm152_vm1, %v4904_v20  ;;  %947 = vmatpush.bf16.msrb.mxu2 %v938_v32  ;;  %v1303_v32 = vsel %vm156_vm0, %v4155_v26, 0 }
  0x71   : > { %973 = vmatpush.bf16.msrb.mxu3 %v964_v34  ;;  %v1336_v34 = vsel %vm156_vm0, %v4163_v29, 0 }
  0x7d   : > { %4074 = vmatmul.msk.bf16.vlgmr.msra.gmra.mxu0 %vm152_vm1, %v4955_v42 }
  0x7e   : > { %4078 = vmatmul.msk.bf16.vlgmr.msra.gmra.mxu1 %vm152_vm1, %v4960_v44  ;;  %999 = vmatpush.bf16.msra.mxu0 %v990_v50 }
  0x7f   : > { %4082 = vmatmul.msk.bf16.vlgmr.msra.gmra.mxu2 %vm152_vm1, %v4962_v45  ;;  %1026 = vmatpush.bf16.msra.mxu1 %v1017_v52  ;;  %v4180_v52 = vld [vmem:[%s5891_s1 + $0xa] sm:$0x3] }
  0x80   : > { %4090 = vmatmul.msk.bf16.vlgmr.msra.gmra.mxu3 %vm152_vm1, %v569_v18  ;;  %1052 = vmatpush.bf16.msra.mxu2 %v1043_v49  ;;  %v4150_v49 = vld [vmem:[%s4783_s24 + $0x99] sm:$0xff]  ;;  %v1458_v63 = vsel %vm156_vm0, %v4180_v52, 0 }
  0x81   : > { %1078 = vmatpush.bf16.msra.mxu3 %v1069_v51  ;;  %v5086_v61 = vpack.c.bf16 %v4150_v49, %v4149_v48 }
  0x8d   : > { %4091 = vmatmul.msk.bf16.vlgmr.msrb.gmra.mxu0 %vm152_vm1, %v4880_v8  ;;  %v4151_v8 = vld [vmem:[%s5891_s1 + $0xe] sm:$0x3] }
  0x8e   : > { %4095 = vmatmul.msk.bf16.vlgmr.msrb.gmra.mxu1 %vm152_vm1, %v4904_v20  ;;  %1111 = vmatpush.bf16.msrb.mxu0 %v1102_v58  ;;  %v1277_v14 = vsel %vm156_vm0, %v4151_v8, 0 }
  0x8f   : > { %4099 = vmatmul.msk.bf16.vlgmr.msrb.gmra.mxu2 %vm152_vm1, %v4955_v42  ;;  %1131 = vmatpush.bf16.msrb.mxu1 %v1122_v60 }
  0x90   : > { %4103 = vmatmul.msk.bf16.vlgmr.msrb.gmra.mxu3 %vm152_vm1, %v4960_v44  ;;  %1155 = vmatpush.bf16.msrb.mxu2 %v1146_v57  ;;  %v4184_v57 = vld [vmem:[%s5891_s1 + $0xc] sm:$0x3] }
  0x91   : > { %1181 = vmatpush.bf16.msrb.mxu3 %v1172_v59  ;;  %v1485_v2 = vsel %vm156_vm0, %v4184_v57, 0 }
  0x9a   : > { %v169_v4 = vpop.f32.mrf.mxu0 }
  0x9b   : > { %v189_v9 = vpop.f32.mrf.mxu1 }
  0x9c   : > { %v190_v20 = vadd.f32 %v189_v9, %v169_v4 }
  0x9d   : > { %4107 = vmatmul.msk.bf16.vlgmr.msra.gmra.mxu0 %vm152_vm1, %v4962_v45 }
  0x9e   : > { %4111 = vmatmul.msk.bf16.vlgmr.msra.gmra.mxu1 %vm152_vm1, %v5017_v5  ;;  %1207 = vmatpush.bf16.msra.mxu0 %v1198_v13  ;;  %v4153_v13 = vld [vmem:[%s4783_s24 + $0x92] sm:$0xff] }
  0x9f   : > { %4115 = vmatmul.msk.bf16.vlgmr.msra.gmra.mxu2 %vm152_vm1, %v5019_v6  ;;  %1233 = vmatpush.bf16.msra.mxu1 %v1224_v15 }
  0xa0   : > { %4119 = vmatmul.msk.bf16.vlgmr.msra.gmra.mxu3 %vm152_vm1, %v5027_v10  ;;  %1260 = vmatpush.bf16.msra.mxu2 %v1251_v12 }
  0xa1   : > { %1286 = vmatpush.bf16.msra.mxu3 %v1277_v14  ;;  %v4154_v14 = vld [vmem:[%s4783_s24 + $0x9a] sm:$0xff] }
  0xa2   : > { %v214_v16 = vpop.f32.mrf.mxu2  ;;  %v171_v18 = vpop.f32.mrf.mxu0 }
  0xa3   : > { %v242_v17 = vpop.f32.mrf.mxu3  ;;  %v191_v19 = vpop.f32.mrf.mxu1  ;;  %v219_v21 = vadd.f32 %v214_v16, %v190_v20 }
  0xa4   : > { %v192_v35 = vadd.f32 %v191_v19, %v171_v18  ;;  %v4200_v18 = vld [vmem:[%s5891_s1 + $0x2] sm:$0x3] }
  0xa5   : > { %v247_v31 = vadd.f32 %v242_v17, %v219_v21  ;;  %v5111_v17 = vpack.c.bf16 %v4154_v14, %v4153_v13  ;;  %v4188_v21 = vld [vmem:[%s5891_s1 + $0xe] sm:$0x3] }
  0xa6   : > { %v1511_v27 = vsel %vm156_vm0, %v4188_v21, 0 }
  0xaa   : > { %v216_v22 = vpop.f32.mrf.mxu2  ;;  %v269_v25 = vpop.f32.mrf.mxu0 }
  0xab   : > { %v244_v24 = vpop.f32.mrf.mxu3  ;;  %v296_v28 = vpop.f32.mrf.mxu1  ;;  %v274_v36 = vadd.f32 %v269_v25, %v247_v31  ;;  %v220_v37 = vadd.f32 %v216_v22, %v192_v35  ;;  %v1561_v22 = vld [vmem:[%s5891_s1] sm:$0x3]  ;;  %v1570_v25 = vsel %vm156_vm0, %v4200_v18, 0 }
  0xad   : > { %4127 = vmatmul.msk.bf16.vlgmr.msrb.gmra.mxu0 %vm152_vm1, %v4960_v44  ;;  %v301_v41 = vadd.f32 %v296_v28, %v274_v36  ;;  %v248_v43 = vadd.f32 %v244_v24, %v220_v37  ;;  %v4192_v24 = vld [vmem:[%s5891_s1 + $0x10] sm:$0x3]  ;;  %v1590_v28 = vsel %vm156_vm0, %v1561_v22, 0 }
  0xae   : > { %4128 = vmatmul.msk.bf16.vlgmr.msrb.gmra.mxu1 %vm152_vm1, %v4955_v42  ;;  %1312 = vmatpush.bf16.msrb.mxu0 %v1303_v32  ;;  %v1537_v29 = vsel %vm156_vm0, %v4192_v24, 0 }
  0xaf   : > { %4132 = vmatmul.msk.bf16.vlgmr.msrb.gmra.mxu2 %vm152_vm1, %v4962_v45  ;;  %1345 = vmatpush.bf16.msrb.mxu1 %v1336_v34 }
  0xb0   : > { %4136 = vmatmul.msk.bf16.vlgmr.msrb.gmra.mxu3 %vm152_vm1, %v5017_v5  ;;  %1365 = vmatpush.bf16.msrb.mxu2 %v1356_v30 }
  0xb1   : > { %1389 = vmatpush.bf16.msrb.mxu3 %v1380_v33 }
  0xb2   : > { %v324_v38 = vpop.f32.mrf.mxu2  ;;  %v271_v40 = vpop.f32.mrf.mxu0 }
  0xb3   : > { %v351_v39 = vpop.f32.mrf.mxu3  ;;  %v298_v42 = vpop.f32.mrf.mxu1  ;;  %v329_v44 = vadd.f32 %v324_v38, %v301_v41  ;;  %v275_v45 = vadd.f32 %v271_v40, %v248_v43  ;;  %v4182_v38 = vld [vmem:[%s4783_s24 + $0xa8] sm:$0xff] }
  0xb5   : > { %v356_v50 = vadd.f32 %v351_v39, %v329_v44  ;;  %v302_v58 = vadd.f32 %v298_v42, %v275_v45  ;;  %v4183_v39 = vld [vmem:[%s4783_s24 + $0xb0] sm:$0xff]  ;;  %v4205_v44 = vld [vmem:[%s5891_s1 + $0x4] sm:$0x3]  ;;  %v4217_v45 = vld [vmem:[%s5891_s1 + $0xa] sm:$0x3] }
  0xb6   : > { %v5148_v49 = vpack.c.bf16 %v4183_v39, %v4182_v38  ;;  %v1692_v56 = vsel %vm156_vm0, %v4217_v45, 0  ;;  %v4242_v38 = vld [vmem:[%s5891_s1 + $0x4] sm:$0x3] }
  0xba   : > { %v326_v51 = vpop.f32.mrf.mxu2  ;;  %v378_v54 = vpop.f32.mrf.mxu0 }
  0xbb   : > { %v353_v53 = vpop.f32.mrf.mxu3  ;;  %v383_v59 = vadd.f32 %v378_v54, %v356_v50  ;;  %v411_v60 = vpop.f32.mrf.mxu1  ;;  %v330_v0 = vadd.f32 %v326_v51, %v302_v58  ;;  %v4209_v50 = vld [vmem:[%s5891_s1 + $0x6] sm:$0x3]  ;;  %v1614_v54 = vsel %vm156_vm0, %v4205_v44, 0  ;;  %v1848_v44 = vsel %vm156_vm0, %v4242_v38, 0 }
  0xbc   : > { %v1640_v57 = vsel %vm156_vm0, %v4209_v50, 0 }
  0xbd   : > { %386 = vst.msk [vmem:[%s5092_s22] sm:$0xff] %vm385_vm2, %v383_v59  ;;  %4140 = vmatmul.msk.bf16.vlgmr.msra.gmra.mxu0 %vm152_vm1, %v5019_v6  ;;  %v357_v4 = vadd.f32 %v353_v53, %v330_v0 }
  0xbe   : > { %4144 = vmatmul.msk.bf16.vlgmr.msra.gmra.mxu1 %vm152_vm1, %v5027_v10  ;;  %1415 = vmatpush.bf16.msra.mxu0 %v1406_v1 }
  0xbf   : > { %4148 = vmatmul.msk.bf16.vlgmr.msra.gmra.mxu2 %vm152_vm1, %v5078_v55  ;;  %1441 = vmatpush.bf16.msra.mxu1 %v1432_v3  ;;  %v4187_v3 = vld [vmem:[%s4783_s24 + $0xb1] sm:$0xff] }
  0xc0   : > { %4152 = vmatmul.msk.bf16.vlgmr.msra.gmra.mxu3 %vm152_vm1, %v5086_v61  ;;  %1467 = vmatpush.bf16.msra.mxu2 %v1458_v63 }
  0xc1   : > { %1494 = vmatpush.bf16.msra.mxu3 %v1485_v2  ;;  %v4186_v2 = vld [vmem:[%s4783_s24 + $0xa9] sm:$0xff] }
  0xc2   : > { %v431_v7 = vpop.f32.mrf.mxu2  ;;  %v380_v9 = vpop.f32.mrf.mxu0 }
  0xc3   : > { %v455_v8 = vpop.f32.mrf.mxu3  ;;  %v384_v11 = vadd.f32 %v380_v9, %v357_v4  ;;  %v413_v12 = vpop.f32.mrf.mxu1  ;;  %v432_v15 = vadd.f32 %v431_v7, %v411_v60  ;;  %v4190_v4 = vld [vmem:[%s4783_s24 + $0xaa] sm:$0xff]  ;;  %v4191_v7 = vld [vmem:[%s4783_s24 + $0xb2] sm:$0xff]  ;;  %v5173_v9 = vpack.c.bf16 %v4187_v3, %v4186_v2 }
  0xc4   : > { %v5178_v14 = vpack.c.bf16 %v4191_v7, %v4190_v4 }
  0xc5   : > { %387 = vst.msk [vmem:[%s5092_s22 + $0x8] sm:$0xff] %vm385_vm2, %v384_v11  ;;  %v460_v26 = vadd.f32 %v455_v8, %v432_v15  ;;  %v4229_v11 = vld [vmem:[%s5891_s1 + $0x10] sm:$0x3]  ;;  %v4221_v15 = vld [vmem:[%s5891_s1 + $0xc] sm:$0x3] }
  0xc6   : > { %v1719_v21 = vsel %vm156_vm0, %v4221_v15, 0 }
  0xca   : > { %v433_v16 = vpop.f32.mrf.mxu2  ;;  %v481_v20 = vpop.f32.mrf.mxu0 }
  0xcb   : > { %v457_v19 = vpop.f32.mrf.mxu3  ;;  %v507_v23 = vpop.f32.mrf.mxu1  ;;  %v486_v30 = vadd.f32 %v481_v20, %v460_v26  ;;  %v434_v31 = vadd.f32 %v433_v16, %v413_v12  ;;  %v4237_v16 = vld [vmem:[%s5891_s1 + $0x2] sm:$0x3]  ;;  %v1771_v20 = vsel %vm156_vm0, %v4229_v11, 0  ;;  %v4266_v11 = vld [vmem:[%s5891_s1 + $0x10] sm:$0x3] }
  0xcc   : > { %v1804_v22 = vsel %vm156_vm0, %v4237_v16, 0 }
  0xcd   : > { %4156 = vmatmul.msk.bf16.vlgmr.msrb.gmra.mxu0 %vm152_vm1, %v5111_v17  ;;  %v461_v36 = vadd.f32 %v457_v19, %v434_v31  ;;  %v4225_v19 = vld [vmem:[%s5891_s1 + $0xe] sm:$0x3] }
  0xce   : > { %4164 = vmatmul.msk.bf16.vlgmr.msrb.gmra.mxu1 %vm152_vm1, %v5019_v6  ;;  %1520 = vmatpush.bf16.msrb.mxu0 %v1511_v27  ;;  %v512_v6 = vadd.f32 %v507_v23, %v486_v30  ;;  %v1745_v24 = vsel %vm156_vm0, %v4225_v19, 0 }
  0xcf   : > { %4165 = vmatmul.msk.bf16.vlgmr.msrb.gmra.mxu2 %vm152_vm1, %v5017_v5  ;;  %1546 = vmatpush.bf16.msrb.mxu1 %v1537_v29 }
  0xd0   : > { %4169 = vmatmul.msk.bf16.vlgmr.msrb.gmra.mxu3 %vm152_vm1, %v5027_v10  ;;  %1579 = vmatpush.bf16.msrb.mxu2 %v1570_v25  ;;  %v4213_v10 = vld [vmem:[%s5891_s1 + $0x8] sm:$0x3] }
  0xd1   : > { %1599 = vmatpush.bf16.msrb.mxu3 %v1590_v28  ;;  %v1666_v51 = vsel %vm156_vm0, %v4213_v10, 0 }
  0xd2   : > { %v533_v32 = vpop.f32.mrf.mxu2  ;;  %v483_v34 = vpop.f32.mrf.mxu0 }
  0xd3   : > { %v560_v33 = vpop.f32.mrf.mxu3  ;;  %v509_v35 = vpop.f32.mrf.mxu1  ;;  %v538_v5 = vadd.f32 %v533_v32, %v512_v6  ;;  %v487_v37 = vadd.f32 %v483_v34, %v461_v36  ;;  %v1795_v36 = vld [vmem:[%s5891_s1] sm:$0x3] }
  0xd4   : > { %v1824_v10 = vsel %vm156_vm0, %v1795_v36, 0 }
  0xd5   : > { %v565_v40 = vadd.f32 %v560_v33, %v538_v5  ;;  %v513_v46 = vadd.f32 %v509_v35, %v487_v37  ;;  %v4250_v5 = vld [vmem:[%s5891_s1 + $0x8] sm:$0x3] }
  0xda   : > { %v535_v41 = vpop.f32.mrf.mxu2  ;;  %v586_v43 = vpop.f32.mrf.mxu0 }
  0xdb   : > { %v562_v42 = vpop.f32.mrf.mxu3  ;;  %v591_v47 = vadd.f32 %v586_v43, %v565_v40  ;;  %v612_v48 = vpop.f32.mrf.mxu1  ;;  %v539_v52 = vadd.f32 %v535_v41, %v513_v46 }
  0xdd   : > { %v617_v53 = vadd.f32 %v612_v48, %v591_v47  ;;  %4173 = vmatmul.msk.bf16.vlgmr.msra.gmra.mxu0 %vm152_vm1, %v5078_v55  ;;  %v566_v58 = vadd.f32 %v562_v42, %v539_v52  ;;  %v1900_v42 = vsel %vm156_vm0, %v4250_v5, 0 }
  0xde   : > { %4177 = vmatmul.msk.bf16.vlgmr.msra.gmra.mxu1 %vm152_vm1, %v5086_v61  ;;  %1623 = vmatpush.bf16.msra.mxu0 %v1614_v54  ;;  %v4220_v54 = vld [vmem:[%s4783_s24 + $0xc8] sm:$0xff] }
  0xdf   : > { %4181 = vmatmul.msk.bf16.vlgmr.msra.gmra.mxu2 %vm152_vm1, %v5111_v17  ;;  %4046 = vst.msk [vmem:[%s5092_s22 + $0x10] sm:$0xff] %vm385_vm2, %v617_v53  ;;  %1649 = vmatpush.bf16.msra.mxu1 %v1640_v57  ;;  %v4219_v53 = vld [vmem:[%s4783_s24 + $0xc0] sm:$0xff]  ;;  %v4224_v57 = vld [vmem:[%s4783_s24 + $0xc9] sm:$0xff] }
  0xe0   : > { %4185 = vmatmul.msk.bf16.vlgmr.msra.gmra.mxu3 %vm152_vm1, %v5148_v49  ;;  %1675 = vmatpush.bf16.msra.mxu2 %v1666_v51 }
  0xe1   : > { %1701 = vmatpush.bf16.msra.mxu3 %v1692_v56  ;;  %v4223_v56 = vld [vmem:[%s4783_s24 + $0xc1] sm:$0xff] }
  0xe2   : > { %v645_v59 = vpop.f32.mrf.mxu2  ;;  %v588_v62 = vpop.f32.mrf.mxu0  ;;  %v5238_v4 = vpack.c.bf16 %v4224_v57, %v4223_v56 }
  0xe3   : > { %v665_v60 = vpop.f32.mrf.mxu3  ;;  %v592_v63 = vadd.f32 %v588_v62, %v566_v58  ;;  %v614_v0 = vpop.f32.mrf.mxu1  ;;  %v4227_v58 = vld [vmem:[%s4783_s24 + $0xc2] sm:$0xff] }
  0xe4   : > { %v666_v23 = vadd.f32 %v665_v60, %v645_v59  ;;  %v4228_v59 = vld [vmem:[%s4783_s24 + $0xca] sm:$0xff] }
  0xe5   : > { %v618_v1 = vadd.f32 %v614_v0, %v592_v63  ;;  %v5233_v63 = vpack.c.bf16 %v4220_v54, %v4219_v53  ;;  %v4262_v0 = vld [vmem:[%s5891_s1 + $0xe] sm:$0x3]  ;;  %v5240_v7 = vpack.c.bf16 %v4228_v59, %v4227_v58  ;;  %v4295_v53 = vld [vmem:[%s5891_s1 + $0xc] sm:$0x3] }
  0xe6   : > { %v1979_v15 = vsel %vm156_vm0, %v4262_v0, 0 }
  0xe7   : > { %4047 = vst.msk [vmem:[%s5092_s22 + $0x18] sm:$0xff] %vm385_vm2, %v618_v1 }
  0xea   : > { %v647_v8 = vpop.f32.mrf.mxu2  ;;  %v689_v13 = vpop.f32.mrf.mxu0 }
  0xeb   : > { %v667_v12 = vpop.f32.mrf.mxu3  ;;  %v715_v18 = vpop.f32.mrf.mxu1  ;;  %v694_v25 = vadd.f32 %v689_v13, %v666_v23  ;;  %v4258_v13 = vld [vmem:[%s5891_s1 + $0xc] sm:$0x3] }
  0xec   : > { %v668_v31 = vadd.f32 %v667_v12, %v647_v8  ;;  %v4254_v8 = vld [vmem:[%s5891_s1 + $0xa] sm:$0x3]  ;;  %v1953_v19 = vsel %vm156_vm0, %v4258_v13, 0 }
  0xed   : > { %4189 = vmatmul.msk.bf16.vlgmr.msrb.gmra.mxu0 %vm152_vm1, %v5173_v9  ;;  %v720_v30 = vadd.f32 %v715_v18, %v694_v25  ;;  %v1926_v16 = vsel %vm156_vm0, %v4254_v8, 0  ;;  %v2005_v18 = vsel %vm156_vm0, %v4266_v11, 0  ;;  %v2187_v8 = vsel %vm156_vm0, %v4295_v53, 0 }
  0xee   : > { %4193 = vmatmul.msk.bf16.vlgmr.msrb.gmra.mxu1 %vm152_vm1, %v5178_v14  ;;  %1728 = vmatpush.bf16.msrb.mxu0 %v1719_v21 }
  0xef   : > { %4201 = vmatmul.msk.bf16.vlgmr.msrb.gmra.mxu2 %vm152_vm1, %v5086_v61  ;;  %1754 = vmatpush.bf16.msrb.mxu1 %v1745_v24  ;;  %v4246_v61 = vld [vmem:[%s5891_s1 + $0x6] sm:$0x3] }
  0xf0   : > { %4202 = vmatmul.msk.bf16.vlgmr.msrb.gmra.mxu3 %vm152_vm1, %v5078_v55  ;;  %1780 = vmatpush.bf16.msrb.mxu2 %v1771_v20  ;;  %v1874_v41 = vsel %vm156_vm0, %v4246_v61, 0  ;;  %v2029_v61 = vld [vmem:[%s5891_s1] sm:$0x3] }
  0xf1   : > { %1813 = vmatpush.bf16.msrb.mxu3 %v1804_v22  ;;  %v2058_v38 = vsel %vm156_vm0, %v2029_v61, 0 }
  0xf2   : > { %v741_v26 = vpop.f32.mrf.mxu2  ;;  %v691_v28 = vpop.f32.mrf.mxu0 }
  0xf3   : > { %v767_v27 = vpop.f32.mrf.mxu3  ;;  %v717_v29 = vpop.f32.mrf.mxu1  ;;  %v746_v32 = vadd.f32 %v741_v26, %v720_v30  ;;  %v695_v33 = vadd.f32 %v691_v28, %v668_v31 }
  0xf5   : > { %v772_v6 = vadd.f32 %v767_v27, %v746_v32  ;;  %v721_v39 = vadd.f32 %v717_v29, %v695_v33  ;;  %v4279_v29 = vld [vmem:[%s5891_s1 + $0x4] sm:$0x3]  ;;  %v4274_v32 = vld [vmem:[%s5891_s1 + $0x2] sm:$0x3]  ;;  %v4283_v33 = vld [vmem:[%s5891_s1 + $0x6] sm:$0x3] }
  0xf6   : > { %v2038_v36 = vsel %vm156_vm0, %v4274_v32, 0  ;;  %v2108_v5 = vsel %vm156_vm0, %v4283_v33, 0 }
  0xfa   : > { %v743_v34 = vpop.f32.mrf.mxu2  ;;  %v794_v35 = vpop.f32.mrf.mxu0 }
  0xfb   : > { %v769_v55 = vpop.f32.mrf.mxu3  ;;  %v820_v37 = vpop.f32.mrf.mxu1  ;;  %v799_v40 = vadd.f32 %v794_v35, %v772_v6  ;;  %v747_v43 = vadd.f32 %v743_v34, %v721_v39  ;;  %v2082_v35 = vsel %vm156_vm0, %v4279_v29, 0  ;;  %v4311_v29 = vld [vmem:[%s5891_s1 + $0x2] sm:$0x3] }
  0xfc   : > { %v2272_v33 = vsel %vm156_vm0, %v4311_v29, 0 }
  0xfd   : > { %4206 = vmatmul.msk.bf16.vlgmr.msra.gmra.mxu0 %vm152_vm1, %v5111_v17  ;;  %v825_v17 = vadd.f32 %v820_v37, %v799_v40  ;;  %v773_v46 = vadd.f32 %v769_v55, %v747_v43 }
  0xfe   : > { %4210 = vmatmul.msk.bf16.vlgmr.msra.gmra.mxu1 %vm152_vm1, %v5148_v49  ;;  %1833 = vmatpush.bf16.msra.mxu0 %v1824_v10 }
  0xff   : > { %4214 = vmatmul.msk.bf16.vlgmr.msra.gmra.mxu2 %vm152_vm1, %v5173_v9  ;;  %1857 = vmatpush.bf16.msra.mxu1 %v1848_v44 }
 0x100   : > { %4218 = vmatmul.msk.bf16.vlgmr.msra.gmra.mxu3 %vm152_vm1, %v5178_v14  ;;  %1883 = vmatpush.bf16.msra.mxu2 %v1874_v41 }
 0x101   : > { %1909 = vmatpush.bf16.msra.mxu3 %v1900_v42 }
 0x102   : > { %v846_v45 = vpop.f32.mrf.mxu2  ;;  %v796_v50 = vpop.f32.mrf.mxu0 }
 0x103   : > { %v851_v47 = vadd.f32 %v846_v45, %v825_v17  ;;  %v879_v48 = vpop.f32.mrf.mxu3  ;;  %v822_v51 = vpop.f32.mrf.mxu1  ;;  %v800_v52 = vadd.f32 %v796_v50, %v773_v46  ;;  %v4256_v17 = vld [vmem:[%s4783_s24 + $0xd8] sm:$0xff]  ;;  %v4257_v45 = vld [vmem:[%s4783_s24 + $0xe0] sm:$0xff] }
 0x104   : > { %v4260_v46 = vld [vmem:[%s4783_s24 + $0xd9] sm:$0xff]  ;;  %v5300_v58 = vpack.c.bf16 %v4257_v45, %v4256_v17  ;;  %v4320_v17 = vld [vmem:[%s5891_s1 + $0x6] sm:$0x3]  ;;  %v4332_v45 = vld [vmem:[%s5891_s1 + $0xc] sm:$0x3] }
 0x105   : > { %4083 = vst.msk [vmem:[%s5092_s22 + $0x20] sm:$0xff] %vm385_vm2, %v851_v47  ;;  %v826_v60 = vadd.f32 %v822_v51, %v800_v52  ;;  %v4261_v47 = vld [vmem:[%s4783_s24 + $0xe1] sm:$0xff] }
 0x106   : > { %v4264_v50 = vld [vmem:[%s4783_s24 + $0xda] sm:$0xff]  ;;  %v4265_v51 = vld [vmem:[%s4783_s24 + $0xe2] sm:$0xff]  ;;  %v5302_v59 = vpack.c.bf16 %v4261_v47, %v4260_v46 }
 0x10a   : > { %v848_v62 = vpop.f32.mrf.mxu2  ;;  %v899_v3 = vpop.f32.mrf.mxu0 }
 0x10b   : > { %v852_v1 = vadd.f32 %v848_v62, %v826_v60  ;;  %v881_v2 = vpop.f32.mrf.mxu3  ;;  %v923_v12 = vpop.f32.mrf.mxu1  ;;  %v900_v20 = vadd.f32 %v899_v3, %v879_v48  ;;  %v4287_v60 = vld [vmem:[%s5891_s1 + $0x8] sm:$0x3]  ;;  %v4299_v62 = vld [vmem:[%s5891_s1 + $0xe] sm:$0x3] }
 0x10c   : > { %v2134_v11 = vsel %vm156_vm0, %v4287_v60, 0 }
 0x10d   : > { %4084 = vst.msk [vmem:[%s5092_s22 + $0x28] sm:$0xff] %vm385_vm2, %v852_v1  ;;  %4222 = vmatmul.msk.bf16.vlgmr.msrb.gmra.mxu0 %vm152_vm1, %v5233_v63  ;;  %v928_v25 = vadd.f32 %v923_v12, %v900_v20  ;;  %v5310_v1 = vpack.c.bf16 %v4265_v51, %v4264_v50  ;;  %v2213_v12 = vsel %vm156_vm0, %v4299_v62, 0  ;;  %v4324_v51 = vld [vmem:[%s5891_s1 + $0x8] sm:$0x3] }
 0x10e   : > { %4226 = vmatmul.msk.bf16.vlgmr.msrb.gmra.mxu1 %vm152_vm1, %v5238_v4  ;;  %1935 = vmatpush.bf16.msrb.mxu0 %v1926_v16 }
 0x10f   : > { %4230 = vmatmul.msk.bf16.vlgmr.msrb.gmra.mxu2 %vm152_vm1, %v5240_v7  ;;  %1962 = vmatpush.bf16.msrb.mxu1 %v1953_v19 }
 0x110   : > { %4238 = vmatmul.msk.bf16.vlgmr.msrb.gmra.mxu3 %vm152_vm1, %v5173_v9  ;;  %1988 = vmatpush.bf16.msrb.mxu2 %v1979_v15 }
 0x111   : > { %2014 = vmatpush.bf16.msrb.mxu3 %v2005_v18 }
 0x112   : > { %v949_v21 = vpop.f32.mrf.mxu2  ;;  %v901_v23 = vpop.f32.mrf.mxu0 }
 0x113   : > { %v975_v22 = vpop.f32.mrf.mxu3  ;;  %v925_v24 = vpop.f32.mrf.mxu1  ;;  %v954_v26 = vadd.f32 %v949_v21, %v928_v25  ;;  %v902_v27 = vadd.f32 %v901_v23, %v881_v2  ;;  %v4291_v2 = vld [vmem:[%s5891_s1 + $0xa] sm:$0x3]  ;;  %v2263_v23 = vld [vmem:[%s5891_s1] sm:$0x3] }
 0x114   : > { %v2160_v13 = vsel %vm156_vm0, %v4291_v2, 0 }
 0x115   : > { %v980_v30 = vadd.f32 %v975_v22, %v954_v26  ;;  %v929_v6 = vadd.f32 %v925_v24, %v902_v27  ;;  %v4303_v26 = vld [vmem:[%s5891_s1 + $0x10] sm:$0x3]  ;;  %v4316_v27 = vld [vmem:[%s5891_s1 + $0x4] sm:$0x3] }
 0x116   : > { %v2316_v32 = vsel %vm156_vm0, %v4316_v27, 0 }
 0x11a   : > { %v951_v28 = vpop.f32.mrf.mxu2  ;;  %v1001_v9 = vpop.f32.mrf.mxu0 }
 0x11b   : > { %v977_v31 = vpop.f32.mrf.mxu3  ;;  %v1028_v34 = vpop.f32.mrf.mxu1  ;;  %v1006_v55 = vadd.f32 %v1001_v9, %v980_v30  ;;  %v955_v37 = vadd.f32 %v951_v28, %v929_v6  ;;  %v2292_v30 = vsel %vm156_vm0, %v2263_v23, 0  ;;  %v2239_v9 = vsel %vm156_vm0, %v4303_v26, 0 }
 0x11d   : > { %4239 = vmatmul.msk.bf16.vlgmr.msra.gmra.mxu0 %vm152_vm1, %v5148_v49  ;;  %v1033_v49 = vadd.f32 %v1028_v34, %v1006_v55 }
 0x11e   : > { %4243 = vmatmul.msk.bf16.vlgmr.msra.gmra.mxu1 %vm152_vm1, %v5178_v14  ;;  %2047 = vmatpush.bf16.msra.mxu0 %v2038_v36  ;;  %v981_v14 = vadd.f32 %v977_v31, %v955_v37 }
 0x11f   : > { %4247 = vmatmul.msk.bf16.vlgmr.msra.gmra.mxu2 %vm152_vm1, %v5233_v63  ;;  %2067 = vmatpush.bf16.msra.mxu1 %v2058_v38  ;;  %v4293_v38 = vld [vmem:[%s4783_s24 + $0xf0] sm:$0xff] }
 0x120   : > { %4251 = vmatmul.msk.bf16.vlgmr.msra.gmra.mxu3 %vm152_vm1, %v5238_v4  ;;  %2091 = vmatpush.bf16.msra.mxu2 %v2082_v35 }
 0x121   : > { %2117 = vmatpush.bf16.msra.mxu3 %v2108_v5 }
 0x122   : > { %v1054_v39 = vpop.f32.mrf.mxu2  ;;  %v1003_v10 = vpop.f32.mrf.mxu0 }
 0x123   : > { %v1059_v40 = vadd.f32 %v1054_v39, %v1033_v49  ;;  %v1080_v41 = vpop.f32.mrf.mxu3  ;;  %v1030_v42 = vpop.f32.mrf.mxu1  ;;  %v1007_v44 = vadd.f32 %v1003_v10, %v981_v14  ;;  %v4294_v49 = vld [vmem:[%s4783_s24 + $0xf8] sm:$0xff]  ;;  %v4328_v10 = vld [vmem:[%s5891_s1 + $0xa] sm:$0x3] }
 0x124   : > { %v4297_v39 = vld [vmem:[%s4783_s24 + $0xf1] sm:$0xff]  ;;  %v4298_v14 = vld [vmem:[%s4783_s24 + $0xf9] sm:$0xff] }
 0x125   : > { %v1085_v43 = vadd.f32 %v1080_v41, %v1059_v40  ;;  %v1034_v48 = vadd.f32 %v1030_v42, %v1007_v44  ;;  %v5360_v44 = vpack.c.bf16 %v4294_v49, %v4293_v38  ;;  %v5368_v50 = vpack.c.bf16 %v4298_v14, %v4297_v39 }
 0x127   : > { %4120 = vst.msk [vmem:[%s5092_s22 + $0x30] sm:$0xff] %vm385_vm2, %v1085_v43 }
 0x12a   : > { %v1056_v52 = vpop.f32.mrf.mxu2  ;;  %v1113_v57 = vpop.f32.mrf.mxu0 }
 0x12b   : > { %v1060_v54 = vadd.f32 %v1056_v52, %v1034_v48  ;;  %v1082_v56 = vpop.f32.mrf.mxu3  ;;  %v1133_v0 = vpop.f32.mrf.mxu1  ;;  %v2394_v52 = vsel %vm156_vm0, %v4328_v10, 0 }
 0x12c   : > { %v1134_v20 = vadd.f32 %v1133_v0, %v1113_v57  ;;  %v2368_v57 = vsel %vm156_vm0, %v4324_v51, 0 }
 0x12d   : > { %v1086_v3 = vadd.f32 %v1082_v56, %v1060_v54  ;;  %4255 = vmatmul.msk.bf16.vlgmr.msrb.gmra.mxu0 %vm152_vm1, %v5240_v7  ;;  %v2342_v54 = vsel %vm156_vm0, %v4320_v17, 0  ;;  %v2421_v56 = vsel %vm156_vm0, %v4332_v45, 0 }
 0x12e   : > { %4259 = vmatmul.msk.bf16.vlgmr.msrb.gmra.mxu1 %vm152_vm1, %v5300_v58  ;;  %2143 = vmatpush.bf16.msrb.mxu0 %v2134_v11  ;;  %v4301_v11 = vld [vmem:[%s4783_s24 + $0xf2] sm:$0xff] }
 0x12f   : > { %4121 = vst.msk [vmem:[%s5092_s22 + $0x38] sm:$0xff] %vm385_vm2, %v1086_v3  ;;  %4263 = vmatmul.msk.bf16.vlgmr.msrb.gmra.mxu2 %vm152_vm1, %v5302_v59  ;;  %2169 = vmatpush.bf16.msrb.mxu1 %v2160_v13 }
 0x130   : > { %4267 = vmatmul.msk.bf16.vlgmr.msrb.gmra.mxu3 %vm152_vm1, %v5310_v1  ;;  %2196 = vmatpush.bf16.msrb.mxu2 %v2187_v8 }
 0x131   : > { %2222 = vmatpush.bf16.msrb.mxu3 %v2213_v12  ;;  %v4302_v12 = vld [vmem:[%s4783_s24 + $0xfa] sm:$0xff] }
 0x132   : > { %v1157_v15 = vpop.f32.mrf.mxu2  ;;  %v1115_v18 = vpop.f32.mrf.mxu0 }
 0x133   : > { %v1183_v16 = vpop.f32.mrf.mxu3  ;;  %v1135_v19 = vpop.f32.mrf.mxu1  ;;  %v1162_v21 = vadd.f32 %v1157_v15, %v1134_v20 }
 0x134   : > { %v1136_v34 = vadd.f32 %v1135_v19, %v1115_v18  ;;  %v4348_v18 = vld [vmem:[%s5891_s1 + $0x2] sm:$0x3] }
 0x135   : > { %v1188_v31 = vadd.f32 %v1183_v16, %v1162_v21  ;;  %v5391_v16 = vpack.c.bf16 %v4302_v12, %v4301_v11  ;;  %v4336_v21 = vld [vmem:[%s5891_s1 + $0xe] sm:$0x3] }
 0x136   : > { %v2447_v27 = vsel %vm156_vm0, %v4336_v21, 0 }
 0x13a   : > { %v1159_v22 = vpop.f32.mrf.mxu2  ;;  %v1209_v25 = vpop.f32.mrf.mxu0 }
 0x13b   : > { %v1185_v24 = vpop.f32.mrf.mxu3  ;;  %v1235_v28 = vpop.f32.mrf.mxu1  ;;  %v1214_v61 = vadd.f32 %v1209_v25, %v1188_v31  ;;  %v2506_v25 = vsel %vm156_vm0, %v4348_v18, 0 }
 0x13d   : > { %4275 = vmatmul.msk.bf16.vlgmr.msra.gmra.mxu0 %vm152_vm1, %v5238_v4  ;;  %v1163_v4 = vadd.f32 %v1159_v22, %v1136_v34  ;;  %v2497_v22 = vld [vmem:[%s5891_s1] sm:$0x3] }
 0x13e   : > { %4276 = vmatmul.msk.bf16.vlgmr.msra.gmra.mxu1 %vm152_vm1, %v5233_v63  ;;  %2248 = vmatpush.bf16.msra.mxu0 %v2239_v9 }
 0x13f   : > { %4280 = vmatmul.msk.bf16.vlgmr.msra.gmra.mxu2 %vm152_vm1, %v5240_v7  ;;  %2281 = vmatpush.bf16.msra.mxu1 %v2272_v33  ;;  %v1240_v7 = vadd.f32 %v1235_v28, %v1214_v61  ;;  %v1189_v36 = vadd.f32 %v1185_v24, %v1163_v4  ;;  %v4340_v24 = vld [vmem:[%s5891_s1 + $0x10] sm:$0x3]  ;;  %v2526_v28 = vsel %vm156_vm0, %v2497_v22, 0 }
 0x140   : > { %4284 = vmatmul.msk.bf16.vlgmr.msra.gmra.mxu3 %vm152_vm1, %v5300_v58  ;;  %2301 = vmatpush.bf16.msra.mxu2 %v2292_v30  ;;  %v2473_v29 = vsel %vm156_vm0, %v4340_v24, 0 }
 0x141   : > { %2325 = vmatpush.bf16.msra.mxu3 %v2316_v32 }
 0x142   : > { %v1262_v6 = vpop.f32.mrf.mxu2  ;;  %v1211_v55 = vpop.f32.mrf.mxu0 }
 0x143   : > { %v1288_v63 = vpop.f32.mrf.mxu3  ;;  %v1237_v35 = vpop.f32.mrf.mxu1  ;;  %v1267_v5 = vadd.f32 %v1262_v6, %v1240_v7  ;;  %v1215_v37 = vadd.f32 %v1211_v55, %v1189_v36  ;;  %v4330_v6 = vld [vmem:[%s4783_s24 + $0x108] sm:$0xff] }
 0x145   : > { %v1293_v40 = vadd.f32 %v1288_v63, %v1267_v5  ;;  %v1241_v46 = vadd.f32 %v1237_v35, %v1215_v37  ;;  %v4331_v63 = vld [vmem:[%s4783_s24 + $0x110] sm:$0xff]  ;;  %v4353_v5 = vld [vmem:[%s5891_s1 + $0x4] sm:$0x3]  ;;  %v4365_v37 = vld [vmem:[%s5891_s1 + $0xa] sm:$0x3] }
 0x146   : > { %v5428_v14 = vpack.c.bf16 %v4331_v63, %v4330_v6  ;;  %v2628_v17 = vsel %vm156_vm0, %v4365_v37, 0  ;;  %v4390_v6 = vld [vmem:[%s5891_s1 + $0x4] sm:$0x3] }
 0x14a   : > { %v1264_v41 = vpop.f32.mrf.mxu2  ;;  %v1314_v43 = vpop.f32.mrf.mxu0 }
 0x14b   : > { %v1290_v42 = vpop.f32.mrf.mxu3  ;;  %v1319_v47 = vadd.f32 %v1314_v43, %v1293_v40  ;;  %v1347_v48 = vpop.f32.mrf.mxu1  ;;  %v1268_v53 = vadd.f32 %v1264_v41, %v1241_v46  ;;  %v4357_v40 = vld [vmem:[%s5891_s1 + $0x6] sm:$0x3]  ;;  %v2550_v43 = vsel %vm156_vm0, %v4353_v5, 0  ;;  %v2784_v5 = vsel %vm156_vm0, %v4390_v6, 0 }
 0x14c   : > { %v2576_v45 = vsel %vm156_vm0, %v4357_v40, 0 }
 0x14d   : > { %4157 = vst.msk [vmem:[%s5092_s22 + $0x40] sm:$0xff] %vm385_vm2, %v1319_v47  ;;  %4288 = vmatmul.msk.bf16.vlgmr.msrb.gmra.mxu0 %vm152_vm1, %v5302_v59  ;;  %v1294_v60 = vadd.f32 %v1290_v42, %v1268_v53 }
 0x14e   : > { %4292 = vmatmul.msk.bf16.vlgmr.msrb.gmra.mxu1 %vm152_vm1, %v5310_v1  ;;  %2351 = vmatpush.bf16.msrb.mxu0 %v2342_v54 }
 0x14f   : > { %4296 = vmatmul.msk.bf16.vlgmr.msrb.gmra.mxu2 %vm152_vm1, %v5360_v44  ;;  %2377 = vmatpush.bf16.msrb.mxu1 %v2368_v57  ;;  %v4335_v57 = vld [vmem:[%s4783_s24 + $0x111] sm:$0xff] }
 0x150   : > { %4300 = vmatmul.msk.bf16.vlgmr.msrb.gmra.mxu3 %vm152_vm1, %v5368_v50  ;;  %2403 = vmatpush.bf16.msrb.mxu2 %v2394_v52 }
 0x151   : > { %2430 = vmatpush.bf16.msrb.mxu3 %v2421_v56  ;;  %v4334_v56 = vld [vmem:[%s4783_s24 + $0x109] sm:$0xff] }
 0x152   : > { %v1367_v62 = vpop.f32.mrf.mxu2  ;;  %v1316_v2 = vpop.f32.mrf.mxu0 }
 0x153   : > { %v1391_v0 = vpop.f32.mrf.mxu3  ;;  %v1320_v3 = vadd.f32 %v1316_v2, %v1294_v60  ;;  %v1349_v8 = vpop.f32.mrf.mxu1  ;;  %v1368_v13 = vadd.f32 %v1367_v62, %v1347_v48  ;;  %v4338_v60 = vld [vmem:[%s4783_s24 + $0x10a] sm:$0xff]  ;;  %v4339_v62 = vld [vmem:[%s4783_s24 + $0x112] sm:$0xff]  ;;  %v5453_v2 = vpack.c.bf16 %v4335_v57, %v4334_v56 }
 0x154   : > { %v5458_v12 = vpack.c.bf16 %v4339_v62, %v4338_v60 }
 0x155   : > { %4158 = vst.msk [vmem:[%s5092_s22 + $0x48] sm:$0xff] %vm385_vm2, %v1320_v3  ;;  %v1396_v26 = vadd.f32 %v1391_v0, %v1368_v13  ;;  %v4377_v3 = vld [vmem:[%s5891_s1 + $0x10] sm:$0x3]  ;;  %v4369_v13 = vld [vmem:[%s5891_s1 + $0xc] sm:$0x3] }
 0x156   : > { %v2655_v21 = vsel %vm156_vm0, %v4369_v13, 0 }
 0x15a   : > { %v1369_v15 = vpop.f32.mrf.mxu2  ;;  %v1417_v20 = vpop.f32.mrf.mxu0 }
 0x15b   : > { %v1393_v19 = vpop.f32.mrf.mxu3  ;;  %v1443_v23 = vpop.f32.mrf.mxu1  ;;  %v1422_v30 = vadd.f32 %v1417_v20, %v1396_v26  ;;  %v1370_v31 = vadd.f32 %v1369_v15, %v1349_v8  ;;  %v4385_v15 = vld [vmem:[%s5891_s1 + $0x2] sm:$0x3]  ;;  %v2707_v20 = vsel %vm156_vm0, %v4377_v3, 0  ;;  %v4414_v3 = vld [vmem:[%s5891_s1 + $0x10] sm:$0x3] }
 0x15c   : > { %v2740_v22 = vsel %vm156_vm0, %v4385_v15, 0 }
 0x15d   : > { %4304 = vmatmul.msk.bf16.vlgmr.msra.gmra.mxu0 %vm152_vm1, %v5391_v16  ;;  %v1397_v61 = vadd.f32 %v1393_v19, %v1370_v31  ;;  %v4373_v19 = vld [vmem:[%s5891_s1 + $0xe] sm:$0x3] }
 0x15e   : > { %4312 = vmatmul.msk.bf16.vlgmr.msra.gmra.mxu1 %vm152_vm1, %v5302_v59  ;;  %2456 = vmatpush.bf16.msra.mxu0 %v2447_v27  ;;  %v1448_v59 = vadd.f32 %v1443_v23, %v1422_v30  ;;  %v2681_v24 = vsel %vm156_vm0, %v4373_v19, 0 }
 0x15f   : > { %4313 = vmatmul.msk.bf16.vlgmr.msra.gmra.mxu2 %vm152_vm1, %v5300_v58  ;;  %2482 = vmatpush.bf16.msra.mxu1 %v2473_v29 }
 0x160   : > { %4317 = vmatmul.msk.bf16.vlgmr.msra.gmra.mxu3 %vm152_vm1, %v5310_v1  ;;  %2515 = vmatpush.bf16.msra.mxu2 %v2506_v25  ;;  %v4361_v1 = vld [vmem:[%s5891_s1 + $0x8] sm:$0x3] }
 0x161   : > { %2535 = vmatpush.bf16.msra.mxu3 %v2526_v28  ;;  %v2602_v41 = vsel %vm156_vm0, %v4361_v1, 0 }
 0x162   : > { %v1469_v9 = vpop.f32.mrf.mxu2  ;;  %v1419_v33 = vpop.f32.mrf.mxu0 }
 0x163   : > { %v1496_v32 = vpop.f32.mrf.mxu3  ;;  %v1445_v34 = vpop.f32.mrf.mxu1  ;;  %v1474_v58 = vadd.f32 %v1469_v9, %v1448_v59  ;;  %v1423_v4 = vadd.f32 %v1419_v33, %v1397_v61  ;;  %v2731_v61 = vld [vmem:[%s5891_s1] sm:$0x3] }
 0x164   : > { %v2760_v1 = vsel %vm156_vm0, %v2731_v61, 0 }
 0x165   : > { %v1501_v55 = vadd.f32 %v1496_v32, %v1474_v58  ;;  %v1449_v38 = vadd.f32 %v1445_v34, %v1423_v4  ;;  %v4398_v58 = vld [vmem:[%s5891_s1 + $0x8] sm:$0x3] }
 0x16a   : > { %v1471_v7 = vpop.f32.mrf.mxu2  ;;  %v1522_v36 = vpop.f32.mrf.mxu0 }
 0x16b   : > { %v1498_v35 = vpop.f32.mrf.mxu3  ;;  %v1527_v49 = vadd.f32 %v1522_v36, %v1501_v55  ;;  %v1548_v39 = vpop.f32.mrf.mxu1  ;;  %v1475_v10 = vadd.f32 %v1471_v7, %v1449_v38 }
 0x16d   : > { %v1553_v42 = vadd.f32 %v1548_v39, %v1527_v49  ;;  %4321 = vmatmul.msk.bf16.vlgmr.msrb.gmra.mxu0 %vm152_vm1, %v5360_v44  ;;  %v1502_v46 = vadd.f32 %v1498_v35, %v1475_v10  ;;  %v2836_v35 = vsel %vm156_vm0, %v4398_v58, 0 }
 0x16e   : > { %4325 = vmatmul.msk.bf16.vlgmr.msrb.gmra.mxu1 %vm152_vm1, %v5368_v50  ;;  %2559 = vmatpush.bf16.msrb.mxu0 %v2550_v43  ;;  %v4368_v43 = vld [vmem:[%s4783_s24 + $0x128] sm:$0xff] }
 0x16f   : > { %4329 = vmatmul.msk.bf16.vlgmr.msrb.gmra.mxu2 %vm152_vm1, %v5391_v16  ;;  %4194 = vst.msk [vmem:[%s5092_s22 + $0x50] sm:$0xff] %vm385_vm2, %v1553_v42  ;;  %2585 = vmatpush.bf16.msrb.mxu1 %v2576_v45  ;;  %v4367_v42 = vld [vmem:[%s4783_s24 + $0x120] sm:$0xff]  ;;  %v4372_v45 = vld [vmem:[%s4783_s24 + $0x129] sm:$0xff] }
 0x170   : > { %4333 = vmatmul.msk.bf16.vlgmr.msrb.gmra.mxu3 %vm152_vm1, %v5428_v14  ;;  %2611 = vmatpush.bf16.msrb.mxu2 %v2602_v41 }
 0x171   : > { %2637 = vmatpush.bf16.msrb.mxu3 %v2628_v17  ;;  %v4371_v17 = vld [vmem:[%s4783_s24 + $0x121] sm:$0xff] }
 0x172   : > { %v1581_v47 = vpop.f32.mrf.mxu2  ;;  %v1524_v51 = vpop.f32.mrf.mxu0  ;;  %v5518_v60 = vpack.c.bf16 %v4372_v45, %v4371_v17 }
 0x173   : > { %v1601_v48 = vpop.f32.mrf.mxu3  ;;  %v1528_v52 = vadd.f32 %v1524_v51, %v1502_v46  ;;  %v1550_v53 = vpop.f32.mrf.mxu1  ;;  %v4375_v46 = vld [vmem:[%s4783_s24 + $0x122] sm:$0xff] }
 0x174   : > { %v1602_v23 = vadd.f32 %v1601_v48, %v1581_v47  ;;  %v4376_v47 = vld [vmem:[%s4783_s24 + $0x12a] sm:$0xff] }
 0x175   : > { %v1554_v54 = vadd.f32 %v1550_v53, %v1528_v52  ;;  %v5513_v52 = vpack.c.bf16 %v4368_v43, %v4367_v42  ;;  %v4410_v53 = vld [vmem:[%s5891_s1 + $0xe] sm:$0x3]  ;;  %v5520_v62 = vpack.c.bf16 %v4376_v47, %v4375_v46  ;;  %v4443_v42 = vld [vmem:[%s5891_s1 + $0xc] sm:$0x3] }
 0x176   : > { %v2915_v13 = vsel %vm156_vm0, %v4410_v53, 0 }
 0x177   : > { %4195 = vst.msk [vmem:[%s5092_s22 + $0x58] sm:$0xff] %vm385_vm2, %v1554_v54 }
 0x17a   : > { %v1583_v0 = vpop.f32.mrf.mxu2  ;;  %v1625_v11 = vpop.f32.mrf.mxu0 }
 0x17b   : > { %v1603_v8 = vpop.f32.mrf.mxu3  ;;  %v1651_v18 = vpop.f32.mrf.mxu1  ;;  %v1630_v25 = vadd.f32 %v1625_v11, %v1602_v23  ;;  %v4406_v11 = vld [vmem:[%s5891_s1 + $0xc] sm:$0x3] }
 0x17c   : > { %v1604_v31 = vadd.f32 %v1603_v8, %v1583_v0  ;;  %v4402_v0 = vld [vmem:[%s5891_s1 + $0xa] sm:$0x3]  ;;  %v2889_v19 = vsel %vm156_vm0, %v4406_v11, 0 }
 0x17d   : > { %4337 = vmatmul.msk.bf16.vlgmr.msra.gmra.mxu0 %vm152_vm1, %v5453_v2  ;;  %v1656_v30 = vadd.f32 %v1651_v18, %v1630_v25  ;;  %v2862_v15 = vsel %vm156_vm0, %v4402_v0, 0  ;;  %v2941_v18 = vsel %vm156_vm0, %v4414_v3, 0  ;;  %v3123_v0 = vsel %vm156_vm0, %v4443_v42, 0 }
 0x17e   : > { %4341 = vmatmul.msk.bf16.vlgmr.msra.gmra.mxu1 %vm152_vm1, %v5458_v12  ;;  %2664 = vmatpush.bf16.msra.mxu0 %v2655_v21 }
 0x17f   : > { %4349 = vmatmul.msk.bf16.vlgmr.msra.gmra.mxu2 %vm152_vm1, %v5368_v50  ;;  %2690 = vmatpush.bf16.msra.mxu1 %v2681_v24  ;;  %v4394_v50 = vld [vmem:[%s5891_s1 + $0x6] sm:$0x3] }
 0x180   : > { %4350 = vmatmul.msk.bf16.vlgmr.msra.gmra.mxu3 %vm152_vm1, %v5360_v44  ;;  %2716 = vmatpush.bf16.msra.mxu2 %v2707_v20  ;;  %v2810_v7 = vsel %vm156_vm0, %v4394_v50, 0  ;;  %v2965_v50 = vld [vmem:[%s5891_s1] sm:$0x3] }
 0x181   : > { %2749 = vmatpush.bf16.msra.mxu3 %v2740_v22  ;;  %v2994_v6 = vsel %vm156_vm0, %v2965_v50, 0 }
 0x182   : > { %v1677_v26 = vpop.f32.mrf.mxu2  ;;  %v1627_v28 = vpop.f32.mrf.mxu0 }
 0x183   : > { %v1703_v27 = vpop.f32.mrf.mxu3  ;;  %v1653_v29 = vpop.f32.mrf.mxu1  ;;  %v1682_v9 = vadd.f32 %v1677_v26, %v1656_v30  ;;  %v1631_v32 = vadd.f32 %v1627_v28, %v1604_v31 }
 0x185   : > { %v1708_v59 = vadd.f32 %v1703_v27, %v1682_v9  ;;  %v1657_v63 = vadd.f32 %v1653_v29, %v1631_v32  ;;  %v4427_v29 = vld [vmem:[%s5891_s1 + $0x4] sm:$0x3]  ;;  %v4422_v9 = vld [vmem:[%s5891_s1 + $0x2] sm:$0x3]  ;;  %v4431_v32 = vld [vmem:[%s5891_s1 + $0x6] sm:$0x3] }
 0x186   : > { %v2974_v61 = vsel %vm156_vm0, %v4422_v9, 0  ;;  %v3044_v58 = vsel %vm156_vm0, %v4431_v32, 0 }
 0x18a   : > { %v1679_v33 = vpop.f32.mrf.mxu2  ;;  %v1730_v34 = vpop.f32.mrf.mxu0 }
 0x18b   : > { %v1705_v44 = vpop.f32.mrf.mxu3  ;;  %v1756_v4 = vpop.f32.mrf.mxu1  ;;  %v1735_v55 = vadd.f32 %v1730_v34, %v1708_v59  ;;  %v1683_v36 = vadd.f32 %v1679_v33, %v1657_v63  ;;  %v3018_v34 = vsel %vm156_vm0, %v4427_v29, 0  ;;  %v4459_v29 = vld [vmem:[%s5891_s1 + $0x2] sm:$0x3] }
 0x18c   : > { %v3208_v32 = vsel %vm156_vm0, %v4459_v29, 0 }
 0x18d   : > { %4354 = vmatmul.msk.bf16.vlgmr.msrb.gmra.mxu0 %vm152_vm1, %v5391_v16  ;;  %v1761_v16 = vadd.f32 %v1756_v4, %v1735_v55  ;;  %v1709_v38 = vadd.f32 %v1705_v44, %v1683_v36 }
 0x18e   : > { %4358 = vmatmul.msk.bf16.vlgmr.msrb.gmra.mxu1 %vm152_vm1, %v5428_v14  ;;  %2769 = vmatpush.bf16.msrb.mxu0 %v2760_v1 }
 0x18f   : > { %4362 = vmatmul.msk.bf16.vlgmr.msrb.gmra.mxu2 %vm152_vm1, %v5453_v2  ;;  %2793 = vmatpush.bf16.msrb.mxu1 %v2784_v5 }
 0x190   : > { %4366 = vmatmul.msk.bf16.vlgmr.msrb.gmra.mxu3 %vm152_vm1, %v5458_v12  ;;  %2819 = vmatpush.bf16.msrb.mxu2 %v2810_v7 }
 0x191   : > { %2845 = vmatpush.bf16.msrb.mxu3 %v2836_v35 }
 0x192   : > { %v1782_v37 = vpop.f32.mrf.mxu2  ;;  %v1732_v40 = vpop.f32.mrf.mxu0 }
 0x193   : > { %v1787_v49 = vadd.f32 %v1782_v37, %v1761_v16  ;;  %v1815_v39 = vpop.f32.mrf.mxu3  ;;  %v1758_v41 = vpop.f32.mrf.mxu1  ;;  %v1736_v10 = vadd.f32 %v1732_v40, %v1709_v38  ;;  %v4404_v16 = vld [vmem:[%s4783_s24 + $0x138] sm:$0xff]  ;;  %v4405_v37 = vld [vmem:[%s4783_s24 + $0x140] sm:$0xff] }
 0x194   : > { %v4408_v38 = vld [vmem:[%s4783_s24 + $0x139] sm:$0xff]  ;;  %v5580_v46 = vpack.c.bf16 %v4405_v37, %v4404_v16  ;;  %v4468_v16 = vld [vmem:[%s5891_s1 + $0x6] sm:$0x3]  ;;  %v4480_v37 = vld [vmem:[%s5891_s1 + $0xc] sm:$0x3] }
 0x195   : > { %4231 = vst.msk [vmem:[%s5092_s22 + $0x60] sm:$0xff] %vm385_vm2, %v1787_v49  ;;  %v1762_v48 = vadd.f32 %v1758_v41, %v1736_v10  ;;  %v4409_v49 = vld [vmem:[%s4783_s24 + $0x141] sm:$0xff] }
 0x196   : > { %v4412_v40 = vld [vmem:[%s4783_s24 + $0x13a] sm:$0xff]  ;;  %v4413_v41 = vld [vmem:[%s4783_s24 + $0x142] sm:$0xff]  ;;  %v5582_v47 = vpack.c.bf16 %v4409_v49, %v4408_v38 }
 0x19a   : > { %v1784_v51 = vpop.f32.mrf.mxu2  ;;  %v1835_v57 = vpop.f32.mrf.mxu0 }
 0x19b   : > { %v1788_v54 = vadd.f32 %v1784_v51, %v1762_v48  ;;  %v1817_v56 = vpop.f32.mrf.mxu3  ;;  %v1859_v8 = vpop.f32.mrf.mxu1  ;;  %v1836_v20 = vadd.f32 %v1835_v57, %v1815_v39  ;;  %v4435_v48 = vld [vmem:[%s5891_s1 + $0x8] sm:$0x3]  ;;  %v4447_v51 = vld [vmem:[%s5891_s1 + $0xe] sm:$0x3] }
 0x19c   : > { %v3070_v3 = vsel %vm156_vm0, %v4435_v48, 0 }
 0x19d   : > { %4232 = vst.msk [vmem:[%s5092_s22 + $0x68] sm:$0xff] %vm385_vm2, %v1788_v54  ;;  %4370 = vmatmul.msk.bf16.vlgmr.msra.gmra.mxu0 %vm152_vm1, %v5513_v52  ;;  %v1864_v25 = vadd.f32 %v1859_v8, %v1836_v20  ;;  %v5590_v54 = vpack.c.bf16 %v4413_v41, %v4412_v40  ;;  %v3149_v8 = vsel %vm156_vm0, %v4447_v51, 0  ;;  %v4472_v41 = vld [vmem:[%s5891_s1 + $0x8] sm:$0x3] }
 0x19e   : > { %4374 = vmatmul.msk.bf16.vlgmr.msra.gmra.mxu1 %vm152_vm1, %v5518_v60  ;;  %2871 = vmatpush.bf16.msra.mxu0 %v2862_v15 }
 0x19f   : > { %4378 = vmatmul.msk.bf16.vlgmr.msra.gmra.mxu2 %vm152_vm1, %v5520_v62  ;;  %2898 = vmatpush.bf16.msra.mxu1 %v2889_v19 }
 0x1a0   : > { %4386 = vmatmul.msk.bf16.vlgmr.msra.gmra.mxu3 %vm152_vm1, %v5453_v2  ;;  %2924 = vmatpush.bf16.msra.mxu2 %v2915_v13 }
 0x1a1   : > { %2950 = vmatpush.bf16.msra.mxu3 %v2941_v18 }
 0x1a2   : > { %v1885_v21 = vpop.f32.mrf.mxu2  ;;  %v1837_v23 = vpop.f32.mrf.mxu0 }
 0x1a3   : > { %v1911_v22 = vpop.f32.mrf.mxu3  ;;  %v1861_v24 = vpop.f32.mrf.mxu1  ;;  %v1890_v26 = vadd.f32 %v1885_v21, %v1864_v25  ;;  %v1838_v27 = vadd.f32 %v1837_v23, %v1817_v56  ;;  %v4439_v56 = vld [vmem:[%s5891_s1 + $0xa] sm:$0x3]  ;;  %v3199_v23 = vld [vmem:[%s5891_s1] sm:$0x3] }
 0x1a4   : > { %v3096_v11 = vsel %vm156_vm0, %v4439_v56, 0 }
 0x1a5   : > { %v1916_v30 = vadd.f32 %v1911_v22, %v1890_v26  ;;  %v1865_v59 = vadd.f32 %v1861_v24, %v1838_v27  ;;  %v4451_v26 = vld [vmem:[%s5891_s1 + $0x10] sm:$0x3]  ;;  %v4464_v27 = vld [vmem:[%s5891_s1 + $0x4] sm:$0x3] }
 0x1a6   : > { %v3252_v9 = vsel %vm156_vm0, %v4464_v27, 0 }
 0x1aa   : > { %v1887_v28 = vpop.f32.mrf.mxu2  ;;  %v1937_v2 = vpop.f32.mrf.mxu0 }
 0x1ab   : > { %v1913_v31 = vpop.f32.mrf.mxu3  ;;  %v1964_v33 = vpop.f32.mrf.mxu1  ;;  %v1942_v44 = vadd.f32 %v1937_v2, %v1916_v30  ;;  %v1891_v4 = vadd.f32 %v1887_v28, %v1865_v59  ;;  %v3228_v30 = vsel %vm156_vm0, %v3199_v23, 0  ;;  %v3175_v2 = vsel %vm156_vm0, %v4451_v26, 0 }
 0x1ad   : > { %4387 = vmatmul.msk.bf16.vlgmr.msrb.gmra.mxu0 %vm152_vm1, %v5428_v14  ;;  %v1969_v14 = vadd.f32 %v1964_v33, %v1942_v44 }
 0x1ae   : > { %4391 = vmatmul.msk.bf16.vlgmr.msrb.gmra.mxu1 %vm152_vm1, %v5458_v12  ;;  %2983 = vmatpush.bf16.msrb.mxu0 %v2974_v61  ;;  %v1917_v12 = vadd.f32 %v1913_v31, %v1891_v4 }
 0x1af   : > { %4395 = vmatmul.msk.bf16.vlgmr.msrb.gmra.mxu2 %vm152_vm1, %v5513_v52  ;;  %3003 = vmatpush.bf16.msrb.mxu1 %v2994_v6  ;;  %v4441_v6 = vld [vmem:[%s4783_s24 + $0x150] sm:$0xff] }
 0x1b0   : > { %4399 = vmatmul.msk.bf16.vlgmr.msrb.gmra.mxu3 %vm152_vm1, %v5518_v60  ;;  %3027 = vmatpush.bf16.msrb.mxu2 %v3018_v34 }
 0x1b1   : > { %3053 = vmatpush.bf16.msrb.mxu3 %v3044_v58 }
 0x1b2   : > { %v1990_v63 = vpop.f32.mrf.mxu2  ;;  %v1939_v1 = vpop.f32.mrf.mxu0 }
 0x1b3   : > { %v1995_v55 = vadd.f32 %v1990_v63, %v1969_v14  ;;  %v2016_v7 = vpop.f32.mrf.mxu3  ;;  %v1966_v35 = vpop.f32.mrf.mxu1  ;;  %v1943_v5 = vadd.f32 %v1939_v1, %v1917_v12  ;;  %v4442_v14 = vld [vmem:[%s4783_s24 + $0x158] sm:$0xff]  ;;  %v4476_v1 = vld [vmem:[%s5891_s1 + $0xa] sm:$0x3] }
 0x1b4   : > { %v4445_v63 = vld [vmem:[%s4783_s24 + $0x151] sm:$0xff]  ;;  %v4446_v12 = vld [vmem:[%s4783_s24 + $0x159] sm:$0xff] }
 0x1b5   : > { %v2021_v36 = vadd.f32 %v2016_v7, %v1995_v55  ;;  %v1970_v39 = vadd.f32 %v1966_v35, %v1943_v5  ;;  %v5640_v5 = vpack.c.bf16 %v4442_v14, %v4441_v6  ;;  %v5648_v40 = vpack.c.bf16 %v4446_v12, %v4445_v63 }
 0x1b7   : > { %4268 = vst.msk [vmem:[%s5092_s22 + $0x70] sm:$0xff] %vm385_vm2, %v2021_v36 }
 0x1ba   : > { %v1992_v10 = vpop.f32.mrf.mxu2  ;;  %v2049_v45 = vpop.f32.mrf.mxu0 }
 0x1bb   : > { %v1996_v43 = vadd.f32 %v1992_v10, %v1970_v39  ;;  %v2018_v17 = vpop.f32.mrf.mxu3  ;;  %v2069_v53 = vpop.f32.mrf.mxu1  ;;  %v3330_v10 = vsel %vm156_vm0, %v4476_v1, 0 }
 0x1bc   : > { %v2070_v20 = vadd.f32 %v2069_v53, %v2049_v45  ;;  %v3304_v45 = vsel %vm156_vm0, %v4472_v41, 0 }
 0x1bd   : > { %v2022_v57 = vadd.f32 %v2018_v17, %v1996_v43  ;;  %4403 = vmatmul.msk.bf16.vlgmr.msra.gmra.mxu0 %vm152_vm1, %v5520_v62  ;;  %v3278_v43 = vsel %vm156_vm0, %v4468_v16, 0  ;;  %v3357_v17 = vsel %vm156_vm0, %v4480_v37, 0 }
 0x1be   : > { %4407 = vmatmul.msk.bf16.vlgmr.msra.gmra.mxu1 %vm152_vm1, %v5580_v46  ;;  %3079 = vmatpush.bf16.msra.mxu0 %v3070_v3  ;;  %v4449_v3 = vld [vmem:[%s4783_s24 + $0x152] sm:$0xff] }
 0x1bf   : > { %4269 = vst.msk [vmem:[%s5092_s22 + $0x78] sm:$0xff] %vm385_vm2, %v2022_v57  ;;  %4411 = vmatmul.msk.bf16.vlgmr.msra.gmra.mxu2 %vm152_vm1, %v5582_v47  ;;  %3105 = vmatpush.bf16.msra.mxu1 %v3096_v11 }
 0x1c0   : > { %4415 = vmatmul.msk.bf16.vlgmr.msra.gmra.mxu3 %vm152_vm1, %v5590_v54  ;;  %3132 = vmatpush.bf16.msra.mxu2 %v3123_v0 }
 0x1c1   : > { %3158 = vmatpush.bf16.msra.mxu3 %v3149_v8  ;;  %v4450_v8 = vld [vmem:[%s4783_s24 + $0x15a] sm:$0xff] }
 0x1c2   : > { %v2093_v13 = vpop.f32.mrf.mxu2  ;;  %v2051_v18 = vpop.f32.mrf.mxu0 }
 0x1c3   : > { %v2119_v15 = vpop.f32.mrf.mxu3  ;;  %v2071_v19 = vpop.f32.mrf.mxu1  ;;  %v2098_v21 = vadd.f32 %v2093_v13, %v2070_v20 }
 0x1c4   : > { %v2072_v33 = vadd.f32 %v2071_v19, %v2051_v18  ;;  %v4496_v18 = vld [vmem:[%s5891_s1 + $0x2] sm:$0x3] }
 0x1c5   : > { %v2124_v31 = vadd.f32 %v2119_v15, %v2098_v21  ;;  %v5671_v15 = vpack.c.bf16 %v4450_v8, %v4449_v3  ;;  %v4484_v21 = vld [vmem:[%s5891_s1 + $0xe] sm:$0x3] }
 0x1c6   : > { %v3383_v27 = vsel %vm156_vm0, %v4484_v21, 0 }
 0x1ca   : > { %v2095_v22 = vpop.f32.mrf.mxu2  ;;  %v2145_v25 = vpop.f32.mrf.mxu0 }
 0x1cb   : > { %v2121_v24 = vpop.f32.mrf.mxu3  ;;  %v2171_v28 = vpop.f32.mrf.mxu1  ;;  %v2150_v50 = vadd.f32 %v2145_v25, %v2124_v31  ;;  %v3442_v25 = vsel %vm156_vm0, %v4496_v18, 0 }
 0x1cd   : > { %4423 = vmatmul.msk.bf16.vlgmr.msrb.gmra.mxu0 %vm152_vm1, %v5518_v60  ;;  %v2099_v60 = vadd.f32 %v2095_v22, %v2072_v33  ;;  %v3433_v22 = vld [vmem:[%s5891_s1] sm:$0x3] }
 0x1ce   : > { %4424 = vmatmul.msk.bf16.vlgmr.msrb.gmra.mxu1 %vm152_vm1, %v5513_v52  ;;  %3184 = vmatpush.bf16.msrb.mxu0 %v3175_v2 }
 0x1cf   : > { %4428 = vmatmul.msk.bf16.vlgmr.msrb.gmra.mxu2 %vm152_vm1, %v5520_v62  ;;  %3217 = vmatpush.bf16.msrb.mxu1 %v3208_v32  ;;  %v2176_v62 = vadd.f32 %v2171_v28, %v2150_v50  ;;  %v2125_v61 = vadd.f32 %v2121_v24, %v2099_v60  ;;  %v4488_v24 = vld [vmem:[%s5891_s1 + $0x10] sm:$0x3]  ;;  %v3462_v28 = vsel %vm156_vm0, %v3433_v22, 0 }
 0x1d0   : > { %4432 = vmatmul.msk.bf16.vlgmr.msrb.gmra.mxu3 %vm152_vm1, %v5580_v46  ;;  %3237 = vmatpush.bf16.msrb.mxu2 %v3228_v30  ;;  %v3409_v29 = vsel %vm156_vm0, %v4488_v24, 0 }
 0x1d1   : > { %3261 = vmatpush.bf16.msrb.mxu3 %v3252_v9 }
 0x1d2   : > { %v2198_v59 = vpop.f32.mrf.mxu2  ;;  %v2147_v44 = vpop.f32.mrf.mxu0 }
 0x1d3   : > { %v2224_v52 = vpop.f32.mrf.mxu3  ;;  %v2173_v34 = vpop.f32.mrf.mxu1  ;;  %v2203_v58 = vadd.f32 %v2198_v59, %v2176_v62  ;;  %v2151_v4 = vadd.f32 %v2147_v44, %v2125_v61  ;;  %v4478_v59 = vld [vmem:[%s4783_s24 + $0x168] sm:$0xff] }
 0x1d5   : > { %v2229_v55 = vadd.f32 %v2224_v52, %v2203_v58  ;;  %v2177_v38 = vadd.f32 %v2173_v34, %v2151_v4  ;;  %v4479_v52 = vld [vmem:[%s4783_s24 + $0x170] sm:$0xff]  ;;  %v4501_v58 = vld [vmem:[%s5891_s1 + $0x4] sm:$0x3]  ;;  %v4513_v4 = vld [vmem:[%s5891_s1 + $0xa] sm:$0x3] }
 0x1d6   : > { %v5708_v12 = vpack.c.bf16 %v4479_v52, %v4478_v59  ;;  %v3564_v16 = vsel %vm156_vm0, %v4513_v4, 0  ;;  %v4538_v59 = vld [vmem:[%s5891_s1 + $0x4] sm:$0x3] }
 0x1da   : > { %v2200_v7 = vpop.f32.mrf.mxu2  ;;  %v2250_v36 = vpop.f32.mrf.mxu0 }
 0x1db   : > { %v2226_v35 = vpop.f32.mrf.mxu3  ;;  %v2255_v49 = vadd.f32 %v2250_v36, %v2229_v55  ;;  %v2283_v39 = vpop.f32.mrf.mxu1  ;;  %v2204_v42 = vadd.f32 %v2200_v7, %v2177_v38  ;;  %v4505_v55 = vld [vmem:[%s5891_s1 + $0x6] sm:$0x3]  ;;  %v3486_v36 = vsel %vm156_vm0, %v4501_v58, 0  ;;  %v3720_v58 = vsel %vm156_vm0, %v4538_v59, 0 }
 0x1dc   : > { %v3512_v37 = vsel %vm156_vm0, %v4505_v55, 0 }
 0x1dd   : > { %4305 = vst.msk [vmem:[%s5092_s22 + $0x80] sm:$0xff] %vm385_vm2, %v2255_v49  ;;  %4436 = vmatmul.msk.bf16.vlgmr.msra.gmra.mxu0 %vm152_vm1, %v5582_v47  ;;  %v2230_v48 = vadd.f32 %v2226_v35, %v2204_v42 }
 0x1de   : > { %4440 = vmatmul.msk.bf16.vlgmr.msra.gmra.mxu1 %vm152_vm1, %v5590_v54  ;;  %3287 = vmatpush.bf16.msra.mxu0 %v3278_v43 }
 0x1df   : > { %4444 = vmatmul.msk.bf16.vlgmr.msra.gmra.mxu2 %vm152_vm1, %v5640_v5  ;;  %3313 = vmatpush.bf16.msra.mxu1 %v3304_v45  ;;  %v4483_v45 = vld [vmem:[%s4783_s24 + $0x171] sm:$0xff] }
 0x1e0   : > { %4448 = vmatmul.msk.bf16.vlgmr.msra.gmra.mxu3 %vm152_vm1, %v5648_v40  ;;  %3339 = vmatpush.bf16.msra.mxu2 %v3330_v10 }
 0x1e1   : > { %3366 = vmatpush.bf16.msra.mxu3 %v3357_v17  ;;  %v4482_v17 = vld [vmem:[%s4783_s24 + $0x169] sm:$0xff] }
 0x1e2   : > { %v2303_v51 = vpop.f32.mrf.mxu2  ;;  %v2252_v56 = vpop.f32.mrf.mxu0 }
 0x1e3   : > { %v2327_v53 = vpop.f32.mrf.mxu3  ;;  %v2256_v57 = vadd.f32 %v2252_v56, %v2230_v48  ;;  %v2285_v0 = vpop.f32.mrf.mxu1  ;;  %v2304_v11 = vadd.f32 %v2303_v51, %v2283_v39  ;;  %v4486_v48 = vld [vmem:[%s4783_s24 + $0x16a] sm:$0xff]  ;;  %v4487_v51 = vld [vmem:[%s4783_s24 + $0x172] sm:$0xff]  ;;  %v5733_v56 = vpack.c.bf16 %v4483_v45, %v4482_v17 }
 0x1e4   : > { %v5738_v8 = vpack.c.bf16 %v4487_v51, %v4486_v48 }
 0x1e5   : > { %4306 = vst.msk [vmem:[%s5092_s22 + $0x88] sm:$0xff] %vm385_vm2, %v2256_v57  ;;  %v2332_v26 = vadd.f32 %v2327_v53, %v2304_v11  ;;  %v4525_v57 = vld [vmem:[%s5891_s1 + $0x10] sm:$0x3]  ;;  %v4517_v11 = vld [vmem:[%s5891_s1 + $0xc] sm:$0x3] }
 0x1e6   : > { %v3591_v21 = vsel %vm156_vm0, %v4517_v11, 0 }
 0x1ea   : > { %v2305_v13 = vpop.f32.mrf.mxu2  ;;  %v2353_v20 = vpop.f32.mrf.mxu0 }
 0x1eb   : > { %v2329_v19 = vpop.f32.mrf.mxu3  ;;  %v2379_v23 = vpop.f32.mrf.mxu1  ;;  %v2358_v30 = vadd.f32 %v2353_v20, %v2332_v26  ;;  %v2306_v31 = vadd.f32 %v2305_v13, %v2285_v0  ;;  %v4533_v13 = vld [vmem:[%s5891_s1 + $0x2] sm:$0x3]  ;;  %v3643_v20 = vsel %vm156_vm0, %v4525_v57, 0  ;;  %v4562_v57 = vld [vmem:[%s5891_s1 + $0x10] sm:$0x3] }
 0x1ec   : > { %v3676_v22 = vsel %vm156_vm0, %v4533_v13, 0 }
 0x1ed   : > { %4452 = vmatmul.msk.bf16.vlgmr.msrb.gmra.mxu0 %vm152_vm1, %v5671_v15  ;;  %v2333_v50 = vadd.f32 %v2329_v19, %v2306_v31  ;;  %v4521_v19 = vld [vmem:[%s5891_s1 + $0xe] sm:$0x3] }
 0x1ee   : > { %4460 = vmatmul.msk.bf16.vlgmr.msrb.gmra.mxu1 %vm152_vm1, %v5582_v47  ;;  %3392 = vmatpush.bf16.msrb.mxu0 %v3383_v27  ;;  %v2384_v47 = vadd.f32 %v2379_v23, %v2358_v30  ;;  %v3617_v24 = vsel %vm156_vm0, %v4521_v19, 0 }
 0x1ef   : > { %4461 = vmatmul.msk.bf16.vlgmr.msrb.gmra.mxu2 %vm152_vm1, %v5580_v46  ;;  %3418 = vmatpush.bf16.msrb.mxu1 %v3409_v29 }
 0x1f0   : > { %4465 = vmatmul.msk.bf16.vlgmr.msrb.gmra.mxu3 %vm152_vm1, %v5590_v54  ;;  %3451 = vmatpush.bf16.msrb.mxu2 %v3442_v25  ;;  %v4509_v54 = vld [vmem:[%s5891_s1 + $0x8] sm:$0x3] }
 0x1f1   : > { %3471 = vmatpush.bf16.msrb.mxu3 %v3462_v28  ;;  %v3538_v7 = vsel %vm156_vm0, %v4509_v54, 0 }
 0x1f2   : > { %v2405_v2 = vpop.f32.mrf.mxu2  ;;  %v2355_v32 = vpop.f32.mrf.mxu0 }
 0x1f3   : > { %v2432_v9 = vpop.f32.mrf.mxu3  ;;  %v2381_v33 = vpop.f32.mrf.mxu1  ;;  %v2410_v46 = vadd.f32 %v2405_v2, %v2384_v47  ;;  %v2359_v60 = vadd.f32 %v2355_v32, %v2333_v50  ;;  %v3667_v50 = vld [vmem:[%s5891_s1] sm:$0x3] }
 0x1f4   : > { %v3696_v54 = vsel %vm156_vm0, %v3667_v50, 0 }
 0x1f5   : > { %v2437_v44 = vadd.f32 %v2432_v9, %v2410_v46  ;;  %v2385_v6 = vadd.f32 %v2381_v33, %v2359_v60  ;;  %v4546_v46 = vld [vmem:[%s5891_s1 + $0x8] sm:$0x3] }
 0x1fa   : > { %v2407_v62 = vpop.f32.mrf.mxu2  ;;  %v2458_v61 = vpop.f32.mrf.mxu0 }
 0x1fb   : > { %v2434_v34 = vpop.f32.mrf.mxu3  ;;  %v2463_v14 = vadd.f32 %v2458_v61, %v2437_v44  ;;  %v2484_v63 = vpop.f32.mrf.mxu1  ;;  %v2411_v1 = vadd.f32 %v2407_v62, %v2385_v6 }
 0x1fd   : > { %v2489_v35 = vadd.f32 %v2484_v63, %v2463_v14  ;;  %4469 = vmatmul.msk.bf16.vlgmr.msra.gmra.mxu0 %vm152_vm1, %v5640_v5  ;;  %v2438_v38 = vadd.f32 %v2434_v34, %v2411_v1  ;;  %v3772_v34 = vsel %vm156_vm0, %v4546_v46, 0 }
 0x1fe   : > { %4473 = vmatmul.msk.bf16.vlgmr.msra.gmra.mxu1 %vm152_vm1, %v5648_v40  ;;  %3495 = vmatpush.bf16.msra.mxu0 %v3486_v36  ;;  %v4516_v36 = vld [vmem:[%s4783_s24 + $0x188] sm:$0xff] }
 0x1ff   : > { %4477 = vmatmul.msk.bf16.vlgmr.msra.gmra.mxu2 %vm152_vm1, %v5671_v15  ;;  %4342 = vst.msk [vmem:[%s5092_s22 + $0x90] sm:$0xff] %vm385_vm2, %v2489_v35  ;;  %3521 = vmatpush.bf16.msra.mxu1 %v3512_v37  ;;  %v4515_v35 = vld [vmem:[%s4783_s24 + $0x180] sm:$0xff]  ;;  %v4520_v37 = vld [vmem:[%s4783_s24 + $0x189] sm:$0xff] }
 0x200   : > { %4481 = vmatmul.msk.bf16.vlgmr.msra.gmra.mxu3 %vm152_vm1, %v5708_v12  ;;  %3547 = vmatpush.bf16.msra.mxu2 %v3538_v7 }
 0x201   : > { %3573 = vmatpush.bf16.msra.mxu3 %v3564_v16  ;;  %v4519_v16 = vld [vmem:[%s4783_s24 + $0x181] sm:$0xff] }
 0x202   : > { %v2517_v49 = vpop.f32.mrf.mxu2  ;;  %v2460_v41 = vpop.f32.mrf.mxu0  ;;  %v3611_v48 = vpack.c.bf16 %v4520_v37, %v4519_v16 }
 0x203   : > { %v2537_v39 = vpop.f32.mrf.mxu3  ;;  %v2464_v10 = vadd.f32 %v2460_v41, %v2438_v38  ;;  %v2486_v42 = vpop.f32.mrf.mxu1  ;;  %v4523_v38 = vld [vmem:[%s4783_s24 + $0x182] sm:$0xff] }
 0x204   : > { %v2538_v23 = vadd.f32 %v2537_v39, %v2517_v49  ;;  %v4524_v49 = vld [vmem:[%s4783_s24 + $0x18a] sm:$0xff] }
 0x205   : > { %v2490_v43 = vadd.f32 %v2486_v42, %v2464_v10  ;;  %v3585_v10 = vpack.c.bf16 %v4516_v36, %v4515_v35  ;;  %v4558_v42 = vld [vmem:[%s5891_s1 + $0xe] sm:$0x3]  ;;  %v5796_v51 = vpack.c.bf16 %v4524_v49, %v4523_v38 }
 0x206   : > { %v3851_v11 = vsel %vm156_vm0, %v4558_v42, 0 }
 0x207   : > { %4343 = vst.msk [vmem:[%s5092_s22 + $0x98] sm:$0xff] %vm385_vm2, %v2490_v43 }
 0x20a   : > { %v2519_v53 = vpop.f32.mrf.mxu2  ;;  %v2561_v3 = vpop.f32.mrf.mxu0 }
 0x20b   : > { %v2539_v0 = vpop.f32.mrf.mxu3  ;;  %v2587_v18 = vpop.f32.mrf.mxu1  ;;  %v2566_v25 = vadd.f32 %v2561_v3, %v2538_v23  ;;  %v4554_v3 = vld [vmem:[%s5891_s1 + $0xc] sm:$0x3] }
 0x20c   : > { %v2540_v31 = vadd.f32 %v2539_v0, %v2519_v53  ;;  %v4550_v53 = vld [vmem:[%s5891_s1 + $0xa] sm:$0x3]  ;;  %v3825_v19 = vsel %vm156_vm0, %v4554_v3, 0 }
 0x20d   : > { %4485 = vmatmul.msk.bf16.vlgmr.msrb.gmra.mxu0 %vm152_vm1, %v5733_v56  ;;  %v2592_v30 = vadd.f32 %v2587_v18, %v2566_v25  ;;  %v3798_v13 = vsel %vm156_vm0, %v4550_v53, 0  ;;  %v3877_v18 = vsel %vm156_vm0, %v4562_v57, 0 }
 0x20e   : > { %4489 = vmatmul.msk.bf16.vlgmr.msrb.gmra.mxu1 %vm152_vm1, %v5738_v8  ;;  %3600 = vmatpush.bf16.msrb.mxu0 %v3591_v21 }
 0x20f   : > { %4497 = vmatmul.msk.bf16.vlgmr.msrb.gmra.mxu2 %vm152_vm1, %v5648_v40  ;;  %3626 = vmatpush.bf16.msrb.mxu1 %v3617_v24  ;;  %v4542_v40 = vld [vmem:[%s5891_s1 + $0x6] sm:$0x3] }
 0x210   : > { %4498 = vmatmul.msk.bf16.vlgmr.msrb.gmra.mxu3 %vm152_vm1, %v5640_v5  ;;  %3652 = vmatpush.bf16.msrb.mxu2 %v3643_v20  ;;  %v3746_v62 = vsel %vm156_vm0, %v4542_v40, 0 }
 0x211   : > { %3685 = vmatpush.bf16.msrb.mxu3 %v3676_v22 }
 0x212   : > { %v2613_v26 = vpop.f32.mrf.mxu2  ;;  %v2563_v28 = vpop.f32.mrf.mxu0 }
 0x213   : > { %v2639_v27 = vpop.f32.mrf.mxu3  ;;  %v2589_v29 = vpop.f32.mrf.mxu1  ;;  %v2618_v2 = vadd.f32 %v2613_v26, %v2592_v30  ;;  %v2567_v9 = vadd.f32 %v2563_v28, %v2540_v31 }
 0x215   : > { %v2644_v47 = vadd.f32 %v2639_v27, %v2618_v2  ;;  %v2593_v52 = vadd.f32 %v2589_v29, %v2567_v9 }
 0x21a   : > { %v2615_v32 = vpop.f32.mrf.mxu2  ;;  %v2666_v33 = vpop.f32.mrf.mxu0 }
 0x21b   : > { %v2641_v5 = vpop.f32.mrf.mxu3  ;;  %v2692_v60 = vpop.f32.mrf.mxu1  ;;  %v2671_v44 = vadd.f32 %v2666_v33, %v2644_v47  ;;  %v2619_v61 = vadd.f32 %v2615_v32, %v2593_v52  ;;  %v4552_v52 = vld [vmem:[%s4783_s24 + $0x198] sm:$0xff] }
 0x21d   : > { %4502 = vmatmul.msk.bf16.vlgmr.msra.gmra.mxu0 %vm152_vm1, %v5671_v15  ;;  %v2697_v15 = vadd.f32 %v2692_v60, %v2671_v44  ;;  %v2645_v6 = vadd.f32 %v2641_v5, %v2619_v61  ;;  %v4556_v44 = vld [vmem:[%s4783_s24 + $0x199] sm:$0xff]  ;;  %v4561_v61 = vld [vmem:[%s4783_s24 + $0x1a2] sm:$0xff] }
 0x21e   : > { %4506 = vmatmul.msk.bf16.vlgmr.msra.gmra.mxu1 %vm152_vm1, %v5708_v12  ;;  %3705 = vmatpush.bf16.msra.mxu0 %v3696_v54 }
 0x21f   : > { %4510 = vmatmul.msk.bf16.vlgmr.msra.gmra.mxu2 %vm152_vm1, %v5733_v56  ;;  %3729 = vmatpush.bf16.msra.mxu1 %v3720_v58 }
 0x220   : > { %4514 = vmatmul.msk.bf16.vlgmr.msra.gmra.mxu3 %vm152_vm1, %v5738_v8  ;;  %3755 = vmatpush.bf16.msra.mxu2 %v3746_v62  ;;  %v4557_v62 = vld [vmem:[%s4783_s24 + $0x1a1] sm:$0xff] }
 0x221   : > { %3781 = vmatpush.bf16.msra.mxu3 %v3772_v34  ;;  %v4560_v34 = vld [vmem:[%s4783_s24 + $0x19a] sm:$0xff] }
 0x222   : > { %v2718_v4 = vpop.f32.mrf.mxu2  ;;  %v2668_v55 = vpop.f32.mrf.mxu0 }
 0x223   : > { %v2723_v14 = vadd.f32 %v2718_v4, %v2697_v15  ;;  %v2751_v63 = vpop.f32.mrf.mxu3  ;;  %v2694_v7 = vpop.f32.mrf.mxu1  ;;  %v2672_v1 = vadd.f32 %v2668_v55, %v2645_v6 }
 0x225   : > { %4379 = vst.msk [vmem:[%s5092_s22 + $0xa0] sm:$0xff] %vm385_vm2, %v2723_v14  ;;  %v2698_v39 = vadd.f32 %v2694_v7, %v2672_v1  ;;  %v3871_v7 = vpack.c.bf16 %v4561_v61, %v4560_v34 }
 0x22a   : > { %v2720_v41 = vpop.f32.mrf.mxu2  ;;  %v2771_v45 = vpop.f32.mrf.mxu0 }
 0x22b   : > { %v2724_v43 = vadd.f32 %v2720_v41, %v2698_v39  ;;  %v2753_v17 = vpop.f32.mrf.mxu3  ;;  %v2795_v0 = vpop.f32.mrf.mxu1  ;;  %v2772_v20 = vadd.f32 %v2771_v45, %v2751_v63  ;;  %v3845_v63 = vpack.c.bf16 %v4557_v62, %v4556_v44 }
 0x22d   : > { %4380 = vst.msk [vmem:[%s5092_s22 + $0xa8] sm:$0xff] %vm385_vm2, %v2724_v43  ;;  %4518 = vmatmul.msk.bf16.vlgmr.msrb.gmra.mxu0 %vm152_vm1, %v3585_v10  ;;  %v2800_v25 = vadd.f32 %v2795_v0, %v2772_v20 }
 0x22e   : > { %4522 = vmatmul.msk.bf16.vlgmr.msrb.gmra.mxu1 %vm152_vm1, %v3611_v48  ;;  %3807 = vmatpush.bf16.msrb.mxu0 %v3798_v13 }
 0x22f   : > { %4526 = vmatmul.msk.bf16.vlgmr.msrb.gmra.mxu2 %vm152_vm1, %v5796_v51  ;;  %3834 = vmatpush.bf16.msrb.mxu1 %v3825_v19 }
 0x230   : > { %4534 = vmatmul.msk.bf16.vlgmr.msrb.gmra.mxu3 %vm152_vm1, %v5733_v56  ;;  %3860 = vmatpush.bf16.msrb.mxu2 %v3851_v11 }
 0x231   : > { %3886 = vmatpush.bf16.msrb.mxu3 %v3877_v18 }
 0x232   : > { %v2821_v21 = vpop.f32.mrf.mxu2  ;;  %v2773_v23 = vpop.f32.mrf.mxu0 }
 0x233   : > { %v2847_v22 = vpop.f32.mrf.mxu3  ;;  %v2797_v24 = vpop.f32.mrf.mxu1  ;;  %v2826_v26 = vadd.f32 %v2821_v21, %v2800_v25  ;;  %v2774_v27 = vadd.f32 %v2773_v23, %v2753_v17 }
 0x235   : > { %v2852_v29 = vadd.f32 %v2847_v22, %v2826_v26  ;;  %v2801_v9 = vadd.f32 %v2797_v24, %v2774_v27 }
 0x23a   : > { %v2823_v28 = vpop.f32.mrf.mxu2  ;;  %v2873_v31 = vpop.f32.mrf.mxu0 }
 0x23b   : > { %v2849_v30 = vpop.f32.mrf.mxu3  ;;  %v2900_v2 = vpop.f32.mrf.mxu1  ;;  %v2878_v56 = vadd.f32 %v2873_v31, %v2852_v29  ;;  %v2827_v32 = vadd.f32 %v2823_v28, %v2801_v9 }
 0x23d   : > { %4535 = vmatmul.msk.bf16.vlgmr.msra.gmra.mxu0 %vm152_vm1, %v5708_v12  ;;  %v2905_v40 = vadd.f32 %v2900_v2, %v2878_v56  ;;  %v2853_v5 = vadd.f32 %v2849_v30, %v2827_v32 }
 0x23e   : > { %4539 = vmatmul.msk.bf16.vlgmr.msra.gmra.mxu1 %vm152_vm1, %v5738_v8  ;;  %v4553_v8 = vld [vmem:[%s4783_s24 + $0x1a0] sm:$0xff]  ;;  %s4571_s24 = sshll.u32 %s4716_s13, 8  ;;  %s3899_s13 = scalar_lea.sflag [#allocation3], %s134_s3 }
 0x23f   : > { %4543 = vmatmul.msk.bf16.vlgmr.msra.gmra.mxu2 %vm152_vm1, %v3585_v10  ;;  %v3819_v14 = vpack.c.bf16 %v4553_v8, %v4552_v52  ;;  %s3910_s7 = scalar_lea.hbm %s5892_s2, %s4571_s24 }
 0x240   : > { %4547 = vmatmul.msk.bf16.vlgmr.msra.gmra.mxu3 %vm152_vm1, %v3611_v48  ;;  %s3913_s14 = sshll.u32 %s3910_s7, 4  ;;  %s3914_s14 = int_to_ptr.hbm [resolvable:$true] %s3913_s14 }
 0x241   : > { %s4628_s16 = sshra.s32 %s3914_s14, 4  ;;  %s4629_s16 = int_to_ptr.hbm [resolvable:$true] %s4628_s16 }
 0x242   : > { %v2926_v47 = vpop.f32.mrf.mxu2  ;;  %v2875_v46 = vpop.f32.mrf.mxu0  ;;  %s4630_s17 = scalar_lea.hbm %s4629_s16, 256  ;;  %p4635_p0 = scmp.lt.s32.totalorder %s4629_s16, %s5892_s2 }
 0x243   : > { %v2931_v33 = vadd.f32 %v2926_v47, %v2905_v40  ;;  %v2952_v50 = vpop.f32.mrf.mxu3  ;;  %v2902_v12 = vpop.f32.mrf.mxu1  ;;  %v2879_v59 = vadd.f32 %v2875_v46, %v2853_v5  ;;  %p4631_p11 = scmp.ne.s32.totalorder %s4629_s16, %s4630_s17  ;;  %p4636_p1 = scmp.lt.s32.totalorder %s4634_s25, %s4630_s17 }
 0x245   : > { %v2957_v60 = vadd.f32 %v2952_v50, %v2931_v33  ;;  %v2906_v54 = vadd.f32 %v2902_v12, %v2879_v59  ;;  %p4632_p12 = pnand %p4631_p11, %p4733_p5  ;;  %p4637_p2 = por %p4636_p1, %p4635_p0 }
 0x247   : > { %4416 = vst.msk [vmem:[%s5092_s22 + $0xb0] sm:$0xff] %vm385_vm2, %v2957_v60  ;;  %p4633_p13 = pneg %p4632_p12 }
 0x249   : > { %p4638_p3 = pnand %p4637_p2, %p4633_p13 }
 0x24a   : > { %v2928_v58 = vpop.f32.mrf.mxu2  ;;  %v2985_v6 = vpop.f32.mrf.mxu0 }
 0x24b   : > { %v2932_v15 = vadd.f32 %v2928_v58, %v2906_v54  ;;  %v2954_v4 = vpop.f32.mrf.mxu3  ;;  %v3005_v55 = vpop.f32.mrf.mxu1 }
 0x24c   : > { %v3006_v38 = vadd.f32 %v3005_v55, %v2985_v6 }
 0x24d   : > { %v2958_v1 = vadd.f32 %v2954_v4, %v2932_v15  ;;  %4551 = vmatmul.msk.bf16.vlgmr.msrb.gmra.mxu0 %vm152_vm1, %v5796_v51 }
 0x24e   : > { %4555 = vmatmul.msk.bf16.vlgmr.msrb.gmra.mxu1 %vm152_vm1, %v3819_v14 }
 0x24f   : > { %4417 = vst.msk [vmem:[%s5092_s22 + $0xb8] sm:$0xff] %vm385_vm2, %v2958_v1  ;;  %4559 = vmatmul.msk.bf16.vlgmr.msrb.gmra.mxu2 %vm152_vm1, %v3845_v63 }
 0x250   : > { %4563 = vmatmul.msk.bf16.vlgmr.msrb.gmra.mxu3 %vm152_vm1, %v3871_v7 }
 0x252   : > { %v3029_v35 = vpop.f32.mrf.mxu2  ;;  %v2987_v16 = vpop.f32.mrf.mxu0 }
 0x253   : > { %v3055_v36 = vpop.f32.mrf.mxu3  ;;  %v3007_v37 = vpop.f32.mrf.mxu1  ;;  %v3034_v49 = vadd.f32 %v3029_v35, %v3006_v38 }
 0x254   : > { %v3008_v17 = vadd.f32 %v3007_v37, %v2987_v16 }
 0x255   : > { %v3060_v43 = vadd.f32 %v3055_v36, %v3034_v49 }
 0x25a   : > { %v3031_v39 = vpop.f32.mrf.mxu2  ;;  %v3081_v10 = vpop.f32.mrf.mxu0 }
 0x25b   : > { %v3057_v41 = vpop.f32.mrf.mxu3  ;;  %v3107_v42 = vpop.f32.mrf.mxu1  ;;  %v3086_v45 = vadd.f32 %v3081_v10, %v3060_v43  ;;  %v3035_v48 = vadd.f32 %v3031_v39, %v3008_v17 }
 0x25d   : > { %v3112_v0 = vadd.f32 %v3107_v42, %v3086_v45  ;;  %v3061_v11 = vadd.f32 %v3057_v41, %v3035_v48 }
 0x262   : > { %v3134_v51 = vpop.f32.mrf.mxu2  ;;  %v3083_v57 = vpop.f32.mrf.mxu0 }
 0x263   : > { %v3160_v53 = vpop.f32.mrf.mxu3  ;;  %v3109_v3 = vpop.f32.mrf.mxu1  ;;  %v3139_v13 = vadd.f32 %v3134_v51, %v3112_v0  ;;  %v3087_v18 = vadd.f32 %v3083_v57, %v3061_v11 }
 0x265   : > { %v3165_v19 = vadd.f32 %v3160_v53, %v3139_v13  ;;  %v3113_v23 = vadd.f32 %v3109_v3, %v3087_v18 }
 0x26a   : > { %v3136_v20 = vpop.f32.mrf.mxu2  ;;  %v3186_v22 = vpop.f32.mrf.mxu0 }
 0x26b   : > { %v3162_v21 = vpop.f32.mrf.mxu3  ;;  %v3191_v24 = vadd.f32 %v3186_v22, %v3165_v19  ;;  %v3219_v25 = vpop.f32.mrf.mxu1  ;;  %v3140_v26 = vadd.f32 %v3136_v20, %v3113_v23 }
 0x26d   : > { %4453 = vst.msk [vmem:[%s5092_s22 + $0xc0] sm:$0xff] %vm385_vm2, %v3191_v24  ;;  %v3166_v27 = vadd.f32 %v3162_v21, %v3140_v26 }
 0x272   : > { %v3239_v28 = vpop.f32.mrf.mxu2  ;;  %v3188_v30 = vpop.f32.mrf.mxu0 }
 0x273   : > { %v3263_v29 = vpop.f32.mrf.mxu3  ;;  %v3192_v31 = vadd.f32 %v3188_v30, %v3166_v27  ;;  %v3221_v2 = vpop.f32.mrf.mxu1  ;;  %v3240_v9 = vadd.f32 %v3239_v28, %v3219_v25 }
 0x275   : > { %4454 = vst.msk [vmem:[%s5092_s22 + $0xc8] sm:$0xff] %vm385_vm2, %v3192_v31  ;;  %v3268_v5 = vadd.f32 %v3263_v29, %v3240_v9 }
 0x27a   : > { %v3241_v56 = vpop.f32.mrf.mxu2  ;;  %v3289_v40 = vpop.f32.mrf.mxu0 }
 0x27b   : > { %v3265_v32 = vpop.f32.mrf.mxu3  ;;  %v3315_v47 = vpop.f32.mrf.mxu1  ;;  %v3294_v33 = vadd.f32 %v3289_v40, %v3268_v5  ;;  %v3242_v50 = vadd.f32 %v3241_v56, %v3221_v2 }
 0x27d   : > { %v3320_v59 = vadd.f32 %v3315_v47, %v3294_v33  ;;  %v3269_v8 = vadd.f32 %v3265_v32, %v3242_v50 }
 0x282   : > { %v3341_v46 = vpop.f32.mrf.mxu2  ;;  %v3291_v60 = vpop.f32.mrf.mxu0 }
 0x283   : > { %v3368_v12 = vpop.f32.mrf.mxu3  ;;  %v3317_v52 = vpop.f32.mrf.mxu1  ;;  %v3346_v44 = vadd.f32 %v3341_v46, %v3320_v59  ;;  %v3295_v62 = vadd.f32 %v3291_v60, %v3269_v8 }
 0x285   : > { %v3373_v54 = vadd.f32 %v3368_v12, %v3346_v44  ;;  %v3321_v15 = vadd.f32 %v3317_v52, %v3295_v62 }
 0x28a   : > { %v3343_v34 = vpop.f32.mrf.mxu2  ;;  %v3394_v58 = vpop.f32.mrf.mxu0 }
 0x28b   : > { %v3370_v61 = vpop.f32.mrf.mxu3  ;;  %v3399_v4 = vadd.f32 %v3394_v58, %v3373_v54  ;;  %v3420_v6 = vpop.f32.mrf.mxu1  ;;  %v3347_v14 = vadd.f32 %v3343_v34, %v3321_v15 }
 0x28d   : > { %v3425_v63 = vadd.f32 %v3420_v6, %v3399_v4  ;;  %v3374_v55 = vadd.f32 %v3370_v61, %v3347_v14 }
 0x28f   : > { %4490 = vst.msk [vmem:[%s5092_s22 + $0xd0] sm:$0xff] %vm385_vm2, %v3425_v63 }
 0x292   : > { %v3453_v7 = vpop.f32.mrf.mxu2  ;;  %v3396_v35 = vpop.f32.mrf.mxu0 }
 0x293   : > { %v3473_v1 = vpop.f32.mrf.mxu3  ;;  %v3400_v36 = vadd.f32 %v3396_v35, %v3374_v55  ;;  %v3422_v16 = vpop.f32.mrf.mxu1 }
 0x294   : > { %v3474_v10 = vadd.f32 %v3473_v1, %v3453_v7 }
 0x295   : > { %v3426_v37 = vadd.f32 %v3422_v16, %v3400_v36 }
 0x297   : > { %4491 = vst.msk [vmem:[%s5092_s22 + $0xd8] sm:$0xff] %vm385_vm2, %v3426_v37 }
 0x29a   : > { %v3455_v38 = vpop.f32.mrf.mxu2  ;;  %v3497_v39 = vpop.f32.mrf.mxu0 }
 0x29b   : > { %v3475_v49 = vpop.f32.mrf.mxu3  ;;  %v3523_v41 = vpop.f32.mrf.mxu1  ;;  %v3502_v42 = vadd.f32 %v3497_v39, %v3474_v10 }
 0x29c   : > { %v3476_v53 = vadd.f32 %v3475_v49, %v3455_v38 }
 0x29d   : > { %v3528_v51 = vadd.f32 %v3523_v41, %v3502_v42 }
 0x2a2   : > { %v3549_v43 = vpop.f32.mrf.mxu2  ;;  %v3499_v45 = vpop.f32.mrf.mxu0 }
 0x2a3   : > { %v3575_v17 = vpop.f32.mrf.mxu3  ;;  %v3525_v48 = vpop.f32.mrf.mxu1  ;;  %v3554_v57 = vadd.f32 %v3549_v43, %v3528_v51  ;;  %v3503_v0 = vadd.f32 %v3499_v45, %v3476_v53 }
 0x2a5   : > { %v3580_v11 = vadd.f32 %v3575_v17, %v3554_v57  ;;  %v3529_v20 = vadd.f32 %v3525_v48, %v3503_v0 }
 0x2aa   : > { %v3551_v3 = vpop.f32.mrf.mxu2  ;;  %v3602_v18 = vpop.f32.mrf.mxu0 }
 0x2ab   : > { %v3577_v13 = vpop.f32.mrf.mxu3  ;;  %v3628_v19 = vpop.f32.mrf.mxu1  ;;  %v3607_v21 = vadd.f32 %v3602_v18, %v3580_v11  ;;  %v3555_v22 = vadd.f32 %v3551_v3, %v3529_v20 }
 0x2ad   : > { %v3633_v23 = vadd.f32 %v3628_v19, %v3607_v21  ;;  %v3581_v25 = vadd.f32 %v3577_v13, %v3555_v22 }
 0x2b2   : > { %v3654_v24 = vpop.f32.mrf.mxu2  ;;  %v3604_v28 = vpop.f32.mrf.mxu0 }
 0x2b3   : > { %v3659_v26 = vadd.f32 %v3654_v24, %v3633_v23  ;;  %v3687_v27 = vpop.f32.mrf.mxu3  ;;  %v3630_v29 = vpop.f32.mrf.mxu1  ;;  %v3608_v30 = vadd.f32 %v3604_v28, %v3581_v25 }
 0x2b5   : > { %4527 = vst.msk [vmem:[%s5092_s22 + $0xe0] sm:$0xff] %vm385_vm2, %v3659_v26  ;;  %v3634_v31 = vadd.f32 %v3630_v29, %v3608_v30 }
 0x2ba   : > { %v3656_v2 = vpop.f32.mrf.mxu2  ;;  %v3707_v32 = vpop.f32.mrf.mxu0 }
 0x2bb   : > { %v3660_v9 = vadd.f32 %v3656_v2, %v3634_v31  ;;  %v3689_v56 = vpop.f32.mrf.mxu3  ;;  %v3731_v40 = vpop.f32.mrf.mxu1  ;;  %v3708_v47 = vadd.f32 %v3707_v32, %v3687_v27 }
 0x2bd   : > { %4528 = vst.msk [vmem:[%s5092_s22 + $0xe8] sm:$0xff] %vm385_vm2, %v3660_v9  ;;  %v3736_v12 = vadd.f32 %v3731_v40, %v3708_v47 }
 0x2c2   : > { %v3757_v5 = vpop.f32.mrf.mxu2  ;;  %v3709_v50 = vpop.f32.mrf.mxu0 }
 0x2c3   : > { %v3783_v33 = vpop.f32.mrf.mxu3  ;;  %v3733_v46 = vpop.f32.mrf.mxu1  ;;  %v3762_v60 = vadd.f32 %v3757_v5, %v3736_v12  ;;  %v3710_v59 = vadd.f32 %v3709_v50, %v3689_v56 }
 0x2c5   : > { %v3788_v8 = vadd.f32 %v3783_v33, %v3762_v60  ;;  %v3737_v54 = vadd.f32 %v3733_v46, %v3710_v59 }
 0x2ca   : > { %v3759_v52 = vpop.f32.mrf.mxu2  ;;  %v3809_v62 = vpop.f32.mrf.mxu0 }
 0x2cb   : > { %v3785_v44 = vpop.f32.mrf.mxu3  ;;  %v3814_v34 = vadd.f32 %v3809_v62, %v3788_v8  ;;  %v3836_v61 = vpop.f32.mrf.mxu1  ;;  %v3763_v58 = vadd.f32 %v3759_v52, %v3737_v54 }
 0x2cd   : > { %v3841_v15 = vadd.f32 %v3836_v61, %v3814_v34  ;;  %v3789_v6 = vadd.f32 %v3785_v44, %v3763_v58 }
 0x2d2   : > { %v3862_v4 = vpop.f32.mrf.mxu2  ;;  %v3811_v55 = vpop.f32.mrf.mxu0 }
 0x2d3   : > { %v3867_v14 = vadd.f32 %v3862_v4, %v3841_v15  ;;  %v3888_v63 = vpop.f32.mrf.mxu3  ;;  %v3815_v1 = vadd.f32 %v3811_v55, %v3789_v6  ;;  %v3838_v35 = vpop.f32.mrf.mxu1 }
 0x2d5   : > { %v3893_v7 = vadd.f32 %v3888_v63, %v3867_v14  ;;  %v3842_v36 = vadd.f32 %v3838_v35, %v3815_v1 }
 0x2d7   : > { %4564 = vst.msk [vmem:[%s5092_s22 + $0xf0] sm:$0xff] %vm385_vm2, %v3893_v7 }
 0x2da   : > { %v3864_v16 = vpop.f32.mrf.mxu2 }
 0x2db   : > { %v3868_v37 = vadd.f32 %v3864_v16, %v3842_v36  ;;  %v3890_v38 = vpop.f32.mrf.mxu3 }
 0x2dd   : > { %v3894_v49 = vadd.f32 %v3890_v38, %v3868_v37 }
 0x2df   : > { %4565 = vst.msk [vmem:[%s5092_s22 + $0xf8] sm:$0xff] %vm385_vm2, %v3894_v49 }
 0x2e0   : > { %4641 = shalt.err (!%p4638_p3)
}
 0x2e1   : > { %s4678_s3 = smov 128   ;;  %s4679_s22 = smov 8  }
 0x2e2   : > { %4573 = dma.vmem_to_hbm [thread:$0]  (%p4733_p5), %s3912_s8, 4096, %s3914_s14, %s3899_s13, %s4678_s3, %s4678_s3, %s4679_s22  }
 0x2e3 PF: > { %p4579_p4 = scmp.ge.s32.totalorder %s4676_s12, 2  ;;  %s3928_s28 = sand.u32 1, %s4664_s9  }
 0x2e4   : > { %s3929_s29 = scalar_lea.sflag [#allocation3], %s3928_s28 }
 0x2e5   : > { %p4576_p7 = pnand %p4579_p4, %p4737_p6 }
 0x2e7   : > { %p4577_p8 = pneg %p4576_p7 }
 0x2e9   : > { %4659 = dma.done.wait (%p4577_p8), %s3929_s29, 4096  }
 0x2ea   : > { %4661 = vsyncadd (%p4577_p8), %s3929_s29, 4294963200  ;;  %p12_p9 = scmp.ge.s32.totalorder %s4720_s15, 4   ;;  %s5895_s9 = smov %s4668_s10 }
 0x2eb   : > { %s5896_s10 = smov %s4672_s11  ;;  %s5897_s11 = smov %s4731_s18 }
 0x2ec   : > { %s5898_s12 = smov %s4720_s15  ;;  %14 = sbr.rel (!%p12_p9) target bundleno = 3 (0x3), region = 103 }
 0x2f1   :  { %3935 = vsyncpa [#allocation3], 1 }
 0x2f2   :  { %3937 = vsyncpa [#allocation3 + $0x1], 1 }

</bundles_post_ra>
